<compile_context>
chip_gen: v7x
topology: tpu7x:2x2x1
jax: 0.10.0
libtpu: 0.0.40
codegen_flags: <defaults>
</compile_context>

<pallas_src>
import numpy as np
import jax
import jax.numpy as jnp
from jax import lax
from jax.experimental import pallas as pl
from jax.experimental.pallas import tpu as pltpu


def mlp_kernel(x_ref,
               w1_ref, b1_ref,
               w2_ref, b2_ref,
               w3_ref, b3_ref,
               w4_ref, b4_ref,
               w5_ref, b5_ref,
               w6_ref, b6_ref,
               out_ref):
    """One batch tile through all 6 layers; weights are VMEM-resident."""

    def layer(h_bf16, w_ref, b_ref):
        # bf16 operands on the MXU, f32 accumulation; bias + ReLU in f32 (VPU).
        y = jnp.dot(h_bf16, w_ref[...], preferred_element_type=jnp.float32)
        y = jnp.maximum(y + b_ref[...], 0.0)
        # dropout(p=0.5) -> identity in eval mode
        return y.astype(jnp.bfloat16)

    # x arrives in its native dtype (f32 in the benchmark); cast on the VPU.
    h = x_ref[...].astype(jnp.bfloat16)          # (TB, in_dim)
    h = layer(h, w1_ref, b1_ref)                 # (TB, H)
    h = layer(h, w2_ref, b2_ref)                 # (TB, H/2)
    h = layer(h, w3_ref, b3_ref)                 # (TB, H/4)
    h = layer(h, w4_ref, b4_ref)                 # (TB, H/8)
    h = layer(h, w5_ref, b5_ref)                 # (TB, H/16)

    # Final (H/16 -> 1) layer on the VPU/XLU: weight stored as a (1, H/16) row,
    # broadcast-multiply then lane-reduce. Avoids an N=1 MXU push/pop per tile.
    w6 = w6_ref[...].astype(jnp.float32)                         # (1, H/16)
    y = jnp.sum(h.astype(jnp.float32) * w6, axis=-1, keepdims=True)
    y = y + b6_ref[...]                                          # (TB, 1) f32
    out_ref[...] = y.astype(out_ref.dtype)


def multilayer_nn_forward(x, params, *, block_batch=512):
    """x: [B, in_dim] (any float dtype);
    params: [(W1[in,H] bf16, b1[1,H] f32), ..., (W6[1,H/16] bf16, b6[1,1] f32)]."""
    B, in_dim = x.shape

    TB = min(block_batch, B)
    if B > TB:
        # Tiled case: keep TB a multiple of 128 (lane/sublane friendly on all
        # generations, required headroom for v5e bf16 (16,128) packing).
        TB = max(128, (TB // 128) * 128)
    grid = (pl.cdiv(B, TB),)

    flat_args = [x]
    in_specs = [pl.BlockSpec((TB, in_dim), lambda i: (i, 0))]
    for w, b in params:
        flat_args.extend([w, b])
        # Full-shape blocks + constant index_map -> weights stay VMEM-resident
        # across grid steps (no re-DMA per batch tile).
        in_specs.append(pl.BlockSpec(w.shape, lambda i: (0, 0)))
        in_specs.append(pl.BlockSpec(b.shape, lambda i: (0, 0)))

    return pl.pallas_call(
        mlp_kernel,
        out_shape=jax.ShapeDtypeStruct((B, 1), jnp.float32),
        grid=grid,
        in_specs=in_specs,
        out_specs=pl.BlockSpec((TB, 1), lambda i: (i, 0)),
        compiler_params=pltpu.CompilerParams(
            dimension_semantics=("parallel",)),
    )(*flat_args)


def init_params(sample_size, hidden_dim, key):
    """Torch-Linear-style init. Layers 1..5 store W transposed ([in, out]) in
    bf16; layer 6 stores W as a (1, in) row (VPU path). Biases stay f32."""
    in_dim = int(np.prod(sample_size))
    dims = [in_dim,
            hidden_dim,
            hidden_dim // 2,
            hidden_dim // 4,
            hidden_dim // 8,
            hidden_dim // 16,
            1]
    params = []
    for i in range(6):
        key, kw, kb = jax.random.split(key, 3)
        bound = 1.0 / np.sqrt(dims[i])
        w_shape = (dims[i], dims[i + 1]) if i < 5 else (1, dims[i])
        w = jax.random.uniform(kw, w_shape, minval=-bound, maxval=bound,
                               dtype=jnp.float32).astype(jnp.bfloat16)
        b = jax.random.uniform(kb, (1, dims[i + 1]),
                               minval=-bound, maxval=bound,
                               dtype=jnp.float32)
        params.append((w, b))
    return params


def reference_forward(x, params):
    """Pure-JAX reference with the same bf16-operand / f32-accumulate scheme."""
    h = x.astype(jnp.float32)
    n = len(params)
    for i, (w, b) in enumerate(params):
        h_q = h.astype(jnp.bfloat16).astype(jnp.float32)
        w_f = w.astype(jnp.float32)
        if i < n - 1:
            h = jnp.maximum(
                jnp.dot(h_q, w_f, precision=lax.Precision.HIGHEST) + b, 0.0)
        else:
            # Final layer weight is stored as a (1, in) row.
            h = jnp.dot(h_q, w_f.T, precision=lax.Precision.HIGHEST) + b
    return h


if __name__ == "__main__":
    key = jax.random.PRNGKey(0)
    key, kx = jax.random.split(key)

    sample_size = (16, 16)      # flattened input size = 256
    hidden_dim = 128            # layers: 256 -> 128 -> 64 -> 32 -> 16 -> 8 -> 1
    batch = 1024                # 2 grid steps of TB=512 (feeds both v7x TCs)

    params = init_params(sample_size, hidden_dim, key)
    x = jax.random.normal(kx, (batch, int(np.prod(sample_size))),
                          dtype=jnp.float32)          # native f32, no wrapper cast

    out = jax.block_until_ready(multilayer_nn_forward(x, params))
    ref = reference_forward(x, params)
    np.testing.assert_allclose(np.asarray(out), np.asarray(ref),
                               rtol=2e-3, atol=2e-3)

    # Remainder-tile check: B not a multiple of the 512-row batch tile.
    x_odd = x[:520]
    out_odd = jax.block_until_ready(multilayer_nn_forward(x_odd, params))
    np.testing.assert_allclose(np.asarray(out_odd), np.asarray(ref[:520]),
                               rtol=2e-3, atol=2e-3)

    print("KERNEL_OK")
</pallas_src>

<mosaic_0001>
module attributes {stable_mosaic.version = 11 : i64} {
  func.func @mlp_kernel(%arg0: i32, %arg1: memref<512x256xf32, #tpu.memory_space<vmem>>, %arg2: memref<256x128xbf16, #tpu.memory_space<vmem>>, %arg3: memref<1x128xf32, #tpu.memory_space<vmem>>, %arg4: memref<128x64xbf16, #tpu.memory_space<vmem>>, %arg5: memref<1x64xf32, #tpu.memory_space<vmem>>, %arg6: memref<64x32xbf16, #tpu.memory_space<vmem>>, %arg7: memref<1x32xf32, #tpu.memory_space<vmem>>, %arg8: memref<32x16xbf16, #tpu.memory_space<vmem>>, %arg9: memref<1x16xf32, #tpu.memory_space<vmem>>, %arg10: memref<16x8xbf16, #tpu.memory_space<vmem>>, %arg11: memref<1x8xf32, #tpu.memory_space<vmem>>, %arg12: memref<1x8xbf16, #tpu.memory_space<vmem>>, %arg13: memref<1x1xf32, #tpu.memory_space<vmem>>, %arg14: memref<512x1xf32, #tpu.memory_space<vmem>>) attributes {dimension_semantics = [#tpu.dimension_semantics<parallel>], iteration_bounds = array<i64: 2>, scalar_prefetch = 0 : i64, scratch_operands = 0 : i64, tpu.core_type = #tpu.core_type<tc>, window_params = [{transform_indices = @transform_0, window_bounds = array<i64: 512, 256>}, {pipeline_mode = #tpu.pipeline_mode<synchronous>, transform_indices = @transform_1, window_bounds = array<i64: 256, 128>}, {pipeline_mode = #tpu.pipeline_mode<synchronous>, transform_indices = @transform_2, window_bounds = array<i64: 1, 128>}, {pipeline_mode = #tpu.pipeline_mode<synchronous>, transform_indices = @transform_3, window_bounds = array<i64: 128, 64>}, {pipeline_mode = #tpu.pipeline_mode<synchronous>, transform_indices = @transform_4, window_bounds = array<i64: 1, 64>}, {pipeline_mode = #tpu.pipeline_mode<synchronous>, transform_indices = @transform_5, window_bounds = array<i64: 64, 32>}, {pipeline_mode = #tpu.pipeline_mode<synchronous>, transform_indices = @transform_6, window_bounds = array<i64: 1, 32>}, {pipeline_mode = #tpu.pipeline_mode<synchronous>, transform_indices = @transform_7, window_bounds = array<i64: 32, 16>}, {pipeline_mode = #tpu.pipeline_mode<synchronous>, transform_indices = @transform_8, window_bounds = array<i64: 1, 16>}, {pipeline_mode = #tpu.pipeline_mode<synchronous>, transform_indices = @transform_9, window_bounds = array<i64: 16, 8>}, {pipeline_mode = #tpu.pipeline_mode<synchronous>, transform_indices = @transform_10, window_bounds = array<i64: 1, 8>}, {pipeline_mode = #tpu.pipeline_mode<synchronous>, transform_indices = @transform_11, window_bounds = array<i64: 1, 8>}, {pipeline_mode = #tpu.pipeline_mode<synchronous>, transform_indices = @transform_12, window_bounds = array<i64: 1, 1>}, {transform_indices = @transform_13, window_bounds = array<i64: 512, 1>}]} {
    %c0 = arith.constant 0 : index
    %c0_0 = arith.constant 0 : index
    %0 = vector.load %arg1[%c0, %c0_0] : memref<512x256xf32, #tpu.memory_space<vmem>>, vector<512x256xf32>
    %1 = arith.truncf %0 : vector<512x256xf32> to vector<512x256xbf16>
    %c0_1 = arith.constant 0 : index
    %c0_2 = arith.constant 0 : index
    %2 = vector.load %arg2[%c0_1, %c0_2] : memref<256x128xbf16, #tpu.memory_space<vmem>>, vector<256x128xbf16>
    %cst = arith.constant dense<0.000000e+00> : vector<512x128xf32>
    %3 = tpu.matmul %1, %2, %cst {dimension_numbers = #tpu.dot_dimension_numbers<[1], [0], [0], [1], [0, 0, 1, 1], [], []>} : vector<512x256xbf16>, vector<256x128xbf16>, vector<512x128xf32> -> vector<512x128xf32>
    %c0_3 = arith.constant 0 : index
    %c0_4 = arith.constant 0 : index
    %4 = vector.load %arg3[%c0_3, %c0_4] : memref<1x128xf32, #tpu.memory_space<vmem>>, vector<1x128xf32>
    %5 = vector.broadcast %4 : vector<1x128xf32> to vector<512x128xf32>
    %6 = arith.addf %3, %5 : vector<512x128xf32>
    %cst_5 = arith.constant 0.000000e+00 : f32
    %7 = vector.broadcast %cst_5 : f32 to vector<512x128xf32>
    %8 = arith.maximumf %6, %7 : vector<512x128xf32>
    %9 = arith.truncf %8 : vector<512x128xf32> to vector<512x128xbf16>
    %c0_6 = arith.constant 0 : index
    %c0_7 = arith.constant 0 : index
    %10 = vector.load %arg4[%c0_6, %c0_7] : memref<128x64xbf16, #tpu.memory_space<vmem>>, vector<128x64xbf16>
    %cst_8 = arith.constant dense<0.000000e+00> : vector<512x64xf32>
    %11 = tpu.matmul %9, %10, %cst_8 {dimension_numbers = #tpu.dot_dimension_numbers<[1], [0], [0], [1], [0, 0, 1, 1], [], []>} : vector<512x128xbf16>, vector<128x64xbf16>, vector<512x64xf32> -> vector<512x64xf32>
    %c0_9 = arith.constant 0 : index
    %c0_10 = arith.constant 0 : index
    %12 = vector.load %arg5[%c0_9, %c0_10] : memref<1x64xf32, #tpu.memory_space<vmem>>, vector<1x64xf32>
    %13 = vector.broadcast %12 : vector<1x64xf32> to vector<512x64xf32>
    %14 = arith.addf %11, %13 : vector<512x64xf32>
    %cst_11 = arith.constant 0.000000e+00 : f32
    %15 = vector.broadcast %cst_11 : f32 to vector<512x64xf32>
    %16 = arith.maximumf %14, %15 : vector<512x64xf32>
    %17 = arith.truncf %16 : vector<512x64xf32> to vector<512x64xbf16>
    %c0_12 = arith.constant 0 : index
    %c0_13 = arith.constant 0 : index
    %18 = vector.load %arg6[%c0_12, %c0_13] : memref<64x32xbf16, #tpu.memory_space<vmem>>, vector<64x32xbf16>
    %cst_14 = arith.constant dense<0.000000e+00> : vector<512x32xf32>
    %19 = tpu.matmul %17, %18, %cst_14 {dimension_numbers = #tpu.dot_dimension_numbers<[1], [0], [0], [1], [0, 0, 1, 1], [], []>} : vector<512x64xbf16>, vector<64x32xbf16>, vector<512x32xf32> -> vector<512x32xf32>
    %c0_15 = arith.constant 0 : index
    %c0_16 = arith.constant 0 : index
    %20 = vector.load %arg7[%c0_15, %c0_16] : memref<1x32xf32, #tpu.memory_space<vmem>>, vector<1x32xf32>
    %21 = vector.broadcast %20 : vector<1x32xf32> to vector<512x32xf32>
    %22 = arith.addf %19, %21 : vector<512x32xf32>
    %cst_17 = arith.constant 0.000000e+00 : f32
    %23 = vector.broadcast %cst_17 : f32 to vector<512x32xf32>
    %24 = arith.maximumf %22, %23 : vector<512x32xf32>
    %25 = arith.truncf %24 : vector<512x32xf32> to vector<512x32xbf16>
    %c0_18 = arith.constant 0 : index
    %c0_19 = arith.constant 0 : index
    %26 = vector.load %arg8[%c0_18, %c0_19] : memref<32x16xbf16, #tpu.memory_space<vmem>>, vector<32x16xbf16>
    %cst_20 = arith.constant dense<0.000000e+00> : vector<512x16xf32>
    %27 = tpu.matmul %25, %26, %cst_20 {dimension_numbers = #tpu.dot_dimension_numbers<[1], [0], [0], [1], [0, 0, 1, 1], [], []>} : vector<512x32xbf16>, vector<32x16xbf16>, vector<512x16xf32> -> vector<512x16xf32>
    %c0_21 = arith.constant 0 : index
    %c0_22 = arith.constant 0 : index
    %28 = vector.load %arg9[%c0_21, %c0_22] : memref<1x16xf32, #tpu.memory_space<vmem>>, vector<1x16xf32>
    %29 = vector.broadcast %28 : vector<1x16xf32> to vector<512x16xf32>
    %30 = arith.addf %27, %29 : vector<512x16xf32>
    %cst_23 = arith.constant 0.000000e+00 : f32
    %31 = vector.broadcast %cst_23 : f32 to vector<512x16xf32>
    %32 = arith.maximumf %30, %31 : vector<512x16xf32>
    %33 = arith.truncf %32 : vector<512x16xf32> to vector<512x16xbf16>
    %c0_24 = arith.constant 0 : index
    %c0_25 = arith.constant 0 : index
    %34 = vector.load %arg10[%c0_24, %c0_25] : memref<16x8xbf16, #tpu.memory_space<vmem>>, vector<16x8xbf16>
    %cst_26 = arith.constant dense<0.000000e+00> : vector<512x8xf32>
    %35 = tpu.matmul %33, %34, %cst_26 {dimension_numbers = #tpu.dot_dimension_numbers<[1], [0], [0], [1], [0, 0, 1, 1], [], []>} : vector<512x16xbf16>, vector<16x8xbf16>, vector<512x8xf32> -> vector<512x8xf32>
    %c0_27 = arith.constant 0 : index
    %c0_28 = arith.constant 0 : index
    %36 = vector.load %arg11[%c0_27, %c0_28] : memref<1x8xf32, #tpu.memory_space<vmem>>, vector<1x8xf32>
    %37 = vector.broadcast %36 : vector<1x8xf32> to vector<512x8xf32>
    %38 = arith.addf %35, %37 : vector<512x8xf32>
    %cst_29 = arith.constant 0.000000e+00 : f32
    %39 = vector.broadcast %cst_29 : f32 to vector<512x8xf32>
    %40 = arith.maximumf %38, %39 : vector<512x8xf32>
    %41 = arith.truncf %40 : vector<512x8xf32> to vector<512x8xbf16>
    %c0_30 = arith.constant 0 : index
    %c0_31 = arith.constant 0 : index
    %42 = vector.load %arg12[%c0_30, %c0_31] : memref<1x8xbf16, #tpu.memory_space<vmem>>, vector<1x8xbf16>
    %43 = arith.extf %42 : vector<1x8xbf16> to vector<1x8xf32>
    %44 = arith.extf %41 : vector<512x8xbf16> to vector<512x8xf32>
    %45 = vector.broadcast %43 : vector<1x8xf32> to vector<512x8xf32>
    %46 = arith.mulf %44, %45 : vector<512x8xf32>
    %cst_32 = arith.constant dense<0.000000e+00> : vector<512xf32>
    %47 = vector.multi_reduction <add>, %46, %cst_32 [1] : vector<512x8xf32> to vector<512xf32>
    %48 = vector.shape_cast %47 : vector<512xf32> to vector<512x1xf32>
    %c0_33 = arith.constant 0 : index
    %c0_34 = arith.constant 0 : index
    %49 = vector.load %arg13[%c0_33, %c0_34] : memref<1x1xf32, #tpu.memory_space<vmem>>, vector<1x1xf32>
    %50 = vector.broadcast %49 : vector<1x1xf32> to vector<512x1xf32>
    %51 = arith.addf %48, %50 : vector<512x1xf32>
    %c0_35 = arith.constant 0 : index
    %c0_36 = arith.constant 0 : index
    %52 = vector.load %arg14[%c0_35, %c0_36] : memref<512x1xf32, #tpu.memory_space<vmem>>, vector<512x1xf32>
    tpu.vector_store %arg14[%c0_35, %c0_36], %51 {strides = array<i32>} : memref<512x1xf32, #tpu.memory_space<vmem>>, vector<512x1xf32>,
    return
  }
  func.func @transform_0(%arg0: i32) -> (i32, i32) {
    %c0_i32 = arith.constant 0 : i32
    %c0_i32_0 = arith.constant 0 : i32
    return %arg0, %c0_i32 : i32, i32
  }
  func.func @transform_1(%arg0: i32) -> (i32, i32) {
    %c0_i32 = arith.constant 0 : i32
    %c0_i32_0 = arith.constant 0 : i32
    %c0_i32_1 = arith.constant 0 : i32
    return %c0_i32, %c0_i32_0 : i32, i32
  }
  func.func @transform_2(%arg0: i32) -> (i32, i32) {
    %c0_i32 = arith.constant 0 : i32
    %c0_i32_0 = arith.constant 0 : i32
    %c0_i32_1 = arith.constant 0 : i32
    return %c0_i32, %c0_i32_0 : i32, i32
  }
  func.func @transform_3(%arg0: i32) -> (i32, i32) {
    %c0_i32 = arith.constant 0 : i32
    %c0_i32_0 = arith.constant 0 : i32
    %c0_i32_1 = arith.constant 0 : i32
    return %c0_i32, %c0_i32_0 : i32, i32
  }
  func.func @transform_4(%arg0: i32) -> (i32, i32) {
    %c0_i32 = arith.constant 0 : i32
    %c0_i32_0 = arith.constant 0 : i32
    %c0_i32_1 = arith.constant 0 : i32
    return %c0_i32, %c0_i32_0 : i32, i32
  }
  func.func @transform_5(%arg0: i32) -> (i32, i32) {
    %c0_i32 = arith.constant 0 : i32
    %c0_i32_0 = arith.constant 0 : i32
    %c0_i32_1 = arith.constant 0 : i32
    return %c0_i32, %c0_i32_0 : i32, i32
  }
  func.func @transform_6(%arg0: i32) -> (i32, i32) {
    %c0_i32 = arith.constant 0 : i32
    %c0_i32_0 = arith.constant 0 : i32
    %c0_i32_1 = arith.constant 0 : i32
    return %c0_i32, %c0_i32_0 : i32, i32
  }
  func.func @transform_7(%arg0: i32) -> (i32, i32) {
    %c0_i32 = arith.constant 0 : i32
    %c0_i32_0 = arith.constant 0 : i32
    %c0_i32_1 = arith.constant 0 : i32
    return %c0_i32, %c0_i32_0 : i32, i32
  }
  func.func @transform_8(%arg0: i32) -> (i32, i32) {
    %c0_i32 = arith.constant 0 : i32
    %c0_i32_0 = arith.constant 0 : i32
    %c0_i32_1 = arith.constant 0 : i32
    return %c0_i32, %c0_i32_0 : i32, i32
  }
  func.func @transform_9(%arg0: i32) -> (i32, i32) {
    %c0_i32 = arith.constant 0 : i32
    %c0_i32_0 = arith.constant 0 : i32
    %c0_i32_1 = arith.constant 0 : i32
    return %c0_i32, %c0_i32_0 : i32, i32
  }
  func.func @transform_10(%arg0: i32) -> (i32, i32) {
    %c0_i32 = arith.constant 0 : i32
    %c0_i32_0 = arith.constant 0 : i32
    %c0_i32_1 = arith.constant 0 : i32
    return %c0_i32, %c0_i32_0 : i32, i32
  }
  func.func @transform_11(%arg0: i32) -> (i32, i32) {
    %c0_i32 = arith.constant 0 : i32
    %c0_i32_0 = arith.constant 0 : i32
    %c0_i32_1 = arith.constant 0 : i32
    return %c0_i32, %c0_i32_0 : i32, i32
  }
  func.func @transform_12(%arg0: i32) -> (i32, i32) {
    %c0_i32 = arith.constant 0 : i32
    %c0_i32_0 = arith.constant 0 : i32
    %c0_i32_1 = arith.constant 0 : i32
    return %c0_i32, %c0_i32_0 : i32, i32
  }
  func.func @transform_13(%arg0: i32) -> (i32, i32) {
    %c0_i32 = arith.constant 0 : i32
    %c0_i32_0 = arith.constant 0 : i32
    return %arg0, %c0_i32 : i32, i32
  }
}

</mosaic_0001>

<bundles_post_ra>
// kernel: tpu_custom_call.1
= control target key start
LH: loop header
LB: loop body
LE: loop exit
PB: predicated region body
PF: predicated region fallthrough
CT: control target
= control target key end

     0   :  { %s5590_s0 = inlined_call_operand.hbm [shape: f32[1024,256], index: 0, kind: input, shape index: {}]   ;;  %s5591_s1 = inlined_call_operand.vmem [shape: bf16[256,128], index: 1, kind: input, shape index: {}]   ;;  %s5592_s2 = inlined_call_operand.vmem [shape: f32[1,128], index: 2, kind: input, shape index: {}]   ;;  %s5593_s3 = inlined_call_operand.vmem [shape: bf16[128,64], index: 3, kind: input, shape index: {}]   ;;  %s5594_s4 = inlined_call_operand.vmem [shape: f32[1,64], index: 4, kind: input, shape index: {}]   ;;  %s5595_s5 = inlined_call_operand.vmem [shape: bf16[64,32], index: 5, kind: input, shape index: {}]   ;;  %s5596_s6 = inlined_call_operand.vmem [shape: f32[1,32], index: 6, kind: input, shape index: {}]   ;;  %s5597_s7 = inlined_call_operand.vmem [shape: bf16[32,16], index: 7, kind: input, shape index: {}]   ;;  %s5598_s8 = inlined_call_operand.vmem [shape: f32[1,16], index: 8, kind: input, shape index: {}]   ;;  %s5599_s9 = inlined_call_operand.vmem [shape: bf16[16,8], index: 9, kind: input, shape index: {}]   ;;  %s5600_s10 = inlined_call_operand.vmem [shape: f32[1,8], index: 10, kind: input, shape index: {}]   ;;  %s5601_s11 = inlined_call_operand.vmem [shape: bf16[1,8], index: 11, kind: input, shape index: {}]   ;;  %s5602_s12 = inlined_call_operand.<no memory space> [shape: f32[1,1], index: 12, kind: input, shape index: {}]   ;;  %s5603_s13 = inlined_call_operand.vmem [shape: f32[1024,1], index: 13, kind: output, shape index: {}]  }
   0x1   :  { %v18_v0 = vstv %s5602_s12 }
   0x2   :  { %19 = vst [vmem:[#allocation2] sm:$0x1] %v18_v0 }
   0x3   :  { %20 = vsyncpa [#allocation4], 0 }
   0x4   :  { %22 = vsyncpa [#allocation4 + $0x1], 0  ;;  %s4485_s27 = smov 0   ;;  %s4487_s28 = smov 0  }
   0x5   :  { %s4489_s29 = smov 0   ;;  %s4491_s30 = smov 0  }
   0x6 LB: > { %s3688_s12 = sadd.s32 4294967295, %s4406_s30   ;;  %s4505_s14 = sadd.s32 1, %s4406_s30   ;;  %s4406_s30 = sphi %s4491_s30, %s5610_s30   ;;  %s4402_s29 = sphi %s4489_s29, %s5609_s29   ;;  %s4398_s28 = sphi %s4487_s28, %s5608_s28   ;;  %s4394_s27 = sphi %s4485_s27, %s5607_s27  }
   0x7   : > { %s32_s15 = ssub.s32 %s4406_s30, %s4505_s14  ;;  %s35_s16 = sadd.s32 1, %s4402_s29 }
   0x8   : > { %p33_p0 = scmp.eq.s32.totalorder %s32_s15, 0  ;;  %p42_p1 = scmp.ne.s32.totalorder %s4402_s29, %s4398_s28 }
   0x9   : > { %p43_p2 = scmp.eq.s32.totalorder %s4406_s30, 0  ;;  %p48_p3 = scmp.ne.s32.totalorder %s4398_s28, %s4394_s27 }
   0xa   : > { %s4515_s17 = scalar_select %p33_p0, %s4402_s29, %s35_s16  }
   0xb   : > { %p44_p4 = por %p43_p2, %p42_p1  ;;  %p49_p5 = scmp.eq.s32.totalorder %s3688_s12, 0 }
   0xc   : > { %p4274_p6 = scmp.lt.s32.totalorder %s4406_s30, 2  ;;  %s386_s19 = sand.u32 1, %s4402_s29  }
   0xd   : > { %p4520_p7 = por %p49_p5, %p48_p3  ;;  %s3692_s20 = sshll.u32 %s386_s19, 10 }
   0xe   : > { %s3836_s21 = sshll.u32 %s4406_s30, 14  ;;  %s390_s25 = scalar_lea.vmem [#allocation3], %s3692_s20 }
   0xf   : > { %s4529_s24 = scalar_lea.hbm %s5590_s0, %s3836_s21  ;;  %s398_s26 = sshll.u32 %s390_s25, 4  ;;  %s4531_s26 = int_to_ptr.vmem [resolvable:$true] %s398_s26 }
  0x10   : > { %p4533_p8 = pnand %p4274_p6, %p44_p4  ;;  %s4538_s15 = scalar_lea.sflag [#allocation4], %s386_s19 }
  0x11   : > { %s4342_s16 = scalar_lea.hbm %s4529_s24, 16384  ;;  %s4347_s22 = scalar_lea.hbm %s5590_s0, 32768 }
  0x12   : > { %p4343_p10 = scmp.ne.s32.totalorder %s4529_s24, %s4342_s16  ;;  %p4344_p11 = pneg %p4533_p8 }
  0x13   : > { %p4348_p0 = scmp.lt.u32.totalorder %s4529_s24, %s5590_s0  ;;  %p4349_p1 = scmp.lt.u32.totalorder %s4347_s22, %s4342_s16 }
  0x14   : > { %p4345_p12 = pnand %p4344_p11, %p4343_p10  ;;  %p4351_p3 = scmp.lt.u32.totalorder %s4342_s16, %s4529_s24 }
  0x15   : > { %p4350_p2 = por %p4349_p1, %p4348_p0 }
  0x16   : > { %p4346_p13 = pneg %p4345_p12 }
  0x17   : > { %p4352_p4 = por %p4351_p3, %p4350_p2 }
  0x19   : > { %p4353_p5 = pnand %p4352_p4, %p4346_p13 }
  0x1b   : > { %4356 = shalt.err (!%p4353_p5)
}
  0x1c   : > { %s4357_s19 = scalar_lea.vmem %s4531_s26, 16384  ;;  %s4408_s20 = smov [#allocation3]  }
  0x1d   : > { %p4358_p6 = scmp.ne.s32.totalorder %s4531_s26, %s4357_s19  ;;  %s4362_s21 = sshll.u32 %s4408_s20, 4  ;;  %s4363_s21 = int_to_ptr.vmem [resolvable:$false] %s4362_s21 }
  0x1e   : > { %s4364_s23 = scalar_lea.vmem %s4363_s21, 32768  ;;  %p4365_p9 = scmp.lt.s32.totalorder %s4531_s26, %s4363_s21 }
  0x1f   : > { %p4360_p10 = pnand %p4358_p6, %p4344_p11  ;;  %p4366_p0 = scmp.lt.s32.totalorder %s4364_s23, %s4357_s19 }
  0x21   : > { %p4361_p12 = pneg %p4360_p10  ;;  %p4367_p1 = por %p4366_p0, %p4365_p9 }
  0x23   : > { %p4368_p2 = pnand %p4367_p1, %p4361_p12 }
  0x25   : > { %4371 = shalt.err (!%p4368_p2)
}
  0x26   : > { %s4409_s16 = smov 256   ;;  %s4410_s22 = smov 16  }
  0x27   : > { %4273 = dma.hbm_to_vmem [thread:$0]  (!%p4533_p8), %s4529_s24, 16384, %s4531_s26, %s4538_s15, %s4409_s16, %s4409_s16, %s4410_s22  }
  0x28   : > { %p406_p11 = scmp.lt.s32.totalorder %s4406_s30, 3  ;;  %p5606_p13 = scmp.ge.s32.totalorder %s4406_s30, 1 }
  0x2a   : > { %p407_p3 = pnand %p5606_p13, %p406_p11 }
  0x2b   : > { %s412_s25 = sand.u32 (!%p407_p3), 1, %s4398_s28  }
  0x2c   : > { %410 = sbr.rel (%p407_p3) target bundleno = 1626 (0x65a), region = 72  ;;  %s3697_s19 = sshll.u32 (!%p407_p3), %s412_s25, 10 }
  0x2d   : > { %s413_s20 = scalar_lea.sflag (!%p407_p3), [#allocation4], %s412_s25  ;;  %s4570_s21 = scalar_lea.vmem (!%p407_p3), [#allocation3], %s3697_s19 }
  0x33   : > { %4389 = dma.done.wait (%p4520_p7), %s413_s20, 16384  }
  0x34   : > { %4391 = vsyncadd (%p4520_p7), %s413_s20, 4294950912  ;;  %v4411_v1 = vmov 0   ;;  %v4310_v2 = vld [vmem:[%s5591_s1] sm:$0xff]   ;;  %v4311_v3 = vld [vmem:[%s5591_s1 + $0x8] sm:$0xff]   ;;  %vm1674_vm0 = vcmask 523264   ;;  %vm2179_vm1 = vcmask 261120  }
  0x35   : > { %794 = vmatprep.subr.bf16.mxu0 %v4411_v1  ;;  %v4312_v4 = vld [vmem:[%s5591_s1 + $0x10] sm:$0xff]   ;;  %v4313_v5 = vld [vmem:[%s5591_s1 + $0x18] sm:$0xff]   ;;  %v4314_v6 = vld [vmem:[%s5591_s1 + $0x20] sm:$0xff]   ;;  %vm2676_vm2 = vcmask 130048   ;;  %vm3292_vm3 = vcmask 64512   ;;  %vm3556_vm4 = vcmask 7168  }
  0x36   : > { %795 = vmatpush1.bf16.msra.mxu0 %v4310_v2  ;;  %v468_v7 = vld [vmem:[%s4570_s21 + $0x8] sm:$0xff]  ;;  %v470_v8 = vld [vmem:[%s4570_s21 + $0x18] sm:$0xff]  ;;  %v467_v21 = vld [vmem:[%s4570_s21] sm:$0xff] }
  0x37   : > { %796 = vmatprep.subr.bf16.mxu0 %v4411_v1  ;;  %v596_v9 = vpack.c.bf16 %v470_v8, %v468_v7  ;;  %v4315_v10 = vld [vmem:[%s5591_s1 + $0x28] sm:$0xff]   ;;  %v4316_v11 = vld [vmem:[%s5591_s1 + $0x30] sm:$0xff]   ;;  %v4317_v12 = vld [vmem:[%s5591_s1 + $0x38] sm:$0xff]  }
  0x38   : > { %v4318_v13 = vld [vmem:[%s5591_s1 + $0x40] sm:$0xff]   ;;  %v4319_v14 = vld [vmem:[%s5591_s1 + $0x48] sm:$0xff]   ;;  %v4320_v15 = vld [vmem:[%s5591_s1 + $0x50] sm:$0xff]  }
  0x39   : > { %826 = vmatprep.mubr.bf16.mxu0 %v596_v9  ;;  %v4321_v16 = vld [vmem:[%s5591_s1 + $0x58] sm:$0xff]   ;;  %v4322_v17 = vld [vmem:[%s5591_s1 + $0x60] sm:$0xff]   ;;  %v4323_v18 = vld [vmem:[%s5591_s1 + $0x68] sm:$0xff]  }
  0x3a   : > { %797 = vmatpush1.bf16.msra.mxu0 %v4311_v3  ;;  %v4324_v19 = vld [vmem:[%s5591_s1 + $0x70] sm:$0xff]   ;;  %v4325_v20 = vld [vmem:[%s5591_s1 + $0x78] sm:$0xff]   ;;  %v471_v27 = vld [vmem:[%s4570_s21 + $0x20] sm:$0xff] }
  0x3b   : > { %798 = vmatprep.subr.bf16.mxu0 %v4411_v1  ;;  %v469_v22 = vld [vmem:[%s4570_s21 + $0x10] sm:$0xff]  ;;  %v472_v23 = vld [vmem:[%s4570_s21 + $0x28] sm:$0xff]  ;;  %v474_v24 = vld [vmem:[%s4570_s21 + $0x38] sm:$0xff] }
  0x3c   : > { %v595_v25 = vpack.c.bf16 %v469_v22, %v467_v21  ;;  %v598_v26 = vpack.c.bf16 %v474_v24, %v472_v23  ;;  %v473_v28 = vld [vmem:[%s4570_s21 + $0x30] sm:$0xff]  ;;  %v476_v29 = vld [vmem:[%s4570_s21 + $0x48] sm:$0xff]  ;;  %v478_v30 = vld [vmem:[%s4570_s21 + $0x58] sm:$0xff] }
  0x3d   : > { %v597_v31 = vpack.c.bf16 %v473_v28, %v471_v27  ;;  %v600_v32 = vpack.c.bf16 %v478_v30, %v476_v29  ;;  %v475_v33 = vld [vmem:[%s4570_s21 + $0x40] sm:$0xff]  ;;  %v477_v34 = vld [vmem:[%s4570_s21 + $0x50] sm:$0xff]  ;;  %v480_v35 = vld [vmem:[%s4570_s21 + $0x68] sm:$0xff] }
  0x3e   : > { %799 = vmatpush1.bf16.msra.mxu0 %v4312_v4  ;;  %v482_v36 = vld [vmem:[%s4570_s21 + $0x78] sm:$0xff]  ;;  %v599_v37 = vpack.c.bf16 %v477_v34, %v475_v33  ;;  %v479_v39 = vld [vmem:[%s4570_s21 + $0x60] sm:$0xff]  ;;  %v481_v40 = vld [vmem:[%s4570_s21 + $0x70] sm:$0xff] }
  0x3f   : > { %800 = vmatprep.subr.bf16.mxu0 %v4411_v1  ;;  %v602_v38 = vpack.c.bf16 %v482_v36, %v480_v35  ;;  %v484_v41 = vld [vmem:[%s4570_s21 + $0x88] sm:$0xff]  ;;  %v486_v42 = vld [vmem:[%s4570_s21 + $0x98] sm:$0xff]  ;;  %v601_v43 = vpack.c.bf16 %v481_v40, %v479_v39  ;;  %v483_v45 = vld [vmem:[%s4570_s21 + $0x80] sm:$0xff] }
  0x40   : > { %v604_v44 = vpack.c.bf16 %v486_v42, %v484_v41  ;;  %v485_v46 = vld [vmem:[%s4570_s21 + $0x90] sm:$0xff]  ;;  %v488_v47 = vld [vmem:[%s4570_s21 + $0xa8] sm:$0xff]  ;;  %v490_v48 = vld [vmem:[%s4570_s21 + $0xb8] sm:$0xff] }
  0x41   : > { %v603_v49 = vpack.c.bf16 %v485_v46, %v483_v45  ;;  %v606_v50 = vpack.c.bf16 %v490_v48, %v488_v47  ;;  %v487_v51 = vld [vmem:[%s4570_s21 + $0xa0] sm:$0xff]  ;;  %v489_v52 = vld [vmem:[%s4570_s21 + $0xb0] sm:$0xff]  ;;  %v492_v53 = vld [vmem:[%s4570_s21 + $0xc8] sm:$0xff] }
  0x42   : > { %801 = vmatpush1.bf16.msra.mxu0 %v4313_v5  ;;  %v494_v54 = vld [vmem:[%s4570_s21 + $0xd8] sm:$0xff]  ;;  %v605_v55 = vpack.c.bf16 %v489_v52, %v487_v51  ;;  %v491_v57 = vld [vmem:[%s4570_s21 + $0xc0] sm:$0xff]  ;;  %v493_v58 = vld [vmem:[%s4570_s21 + $0xd0] sm:$0xff] }
  0x43   : > { %802 = vmatprep.subr.bf16.mxu0 %v4411_v1  ;;  %v608_v56 = vpack.c.bf16 %v494_v54, %v492_v53  ;;  %v496_v59 = vld [vmem:[%s4570_s21 + $0xe8] sm:$0xff]  ;;  %v498_v60 = vld [vmem:[%s4570_s21 + $0xf8] sm:$0xff]  ;;  %v607_v61 = vpack.c.bf16 %v493_v58, %v491_v57  ;;  %v495_v63 = vld [vmem:[%s4570_s21 + $0xe0] sm:$0xff] }
  0x44   : > { %v610_v62 = vpack.c.bf16 %v498_v60, %v496_v59  ;;  %v497_v0 = vld [vmem:[%s4570_s21 + $0xf0] sm:$0xff]  ;;  %v502_v2 = vld [vmem:[%s4570_s21 + $0x118] sm:$0xff]  ;;  %v499_v5 = vld [vmem:[%s4570_s21 + $0x100] sm:$0xff] }
  0x45   : > { %v609_v3 = vpack.c.bf16 %v497_v0, %v495_v63  ;;  %v504_v7 = vld [vmem:[%s4570_s21 + $0x128] sm:$0xff]  ;;  %v506_v8 = vld [vmem:[%s4570_s21 + $0x138] sm:$0xff]  ;;  %v509_v21 = vld [vmem:[%s4570_s21 + $0x150] sm:$0xff] }
  0x46   : > { %803 = vmatpush1.bf16.msra.mxu0 %v4314_v6  ;;  %v501_v6 = vld [vmem:[%s4570_s21 + $0x110] sm:$0xff]  ;;  %v512_v22 = vld [vmem:[%s4570_s21 + $0x168] sm:$0xff]  ;;  %v514_v23 = vld [vmem:[%s4570_s21 + $0x178] sm:$0xff] }
  0x47   : > { %804 = vmatprep.subr.bf16.mxu0 %v4411_v1  ;;  %v611_v9 = vpack.c.bf16 %v501_v6, %v499_v5  ;;  %v511_v27 = vld [vmem:[%s4570_s21 + $0x160] sm:$0xff]  ;;  %v513_v28 = vld [vmem:[%s4570_s21 + $0x170] sm:$0xff]  ;;  %v516_v29 = vld [vmem:[%s4570_s21 + $0x188] sm:$0xff] }
  0x48   : > { %v518_v30 = vld [vmem:[%s4570_s21 + $0x198] sm:$0xff]  ;;  %v4331_v34 = vld [vmem:[%s5593_s3 + $0x28] sm:$0xff]   ;;  %v517_v36 = vld [vmem:[%s4570_s21 + $0x190] sm:$0xff] }
  0x49   : > { %v620_v33 = vpack.c.bf16 %v518_v30, %v516_v29  ;;  %v515_v35 = vld [vmem:[%s4570_s21 + $0x180] sm:$0xff]  ;;  %v4332_v39 = vld [vmem:[%s5593_s3 + $0x30] sm:$0xff]   ;;  %v4333_v42 = vld [vmem:[%s5593_s3 + $0x38] sm:$0xff]  }
  0x4a   : > { %805 = vmatpush1.bf16.msra.mxu0 %v4315_v10  ;;  %v614_v10 = vpack.c.bf16 %v506_v8, %v504_v7  ;;  %v619_v40 = vpack.c.bf16 %v517_v36, %v515_v35  ;;  %v524_v45 = vld [vmem:[%s4570_s21 + $0x1c8] sm:$0xff]  ;;  %v526_v46 = vld [vmem:[%s4570_s21 + $0x1d8] sm:$0xff] }
  0x4b   : > { %806 = vmatprep.subr.bf16.mxu0 %v4411_v1  ;;  %v624_v48 = vpack.c.bf16 %v526_v46, %v524_v45  ;;  %v528_v51 = vld [vmem:[%s4570_s21 + $0x1e8] sm:$0xff]  ;;  %v530_v52 = vld [vmem:[%s4570_s21 + $0x1f8] sm:$0xff]  ;;  %v563_v45 = vld [vmem:[%s4570_s21 + $0x300] sm:$0xff] }
  0x4c   : > { %v626_v54 = vpack.c.bf16 %v530_v52, %v528_v51  ;;  %v532_v57 = vld [vmem:[%s4570_s21 + $0x208] sm:$0xff]  ;;  %v534_v58 = vld [vmem:[%s4570_s21 + $0x218] sm:$0xff]  ;;  %v565_v46 = vld [vmem:[%s4570_s21 + $0x310] sm:$0xff] }
  0x4d   : > { %v628_v60 = vpack.c.bf16 %v534_v58, %v532_v57  ;;  %v536_v63 = vld [vmem:[%s4570_s21 + $0x228] sm:$0xff]  ;;  %v538_v0 = vld [vmem:[%s4570_s21 + $0x238] sm:$0xff]  ;;  %v567_v51 = vld [vmem:[%s4570_s21 + $0x320] sm:$0xff] }
  0x4e   : > { %807 = vmatpush1.bf16.msra.mxu0 %v4316_v11  ;;  %v4326_v11 = vld [vmem:[%s5593_s3] sm:$0xff]   ;;  %v540_v5 = vld [vmem:[%s4570_s21 + $0x248] sm:$0xff]  ;;  %v569_v52 = vld [vmem:[%s4570_s21 + $0x330] sm:$0xff] }
  0x4f   : > { %808 = vmatprep.subr.bf16.mxu0 %v4411_v1  ;;  %3980 = vmatprep.subr.bf16.mxu1 %v4326_v11  ;;  %v542_v6 = vld [vmem:[%s4570_s21 + $0x258] sm:$0xff]  ;;  %v556_v29 = vld [vmem:[%s4570_s21 + $0x2c8] sm:$0xff]  ;;  %v571_v57 = vld [vmem:[%s4570_s21 + $0x340] sm:$0xff] }
  0x50   : > { %3981 = vmatpush3.bf16.msra.mxu1 %v4326_v11  ;;  %v632_v8 = vpack.c.bf16 %v542_v6, %v540_v5  ;;  %v544_v11 = vld [vmem:[%s4570_s21 + $0x268] sm:$0xff]  ;;  %v558_v30 = vld [vmem:[%s4570_s21 + $0x2d8] sm:$0xff]  ;;  %v573_v58 = vld [vmem:[%s4570_s21 + $0x350] sm:$0xff] }
  0x51   : > { %v560_v35 = vld [vmem:[%s4570_s21 + $0x2e8] sm:$0xff]  ;;  %v562_v36 = vld [vmem:[%s4570_s21 + $0x2f8] sm:$0xff] }
  0x52   : > { %809 = vmatpush1.bf16.msra.mxu0 %v4317_v12  ;;  %v503_v12 = vld [vmem:[%s4570_s21 + $0x120] sm:$0xff] }
  0x53   : > { %810 = vmatprep.subr.bf16.mxu0 %v4411_v1 }
  0x56   : > { %811 = vmatpush1.bf16.msra.mxu0 %v4318_v13  ;;  %v505_v13 = vld [vmem:[%s4570_s21 + $0x130] sm:$0xff] }
  0x57   : > { %812 = vmatprep.subr.bf16.mxu0 %v4411_v1 }
  0x5a   : > { %813 = vmatpush1.bf16.msra.mxu0 %v4319_v14  ;;  %v508_v14 = vld [vmem:[%s4570_s21 + $0x148] sm:$0xff] }
  0x5b   : > { %814 = vmatprep.subr.bf16.mxu0 %v4411_v1 }
  0x5e   : > { %815 = vmatpush1.bf16.msra.mxu0 %v4320_v15  ;;  %v510_v15 = vld [vmem:[%s4570_s21 + $0x158] sm:$0xff] }
  0x5f   : > { %816 = vmatprep.subr.bf16.mxu0 %v4411_v1 }
  0x62   : > { %817 = vmatpush1.bf16.msra.mxu0 %v4321_v16  ;;  %v613_v16 = vpack.c.bf16 %v505_v13, %v503_v12  ;;  %v546_v12 = vld [vmem:[%s4570_s21 + $0x278] sm:$0xff] }
  0x63   : > { %818 = vmatprep.subr.bf16.mxu0 %v4411_v1 }
  0x66   : > { %819 = vmatpush1.bf16.msra.mxu0 %v4322_v17  ;;  %v616_v17 = vpack.c.bf16 %v510_v15, %v508_v14  ;;  %v634_v14 = vpack.c.bf16 %v546_v12, %v544_v11  ;;  %v543_v15 = vld [vmem:[%s4570_s21 + $0x260] sm:$0xff] }
  0x67   : > { %820 = vmatprep.subr.bf16.mxu0 %v4411_v1 }
  0x6a   : > { %821 = vmatpush1.bf16.msra.mxu0 %v4323_v18  ;;  %v4327_v18 = vld [vmem:[%s5593_s3 + $0x8] sm:$0xff]  }
  0x6b   : > { %822 = vmatprep.subr.bf16.mxu0 %v4411_v1  ;;  %3982 = vmatprep.subr.bf16.mxu1 %v4327_v18 }
  0x6c   : > { %3983 = vmatpush3.bf16.msra.mxu1 %v4327_v18  ;;  %v550_v18 = vld [vmem:[%s4570_s21 + $0x298] sm:$0xff] }
  0x6e   : > { %823 = vmatpush1.bf16.msra.mxu0 %v4324_v19  ;;  %v4328_v19 = vld [vmem:[%s5593_s3 + $0x10] sm:$0xff]  }
  0x6f   : > { %824 = vmatprep.subr.bf16.mxu0 %v4411_v1  ;;  %v500_v1 = vld [vmem:[%s4570_s21 + $0x108] sm:$0xff]  ;;  %3984 = vmatprep.subr.bf16.mxu1 %v4328_v19 }
  0x70   : > { %v612_v4 = vpack.c.bf16 %v502_v2, %v500_v1  ;;  %3985 = vmatpush3.bf16.msra.mxu1 %v4328_v19  ;;  %v630_v2 = vpack.c.bf16 %v538_v0, %v536_v63  ;;  %v4761_v63 = vld [vmem:[%s5592_s2] ss:$0 sm:$0xff]  ;;  %v575_v0 = vld [vmem:[%s4570_s21 + $0x360] sm:$0xff] }
  0x72   : > { %825 = vmatpush1.bf16.msra.mxu0 %v4325_v20  ;;  %v507_v20 = vld [vmem:[%s4570_s21 + $0x140] sm:$0xff] }
  0x73   : > { %v615_v24 = vpack.c.bf16 %v509_v21, %v507_v20  ;;  %v547_v21 = vld [vmem:[%s4570_s21 + $0x280] sm:$0xff] }
  0x75   : > { %827 = vmatmul.mubr.bf16.vlgmr.msra.gmra.mrb[0].mxu0 %v595_v25  ;;  %v618_v25 = vpack.c.bf16 %v514_v23, %v512_v22  ;;  %v549_v22 = vld [vmem:[%s4570_s21 + $0x290] sm:$0xff]  ;;  %v552_v23 = vld [vmem:[%s4570_s21 + $0x2a8] sm:$0xff] }
  0x76   : > { %834 = vmatprep.mubr.bf16.mxu0 %v598_v26  ;;  %v4329_v26 = vld [vmem:[%s5593_s3 + $0x18] sm:$0xff]  }
  0x77   : > { %3986 = vmatprep.subr.bf16.mxu1 %v4329_v26 }
  0x78   : > { %3987 = vmatpush3.bf16.msra.mxu1 %v4329_v26 }
  0x7d   : > { %835 = vmatmul.mubr.bf16.gmra.mrb[4].mxu0 %v597_v31  ;;  %v4330_v31 = vld [vmem:[%s5593_s3 + $0x20] sm:$0xff]  }
  0x7e   : > { %842 = vmatprep.mubr.bf16.mxu0 %v600_v32  ;;  %v617_v32 = vpack.c.bf16 %v513_v28, %v511_v27  ;;  %3988 = vmatprep.subr.bf16.mxu1 %v4330_v31  ;;  %v551_v27 = vld [vmem:[%s4570_s21 + $0x2a0] sm:$0xff]  ;;  %v553_v28 = vld [vmem:[%s4570_s21 + $0x2b0] sm:$0xff] }
  0x7f   : > { %3989 = vmatpush3.bf16.msra.mxu1 %v4330_v31  ;;  %v637_v31 = vpack.c.bf16 %v553_v28, %v551_v27 }
  0x80   : > { %3990 = vmatprep.subr.bf16.mxu1 %v4331_v34 }
  0x83   : > { %3991 = vmatpush3.bf16.msra.mxu1 %v4331_v34  ;;  %v557_v34 = vld [vmem:[%s4570_s21 + $0x2d0] sm:$0xff] }
  0x84   : > { %3992 = vmatprep.subr.bf16.mxu1 %v4332_v39 }
  0x85   : > { %843 = vmatmul.mubr.bf16.gmra.mrb[8].mxu0 %v599_v37  ;;  %v520_v37 = vld [vmem:[%s4570_s21 + $0x1a8] sm:$0xff] }
  0x86   : > { %850 = vmatprep.mubr.bf16.mxu0 %v602_v38  ;;  %v522_v38 = vld [vmem:[%s4570_s21 + $0x1b8] sm:$0xff] }
  0x87   : > { %v622_v41 = vpack.c.bf16 %v522_v38, %v520_v37  ;;  %3993 = vmatpush3.bf16.msra.mxu1 %v4332_v39  ;;  %v642_v38 = vpack.c.bf16 %v562_v36, %v560_v35  ;;  %v559_v39 = vld [vmem:[%s4570_s21 + $0x2e0] sm:$0xff] }
  0x88   : > { %3994 = vmatprep.subr.bf16.mxu1 %v4333_v42 }
  0x8b   : > { %3995 = vmatpush3.bf16.msra.mxu1 %v4333_v42  ;;  %v566_v42 = vld [vmem:[%s4570_s21 + $0x318] sm:$0xff] }
  0x8d   : > { %851 = vmatmul.mubr.bf16.gmra.mrb[12].mxu0 %v601_v43  ;;  %v519_v43 = vld [vmem:[%s4570_s21 + $0x1a0] sm:$0xff] }
  0x8e   : > { %858 = vmatprep.mubr.bf16.mxu0 %v604_v44  ;;  %v521_v44 = vld [vmem:[%s4570_s21 + $0x1b0] sm:$0xff] }
  0x8f   : > { %v621_v47 = vpack.c.bf16 %v521_v44, %v519_v43 }
  0x95   : > { %859 = vmatmul.mubr.bf16.gmra.mrb[16].mxu0 %v603_v49  ;;  %v523_v49 = vld [vmem:[%s4570_s21 + $0x1c0] sm:$0xff] }
  0x96   : > { %866 = vmatprep.mubr.bf16.mxu0 %v606_v50  ;;  %v525_v50 = vld [vmem:[%s4570_s21 + $0x1d0] sm:$0xff] }
  0x97   : > { %v623_v53 = vpack.c.bf16 %v525_v50, %v523_v49  ;;  %v643_v49 = vpack.c.bf16 %v565_v46, %v563_v45  ;;  %v589_v45 = vld [vmem:[%s4570_s21 + $0x3d0] sm:$0xff] }
  0x9d   : > { %867 = vmatmul.mubr.bf16.gmra.mrb[20].mxu0 %v605_v55  ;;  %v527_v55 = vld [vmem:[%s4570_s21 + $0x1e0] sm:$0xff] }
  0x9e   : > { %874 = vmatprep.mubr.bf16.mxu0 %v608_v56  ;;  %v529_v56 = vld [vmem:[%s4570_s21 + $0x1f0] sm:$0xff] }
  0x9f   : > { %v625_v59 = vpack.c.bf16 %v529_v56, %v527_v55  ;;  %v645_v55 = vpack.c.bf16 %v569_v52, %v567_v51 }
  0xa5   : > { %875 = vmatmul.mubr.bf16.gmra.mrb[24].mxu0 %v607_v61  ;;  %v531_v61 = vld [vmem:[%s4570_s21 + $0x200] sm:$0xff] }
  0xa6   : > { %882 = vmatprep.mubr.bf16.mxu0 %v610_v62  ;;  %v533_v62 = vld [vmem:[%s4570_s21 + $0x210] sm:$0xff] }
  0xa7   : > { %v627_v1 = vpack.c.bf16 %v533_v62, %v531_v61  ;;  %v647_v61 = vpack.c.bf16 %v573_v58, %v571_v57 }
  0xad   : > { %883 = vmatmul.mubr.bf16.gmra.mrb[28].mxu0 %v609_v3  ;;  %v535_v3 = vld [vmem:[%s4570_s21 + $0x220] sm:$0xff] }
  0xae   : > { %890 = vmatprep.mubr.bf16.mxu0 %v612_v4  ;;  %v537_v4 = vld [vmem:[%s4570_s21 + $0x230] sm:$0xff] }
  0xaf   : > { %v629_v7 = vpack.c.bf16 %v537_v4, %v535_v3  ;;  %v582_v3 = vld [vmem:[%s4570_s21 + $0x398] sm:$0xff] }
  0xb5   : > { %891 = vmatmul.mubr.bf16.gmra.mrb[32].mxu0 %v611_v9  ;;  %v539_v9 = vld [vmem:[%s4570_s21 + $0x240] sm:$0xff] }
  0xb6   : > { %898 = vmatprep.mubr.bf16.mxu0 %v614_v10  ;;  %v541_v10 = vld [vmem:[%s4570_s21 + $0x250] sm:$0xff] }
  0xb7   : > { %v631_v13 = vpack.c.bf16 %v541_v10, %v539_v9 }
  0xbd   : > { %899 = vmatmul.mubr.bf16.gmra.mrb[36].mxu0 %v613_v16  ;;  %v545_v16 = vld [vmem:[%s4570_s21 + $0x270] sm:$0xff] }
  0xbe   : > { %906 = vmatprep.mubr.bf16.mxu0 %v616_v17  ;;  %v548_v17 = vld [vmem:[%s4570_s21 + $0x288] sm:$0xff]  ;;  %v633_v19 = vpack.c.bf16 %v545_v16, %v543_v15  ;;  %v581_v15 = vld [vmem:[%s4570_s21 + $0x390] sm:$0xff] }
  0xbf   : > { %v636_v20 = vpack.c.bf16 %v550_v18, %v548_v17  ;;  %v584_v17 = vld [vmem:[%s4570_s21 + $0x3a8] sm:$0xff]  ;;  %v586_v18 = vld [vmem:[%s4570_s21 + $0x3b8] sm:$0xff] }
  0xc5   : > { %907 = vmatmul.mubr.bf16.gmra.mrb[40].mxu0 %v615_v24  ;;  %v554_v24 = vld [vmem:[%s4570_s21 + $0x2b8] sm:$0xff] }
  0xc6   : > { %914 = vmatprep.mubr.bf16.mxu0 %v618_v25  ;;  %v635_v25 = vpack.c.bf16 %v549_v22, %v547_v21  ;;  %v638_v26 = vpack.c.bf16 %v554_v24, %v552_v23  ;;  %v654_v24 = vpack.c.bf16 %v586_v18, %v584_v17 }
  0xcd   : > { %915 = vmatmul.mubr.bf16.gmra.mrb[44].mxu0 %v617_v32  ;;  %v640_v32 = vpack.c.bf16 %v558_v30, %v556_v29  ;;  %v583_v29 = vld [vmem:[%s4570_s21 + $0x3a0] sm:$0xff]  ;;  %v585_v30 = vld [vmem:[%s4570_s21 + $0x3b0] sm:$0xff] }
  0xce   : > { %922 = vmatprep.mubr.bf16.mxu0 %v620_v33  ;;  %v555_v33 = vld [vmem:[%s4570_s21 + $0x2c0] sm:$0xff] }
  0xcf   : > { %v639_v37 = vpack.c.bf16 %v557_v34, %v555_v33  ;;  %v590_v33 = vld [vmem:[%s4570_s21 + $0x3d8] sm:$0xff] }
  0xd5   : > { %923 = vmatmul.mubr.bf16.gmra.mrb[48].mxu0 %v619_v40  ;;  %v561_v40 = vld [vmem:[%s4570_s21 + $0x2f0] sm:$0xff] }
  0xd6   : > { %930 = vmatprep.mubr.bf16.mxu0 %v622_v41  ;;  %v564_v41 = vld [vmem:[%s4570_s21 + $0x308] sm:$0xff]  ;;  %v641_v43 = vpack.c.bf16 %v561_v40, %v559_v39 }
  0xd7   : > { %v644_v44 = vpack.c.bf16 %v566_v42, %v564_v41 }
  0xdd   : > { %931 = vmatmul.mubr.bf16.gmra.mrb[52].mxu0 %v621_v47  ;;  %v568_v47 = vld [vmem:[%s4570_s21 + $0x328] sm:$0xff] }
  0xde   : > { %938 = vmatprep.mubr.bf16.mxu0 %v624_v48  ;;  %v570_v48 = vld [vmem:[%s4570_s21 + $0x338] sm:$0xff] }
  0xdf   : > { %v646_v50 = vpack.c.bf16 %v570_v48, %v568_v47  ;;  %v592_v47 = vld [vmem:[%s4570_s21 + $0x3e8] sm:$0xff]  ;;  %v594_v48 = vld [vmem:[%s4570_s21 + $0x3f8] sm:$0xff] }
  0xe5   : > { %939 = vmatmul.mubr.bf16.gmra.mrb[56].mxu0 %v623_v53  ;;  %v572_v53 = vld [vmem:[%s4570_s21 + $0x348] sm:$0xff] }
  0xe6   : > { %946 = vmatprep.mubr.bf16.mxu0 %v626_v54  ;;  %v574_v54 = vld [vmem:[%s4570_s21 + $0x358] sm:$0xff] }
  0xe7   : > { %v648_v56 = vpack.c.bf16 %v574_v54, %v572_v53  ;;  %v658_v54 = vpack.c.bf16 %v594_v48, %v592_v47 }
  0xed   : > { %947 = vmatmul.mubr.bf16.gmra.mrb[60].mxu0 %v625_v59  ;;  %v576_v59 = vld [vmem:[%s4570_s21 + $0x368] sm:$0xff] }
  0xee   : > { %954 = vmatprep.mubr.bf16.mxu0 %v628_v60  ;;  %v578_v60 = vld [vmem:[%s4570_s21 + $0x378] sm:$0xff] }
  0xef   : > { %v650_v62 = vpack.c.bf16 %v578_v60, %v576_v59  ;;  %v591_v59 = vld [vmem:[%s4570_s21 + $0x3e0] sm:$0xff]  ;;  %v593_v60 = vld [vmem:[%s4570_s21 + $0x3f0] sm:$0xff] }
  0xf5   : > { %955 = vmatmul.mubr.bf16.gmra.mrb[64].mxu0 %v627_v1  ;;  %v577_v1 = vld [vmem:[%s4570_s21 + $0x370] sm:$0xff] }
  0xf6   : > { %962 = vmatprep.mubr.bf16.mxu0 %v630_v2  ;;  %v580_v2 = vld [vmem:[%s4570_s21 + $0x388] sm:$0xff] }
  0xf7   : > { %v652_v9 = vpack.c.bf16 %v582_v3, %v580_v2  ;;  %v657_v2 = vpack.c.bf16 %v593_v60, %v591_v59 }
  0xfd   : > { %963 = vmatmul.mubr.bf16.gmra.mrb[68].mxu0 %v629_v7  ;;  %v649_v7 = vpack.c.bf16 %v577_v1, %v575_v0 }
  0xfe   : > { %970 = vmatprep.mubr.bf16.mxu0 %v632_v8 }
 0x105   : > { %971 = vmatmul.mubr.bf16.gmra.mrb[72].mxu0 %v631_v13 }
 0x106   : > { %978 = vmatprep.mubr.bf16.mxu0 %v634_v14  ;;  %v579_v14 = vld [vmem:[%s4570_s21 + $0x380] sm:$0xff] }
 0x107   : > { %v651_v22 = vpack.c.bf16 %v581_v15, %v579_v14 }
 0x10d   : > { %979 = vmatmul.mubr.bf16.gmra.mrb[76].mxu0 %v633_v19 }
 0x10e   : > { %986 = vmatprep.mubr.bf16.mxu0 %v636_v20 }
 0x115   : > { %987 = vmatmul.mubr.bf16.gmra.mrb[80].mxu0 %v635_v25 }
 0x116   : > { %994 = vmatprep.mubr.bf16.mxu0 %v638_v26 }
 0x11d   : > { %995 = vmatmul.mubr.bf16.gmra.mrb[84].mxu0 %v637_v31 }
 0x11e   : > { %1002 = vmatprep.mubr.bf16.mxu0 %v640_v32  ;;  %v588_v32 = vld [vmem:[%s4570_s21 + $0x3c8] sm:$0xff] }
 0x11f   : > { %v656_v39 = vpack.c.bf16 %v590_v33, %v588_v32 }
 0x125   : > { %1003 = vmatmul.mubr.bf16.gmra.mrb[88].mxu0 %v639_v37  ;;  %v653_v37 = vpack.c.bf16 %v585_v30, %v583_v29 }
 0x126   : > { %1010 = vmatprep.mubr.bf16.mxu0 %v642_v38 }
 0x12d   : > { %1011 = vmatmul.mubr.bf16.gmra.mrb[92].mxu0 %v641_v43 }
 0x12e   : > { %1018 = vmatprep.mubr.bf16.mxu0 %v644_v44  ;;  %v587_v44 = vld [vmem:[%s4570_s21 + $0x3c0] sm:$0xff]  ;;  %s3698_s21 = sshll.u32 %s3688_s12, 6 }
 0x12f   : > { %v655_v52 = vpack.c.bf16 %v589_v45, %v587_v44  ;;  %p461_p7 = scmp.lt.s32.totalorder %s3698_s21, 127 }
 0x131   : > { %s5612_s21 = smov (!%p461_p7, %s3698_s21), 127 }
 0x132   : > { %s3699_s30 = sshll.u32 %s5612_s21, 3 }
 0x133   : > { %s5328_s22 = scalar_lea.vmem %s5603_s13, %s3699_s30 }
 0x135   : > { %1019 = vmatmul.mubr.bf16.gmra.mrb[96].mxu0 %v643_v49 }
 0x136   : > { %1026 = vmatprep.mubr.bf16.mxu0 %v646_v50 }
 0x13d   : > { %1027 = vmatmul.mubr.bf16.gmra.mrb[100].mxu0 %v645_v55 }
 0x13e   : > { %1034 = vmatprep.mubr.bf16.mxu0 %v648_v56 }
 0x145   : > { %1035 = vmatmul.mubr.bf16.gmra.mrb[104].mxu0 %v647_v61 }
 0x146   : > { %1042 = vmatprep.mubr.bf16.mxu0 %v650_v62 }
 0x148   : > { %v828_v4 = vpop.f32.mrb[0].mxu0 }
 0x149   : > { %v829_v5 = vadd.f32 %v4761_v63, %v828_v4  ;;  %v830_v6 = vpop.f32.mrb[1].mxu0 }
 0x14a   : > { %v831_v8 = vpop.f32.mrb[2].mxu0 }
 0x14b   : > { %v832_v10 = vadd.f32 %v4761_v63, %v831_v8  ;;  %v833_v11 = vpop.f32.mrb[3].mxu0  ;;  %v1083_v12 = vmax.f32 %v829_v5, 0.0 }
 0x14d   : > { %v1084_v13 = vmax.f32 %v832_v10, 0.0  ;;  %1043 = vmatmul.mubr.bf16.gmra.mrb[108].mxu0 %v649_v7 }
 0x14e   : > { %1050 = vmatprep.mubr.bf16.mxu0 %v652_v9 }
 0x14f   : > { %v1147_v16 = vpack.c.bf16 %v1084_v13, %v1083_v12 }
 0x150   : > { %v836_v19 = vpop.f32.mrb[4].mxu0 }
 0x151   : > { %v837_v20 = vadd.f32 %v4761_v63, %v836_v19  ;;  %v838_v21 = vpop.f32.mrb[5].mxu0  ;;  %3996 = vmatprep.mubr.bf16.mxu1 %v1147_v16 }
 0x152   : > { %v839_v23 = vpop.f32.mrb[6].mxu0 }
 0x153   : > { %v840_v25 = vadd.f32 %v4761_v63, %v839_v23  ;;  %v841_v26 = vpop.f32.mrb[7].mxu0  ;;  %v1085_v27 = vmax.f32 %v837_v20, 0.0 }
 0x155   : > { %v1086_v28 = vmax.f32 %v840_v25, 0.0  ;;  %1051 = vmatmul.mubr.bf16.gmra.mrb[112].mxu0 %v651_v22 }
 0x156   : > { %1058 = vmatprep.mubr.bf16.mxu0 %v654_v24 }
 0x157   : > { %v1148_v31 = vpack.c.bf16 %v1086_v28, %v1085_v27 }
 0x158   : > { %v844_v34 = vpop.f32.mrb[8].mxu0 }
 0x159   : > { %v845_v35 = vadd.f32 %v4761_v63, %v844_v34  ;;  %v846_v36 = vpop.f32.mrb[9].mxu0  ;;  %3997 = vmatmul.mubr.bf16.vlgmr.msra.gmra.mrb[0].mxu1 %v1148_v31 }
 0x15a   : > { %v847_v38 = vpop.f32.mrb[10].mxu0 }
 0x15b   : > { %v848_v40 = vadd.f32 %v4761_v63, %v847_v38  ;;  %v849_v41 = vpop.f32.mrb[11].mxu0  ;;  %v1087_v42 = vmax.f32 %v845_v35, 0.0 }
 0x15d   : > { %v1088_v43 = vmax.f32 %v848_v40, 0.0  ;;  %1059 = vmatmul.mubr.bf16.gmra.mrb[116].mxu0 %v653_v37 }
 0x15e   : > { %1066 = vmatprep.mubr.bf16.mxu0 %v656_v39 }
 0x15f   : > { %v1149_v46 = vpack.c.bf16 %v1088_v43, %v1087_v42 }
 0x160   : > { %v852_v49 = vpop.f32.mrb[12].mxu0 }
 0x161   : > { %v853_v50 = vadd.f32 %v4761_v63, %v852_v49  ;;  %v854_v51 = vpop.f32.mrb[13].mxu0  ;;  %4000 = vmatprep.mubr.bf16.mxu1 %v1149_v46 }
 0x162   : > { %v855_v53 = vpop.f32.mrb[14].mxu0 }
 0x163   : > { %v856_v55 = vadd.f32 %v4761_v63, %v855_v53  ;;  %v857_v56 = vpop.f32.mrb[15].mxu0  ;;  %v1089_v57 = vmax.f32 %v853_v50, 0.0 }
 0x165   : > { %v1090_v58 = vmax.f32 %v856_v55, 0.0  ;;  %1067 = vmatmul.mubr.bf16.gmra.mrb[120].mxu0 %v655_v52 }
 0x166   : > { %1074 = vmatprep.mubr.bf16.mxu0 %v658_v54 }
 0x167   : > { %v1150_v61 = vpack.c.bf16 %v1090_v58, %v1089_v57 }
 0x168   : > { %v860_v62 = vpop.f32.mrb[16].mxu0 }
 0x169   : > { %v861_v0 = vadd.f32 %v4761_v63, %v860_v62  ;;  %v862_v1 = vpop.f32.mrb[17].mxu0  ;;  %4001 = vmatmul.mubr.bf16.gmra.mrb[4].mxu1 %v1150_v61 }
 0x16a   : > { %v863_v3 = vpop.f32.mrb[18].mxu0 }
 0x16b   : > { %v864_v4 = vadd.f32 %v4761_v63, %v863_v3  ;;  %v865_v5 = vpop.f32.mrb[19].mxu0  ;;  %v1091_v6 = vmax.f32 %v861_v0, 0.0 }
 0x16d   : > { %v1092_v7 = vmax.f32 %v864_v4, 0.0  ;;  %1075 = vmatmul.mubr.bf16.gmra.mrb[124].mxu0 %v657_v2 }
 0x16f   : > { %v1151_v8 = vpack.c.bf16 %v1092_v7, %v1091_v6 }
 0x170   : > { %v868_v9 = vpop.f32.mrb[20].mxu0 }
 0x171   : > { %v869_v10 = vadd.f32 %v4761_v63, %v868_v9  ;;  %v870_v11 = vpop.f32.mrb[21].mxu0  ;;  %4004 = vmatprep.mubr.bf16.mxu1 %v1151_v8 }
 0x172   : > { %v871_v12 = vpop.f32.mrb[22].mxu0 }
 0x173   : > { %v872_v13 = vadd.f32 %v4761_v63, %v871_v12  ;;  %v873_v14 = vpop.f32.mrb[23].mxu0  ;;  %v1093_v15 = vmax.f32 %v869_v10, 0.0 }
 0x175   : > { %v1094_v16 = vmax.f32 %v872_v13, 0.0 }
 0x177   : > { %v1152_v17 = vpack.c.bf16 %v1094_v16, %v1093_v15 }
 0x178   : > { %v876_v18 = vpop.f32.mrb[24].mxu0 }
 0x179   : > { %v877_v19 = vadd.f32 %v4761_v63, %v876_v18  ;;  %v878_v20 = vpop.f32.mrb[25].mxu0  ;;  %4005 = vmatmul.mubr.bf16.gmra.mrb[8].mxu1 %v1152_v17 }
 0x17a   : > { %v879_v21 = vpop.f32.mrb[26].mxu0 }
 0x17b   : > { %v880_v22 = vadd.f32 %v4761_v63, %v879_v21  ;;  %v881_v23 = vpop.f32.mrb[27].mxu0  ;;  %v1095_v24 = vmax.f32 %v877_v19, 0.0 }
 0x17d   : > { %v1096_v25 = vmax.f32 %v880_v22, 0.0 }
 0x17f   : > { %v1153_v26 = vpack.c.bf16 %v1096_v25, %v1095_v24  ;;  %v4334_v24 = vld [vmem:[%s5595_s5] sm:$0xff]  }
 0x180   : > { %v884_v27 = vpop.f32.mrb[28].mxu0  ;;  %4060 = vmatprep.subr.bf16.mxu1 %v4334_v24 }
 0x181   : > { %v885_v28 = vadd.f32 %v4761_v63, %v884_v27  ;;  %v886_v29 = vpop.f32.mrb[29].mxu0  ;;  %4008 = vmatprep.mubr.bf16.mxu1 %v1153_v26  ;;  %4061 = vmatpush3.bf16.msra.mxu1 %v4334_v24 }
 0x182   : > { %v887_v30 = vpop.f32.mrb[30].mxu0 }
 0x183   : > { %v888_v31 = vadd.f32 %v4761_v63, %v887_v30  ;;  %v889_v32 = vpop.f32.mrb[31].mxu0  ;;  %v1097_v33 = vmax.f32 %v885_v28, 0.0 }
 0x185   : > { %v1098_v34 = vmax.f32 %v888_v31, 0.0 }
 0x187   : > { %v1154_v35 = vpack.c.bf16 %v1098_v34, %v1097_v33 }
 0x188   : > { %v892_v36 = vpop.f32.mrb[32].mxu0 }
 0x189   : > { %v893_v37 = vadd.f32 %v4761_v63, %v892_v36  ;;  %v894_v38 = vpop.f32.mrb[33].mxu0  ;;  %4009 = vmatmul.mubr.bf16.gmra.mrb[12].mxu1 %v1154_v35 }
 0x18a   : > { %v895_v39 = vpop.f32.mrb[34].mxu0 }
 0x18b   : > { %v896_v40 = vadd.f32 %v4761_v63, %v895_v39  ;;  %v897_v41 = vpop.f32.mrb[35].mxu0  ;;  %v1099_v42 = vmax.f32 %v893_v37, 0.0 }
 0x18d   : > { %v1100_v43 = vmax.f32 %v896_v40, 0.0 }
 0x18f   : > { %v1155_v44 = vpack.c.bf16 %v1100_v43, %v1099_v42  ;;  %v4335_v43 = vld [vmem:[%s5595_s5 + $0x8] sm:$0xff]  }
 0x190   : > { %v900_v45 = vpop.f32.mrb[36].mxu0  ;;  %4062 = vmatprep.subr.bf16.mxu1 %v4335_v43 }
 0x191   : > { %v901_v46 = vadd.f32 %v4761_v63, %v900_v45  ;;  %v902_v47 = vpop.f32.mrb[37].mxu0  ;;  %4012 = vmatprep.mubr.bf16.mxu1 %v1155_v44  ;;  %4063 = vmatpush3.bf16.msra.mxu1 %v4335_v43 }
 0x192   : > { %v903_v48 = vpop.f32.mrb[38].mxu0  ;;  %v4336_v47 = vld [vmem:[%s5595_s5 + $0x10] sm:$0xff]  }
 0x193   : > { %v904_v49 = vadd.f32 %v4761_v63, %v903_v48  ;;  %v905_v50 = vpop.f32.mrb[39].mxu0  ;;  %v1101_v51 = vmax.f32 %v901_v46, 0.0  ;;  %4064 = vmatprep.subr.bf16.mxu1 %v4336_v47 }
 0x195   : > { %v1102_v52 = vmax.f32 %v904_v49, 0.0  ;;  %4065 = vmatpush3.bf16.msra.mxu1 %v4336_v47 }
 0x197   : > { %v1156_v53 = vpack.c.bf16 %v1102_v52, %v1101_v51 }
 0x198   : > { %v908_v54 = vpop.f32.mrb[40].mxu0 }
 0x199   : > { %v909_v55 = vadd.f32 %v4761_v63, %v908_v54  ;;  %v910_v56 = vpop.f32.mrb[41].mxu0  ;;  %4013 = vmatmul.mubr.bf16.gmra.mrb[16].mxu1 %v1156_v53  ;;  %v4337_v54 = vld [vmem:[%s5595_s5 + $0x18] sm:$0xff]  }
 0x19a   : > { %v911_v57 = vpop.f32.mrb[42].mxu0  ;;  %4066 = vmatprep.subr.bf16.mxu1 %v4337_v54 }
 0x19b   : > { %v912_v58 = vadd.f32 %v4761_v63, %v911_v57  ;;  %v913_v59 = vpop.f32.mrb[43].mxu0  ;;  %v1103_v60 = vmax.f32 %v909_v55, 0.0  ;;  %4067 = vmatpush3.bf16.msra.mxu1 %v4337_v54 }
 0x19d   : > { %v1104_v61 = vmax.f32 %v912_v58, 0.0 }
 0x19f   : > { %v1157_v62 = vpack.c.bf16 %v1104_v61, %v1103_v60 }
 0x1a0   : > { %v916_v0 = vpop.f32.mrb[44].mxu0 }
 0x1a1   : > { %v917_v1 = vadd.f32 %v4761_v63, %v916_v0  ;;  %v918_v2 = vpop.f32.mrb[45].mxu0  ;;  %4016 = vmatprep.mubr.bf16.mxu1 %v1157_v62 }
 0x1a2   : > { %v919_v3 = vpop.f32.mrb[46].mxu0 }
 0x1a3   : > { %v920_v4 = vadd.f32 %v4761_v63, %v919_v3  ;;  %v921_v5 = vpop.f32.mrb[47].mxu0  ;;  %v1105_v6 = vmax.f32 %v917_v1, 0.0 }
 0x1a5   : > { %v1106_v7 = vmax.f32 %v920_v4, 0.0 }
 0x1a7   : > { %v1158_v8 = vpack.c.bf16 %v1106_v7, %v1105_v6 }
 0x1a8   : > { %v924_v9 = vpop.f32.mrb[48].mxu0 }
 0x1a9   : > { %v925_v10 = vadd.f32 %v4761_v63, %v924_v9  ;;  %v926_v11 = vpop.f32.mrb[49].mxu0  ;;  %4017 = vmatmul.mubr.bf16.gmra.mrb[20].mxu1 %v1158_v8 }
 0x1aa   : > { %v927_v12 = vpop.f32.mrb[50].mxu0 }
 0x1ab   : > { %v928_v13 = vadd.f32 %v4761_v63, %v927_v12  ;;  %v929_v14 = vpop.f32.mrb[51].mxu0  ;;  %v1107_v15 = vmax.f32 %v925_v10, 0.0 }
 0x1ad   : > { %v1108_v16 = vmax.f32 %v928_v13, 0.0 }
 0x1af   : > { %v1159_v17 = vpack.c.bf16 %v1108_v16, %v1107_v15 }
 0x1b0   : > { %v932_v18 = vpop.f32.mrb[52].mxu0 }
 0x1b1   : > { %v933_v19 = vadd.f32 %v4761_v63, %v932_v18  ;;  %v934_v20 = vpop.f32.mrb[53].mxu0  ;;  %4020 = vmatprep.mubr.bf16.mxu1 %v1159_v17 }
 0x1b2   : > { %v935_v21 = vpop.f32.mrb[54].mxu0 }
 0x1b3   : > { %v936_v22 = vadd.f32 %v4761_v63, %v935_v21  ;;  %v937_v23 = vpop.f32.mrb[55].mxu0  ;;  %v1109_v25 = vmax.f32 %v933_v19, 0.0 }
 0x1b5   : > { %v1110_v26 = vmax.f32 %v936_v22, 0.0 }
 0x1b7   : > { %v1160_v27 = vpack.c.bf16 %v1110_v26, %v1109_v25 }
 0x1b8   : > { %v940_v28 = vpop.f32.mrb[56].mxu0 }
 0x1b9   : > { %v941_v29 = vadd.f32 %v4761_v63, %v940_v28  ;;  %v942_v30 = vpop.f32.mrb[57].mxu0  ;;  %4021 = vmatmul.mubr.bf16.gmra.mrb[24].mxu1 %v1160_v27 }
 0x1ba   : > { %v943_v31 = vpop.f32.mrb[58].mxu0 }
 0x1bb   : > { %v944_v32 = vadd.f32 %v4761_v63, %v943_v31  ;;  %v945_v33 = vpop.f32.mrb[59].mxu0  ;;  %v1111_v34 = vmax.f32 %v941_v29, 0.0 }
 0x1bd   : > { %v1112_v35 = vmax.f32 %v944_v32, 0.0 }
 0x1bf   : > { %v1161_v36 = vpack.c.bf16 %v1112_v35, %v1111_v34 }
 0x1c0   : > { %v948_v37 = vpop.f32.mrb[60].mxu0 }
 0x1c1   : > { %v949_v38 = vadd.f32 %v4761_v63, %v948_v37  ;;  %v950_v39 = vpop.f32.mrb[61].mxu0  ;;  %4024 = vmatprep.mubr.bf16.mxu1 %v1161_v36 }
 0x1c2   : > { %v951_v40 = vpop.f32.mrb[62].mxu0 }
 0x1c3   : > { %v952_v41 = vadd.f32 %v4761_v63, %v951_v40  ;;  %v953_v42 = vpop.f32.mrb[63].mxu0  ;;  %v1113_v44 = vmax.f32 %v949_v38, 0.0 }
 0x1c5   : > { %v1114_v45 = vmax.f32 %v952_v41, 0.0 }
 0x1c7   : > { %v1162_v46 = vpack.c.bf16 %v1114_v45, %v1113_v44 }
 0x1c8   : > { %v956_v48 = vpop.f32.mrb[64].mxu0 }
 0x1c9   : > { %v957_v49 = vadd.f32 %v4761_v63, %v956_v48  ;;  %v958_v50 = vpop.f32.mrb[65].mxu0  ;;  %4025 = vmatmul.mubr.bf16.gmra.mrb[28].mxu1 %v1162_v46 }
 0x1ca   : > { %v959_v51 = vpop.f32.mrb[66].mxu0 }
 0x1cb   : > { %v960_v52 = vadd.f32 %v4761_v63, %v959_v51  ;;  %v961_v53 = vpop.f32.mrb[67].mxu0  ;;  %v1115_v55 = vmax.f32 %v957_v49, 0.0 }
 0x1cd   : > { %v1116_v56 = vmax.f32 %v960_v52, 0.0 }
 0x1cf   : > { %v1163_v57 = vpack.c.bf16 %v1116_v56, %v1115_v55 }
 0x1d0   : > { %v964_v58 = vpop.f32.mrb[68].mxu0 }
 0x1d1   : > { %v965_v59 = vadd.f32 %v4761_v63, %v964_v58  ;;  %v966_v60 = vpop.f32.mrb[69].mxu0  ;;  %4028 = vmatprep.mubr.bf16.mxu1 %v1163_v57 }
 0x1d2   : > { %v967_v61 = vpop.f32.mrb[70].mxu0 }
 0x1d3   : > { %v968_v62 = vadd.f32 %v4761_v63, %v967_v61  ;;  %v969_v0 = vpop.f32.mrb[71].mxu0  ;;  %v1117_v1 = vmax.f32 %v965_v59, 0.0 }
 0x1d5   : > { %v1118_v2 = vmax.f32 %v968_v62, 0.0 }
 0x1d7   : > { %v1164_v3 = vpack.c.bf16 %v1118_v2, %v1117_v1 }
 0x1d8   : > { %v972_v4 = vpop.f32.mrb[72].mxu0 }
 0x1d9   : > { %v973_v5 = vadd.f32 %v4761_v63, %v972_v4  ;;  %v974_v6 = vpop.f32.mrb[73].mxu0  ;;  %4029 = vmatmul.mubr.bf16.gmra.mrb[32].mxu1 %v1164_v3 }
 0x1da   : > { %v975_v7 = vpop.f32.mrb[74].mxu0 }
 0x1db   : > { %v976_v8 = vadd.f32 %v4761_v63, %v975_v7  ;;  %v977_v9 = vpop.f32.mrb[75].mxu0  ;;  %v1119_v10 = vmax.f32 %v973_v5, 0.0 }
 0x1dd   : > { %v1120_v11 = vmax.f32 %v976_v8, 0.0 }
 0x1df   : > { %v1165_v12 = vpack.c.bf16 %v1120_v11, %v1119_v10 }
 0x1e0   : > { %v980_v13 = vpop.f32.mrb[76].mxu0 }
 0x1e1   : > { %v981_v14 = vadd.f32 %v4761_v63, %v980_v13  ;;  %v982_v15 = vpop.f32.mrb[77].mxu0  ;;  %4032 = vmatprep.mubr.bf16.mxu1 %v1165_v12 }
 0x1e2   : > { %v983_v16 = vpop.f32.mrb[78].mxu0 }
 0x1e3   : > { %v984_v17 = vadd.f32 %v4761_v63, %v983_v16  ;;  %v985_v18 = vpop.f32.mrb[79].mxu0  ;;  %v1121_v19 = vmax.f32 %v981_v14, 0.0 }
 0x1e5   : > { %v1122_v20 = vmax.f32 %v984_v17, 0.0 }
 0x1e7   : > { %v1166_v21 = vpack.c.bf16 %v1122_v20, %v1121_v19 }
 0x1e8   : > { %v988_v22 = vpop.f32.mrb[80].mxu0 }
 0x1e9   : > { %v989_v23 = vadd.f32 %v4761_v63, %v988_v22  ;;  %v990_v24 = vpop.f32.mrb[81].mxu0  ;;  %4033 = vmatmul.mubr.bf16.gmra.mrb[36].mxu1 %v1166_v21 }
 0x1ea   : > { %v991_v25 = vpop.f32.mrb[82].mxu0 }
 0x1eb   : > { %v992_v26 = vadd.f32 %v4761_v63, %v991_v25  ;;  %v993_v27 = vpop.f32.mrb[83].mxu0  ;;  %v1123_v28 = vmax.f32 %v989_v23, 0.0 }
 0x1ed   : > { %v1124_v29 = vmax.f32 %v992_v26, 0.0 }
 0x1ef   : > { %v1167_v30 = vpack.c.bf16 %v1124_v29, %v1123_v28 }
 0x1f0   : > { %v996_v31 = vpop.f32.mrb[84].mxu0 }
 0x1f1   : > { %v997_v32 = vadd.f32 %v4761_v63, %v996_v31  ;;  %v998_v33 = vpop.f32.mrb[85].mxu0  ;;  %4036 = vmatprep.mubr.bf16.mxu1 %v1167_v30 }
 0x1f2   : > { %v999_v34 = vpop.f32.mrb[86].mxu0 }
 0x1f3   : > { %v1000_v35 = vadd.f32 %v4761_v63, %v999_v34  ;;  %v1001_v36 = vpop.f32.mrb[87].mxu0  ;;  %v1125_v37 = vmax.f32 %v997_v32, 0.0 }
 0x1f5   : > { %v1126_v38 = vmax.f32 %v1000_v35, 0.0  ;;  %v4853_v35 = vld [vmem:[%s5594_s4] ss:$0 sm:$0xff] }
 0x1f7   : > { %v1168_v39 = vpack.c.bf16 %v1126_v38, %v1125_v37 }
 0x1f8   : > { %v1004_v40 = vpop.f32.mrb[88].mxu0 }
 0x1f9   : > { %v1005_v41 = vadd.f32 %v4761_v63, %v1004_v40  ;;  %v1006_v42 = vpop.f32.mrb[89].mxu0  ;;  %4037 = vmatmul.mubr.bf16.gmra.mrb[40].mxu1 %v1168_v39 }
 0x1fa   : > { %v1007_v43 = vpop.f32.mrb[90].mxu0 }
 0x1fb   : > { %v1008_v44 = vadd.f32 %v4761_v63, %v1007_v43  ;;  %v1009_v45 = vpop.f32.mrb[91].mxu0  ;;  %v1127_v46 = vmax.f32 %v1005_v41, 0.0 }
 0x1fd   : > { %v1128_v47 = vmax.f32 %v1008_v44, 0.0 }
 0x1ff   : > { %v1169_v48 = vpack.c.bf16 %v1128_v47, %v1127_v46 }
 0x200   : > { %v1012_v49 = vpop.f32.mrb[92].mxu0 }
 0x201   : > { %v1013_v50 = vadd.f32 %v4761_v63, %v1012_v49  ;;  %v1014_v51 = vpop.f32.mrb[93].mxu0  ;;  %4040 = vmatprep.mubr.bf16.mxu1 %v1169_v48 }
 0x202   : > { %v1015_v52 = vpop.f32.mrb[94].mxu0 }
 0x203   : > { %v1016_v53 = vadd.f32 %v4761_v63, %v1015_v52  ;;  %v1017_v54 = vpop.f32.mrb[95].mxu0  ;;  %v1129_v55 = vmax.f32 %v1013_v50, 0.0 }
 0x205   : > { %v1130_v56 = vmax.f32 %v1016_v53, 0.0 }
 0x207   : > { %v1170_v57 = vpack.c.bf16 %v1130_v56, %v1129_v55 }
 0x208   : > { %v1020_v58 = vpop.f32.mrb[96].mxu0 }
 0x209   : > { %v1021_v59 = vadd.f32 %v4761_v63, %v1020_v58  ;;  %v1022_v60 = vpop.f32.mrb[97].mxu0  ;;  %4041 = vmatmul.mubr.bf16.gmra.mrb[44].mxu1 %v1170_v57 }
 0x20a   : > { %v1023_v61 = vpop.f32.mrb[98].mxu0 }
 0x20b   : > { %v1024_v62 = vadd.f32 %v4761_v63, %v1023_v61  ;;  %v1025_v0 = vpop.f32.mrb[99].mxu0  ;;  %v1131_v1 = vmax.f32 %v1021_v59, 0.0 }
 0x20d   : > { %v1132_v2 = vmax.f32 %v1024_v62, 0.0 }
 0x20f   : > { %v1171_v3 = vpack.c.bf16 %v1132_v2, %v1131_v1 }
 0x210   : > { %v1028_v4 = vpop.f32.mrb[100].mxu0 }
 0x211   : > { %v1029_v5 = vadd.f32 %v4761_v63, %v1028_v4  ;;  %v1030_v6 = vpop.f32.mrb[101].mxu0  ;;  %4044 = vmatprep.mubr.bf16.mxu1 %v1171_v3 }
 0x212   : > { %v1031_v7 = vpop.f32.mrb[102].mxu0 }
 0x213   : > { %v1032_v8 = vadd.f32 %v4761_v63, %v1031_v7  ;;  %v1033_v9 = vpop.f32.mrb[103].mxu0  ;;  %v1133_v10 = vmax.f32 %v1029_v5, 0.0 }
 0x215   : > { %v1134_v11 = vmax.f32 %v1032_v8, 0.0 }
 0x217   : > { %v1172_v12 = vpack.c.bf16 %v1134_v11, %v1133_v10 }
 0x218   : > { %v1036_v13 = vpop.f32.mrb[104].mxu0 }
 0x219   : > { %v1037_v14 = vadd.f32 %v4761_v63, %v1036_v13  ;;  %v1038_v15 = vpop.f32.mrb[105].mxu0  ;;  %4045 = vmatmul.mubr.bf16.gmra.mrb[48].mxu1 %v1172_v12 }
 0x21a   : > { %v1039_v16 = vpop.f32.mrb[106].mxu0 }
 0x21b   : > { %v1040_v17 = vadd.f32 %v4761_v63, %v1039_v16  ;;  %v1041_v18 = vpop.f32.mrb[107].mxu0  ;;  %v1135_v19 = vmax.f32 %v1037_v14, 0.0 }
 0x21d   : > { %v1136_v20 = vmax.f32 %v1040_v17, 0.0 }
 0x21f   : > { %v1173_v21 = vpack.c.bf16 %v1136_v20, %v1135_v19 }
 0x220   : > { %v1044_v22 = vpop.f32.mrb[108].mxu0 }
 0x221   : > { %v1045_v23 = vadd.f32 %v4761_v63, %v1044_v22  ;;  %v1046_v24 = vpop.f32.mrb[109].mxu0  ;;  %4048 = vmatprep.mubr.bf16.mxu1 %v1173_v21 }
 0x222   : > { %v1047_v25 = vpop.f32.mrb[110].mxu0 }
 0x223   : > { %v1048_v26 = vadd.f32 %v4761_v63, %v1047_v25  ;;  %v1049_v27 = vpop.f32.mrb[111].mxu0  ;;  %v1137_v28 = vmax.f32 %v1045_v23, 0.0 }
 0x225   : > { %v1138_v29 = vmax.f32 %v1048_v26, 0.0 }
 0x227   : > { %v1174_v30 = vpack.c.bf16 %v1138_v29, %v1137_v28 }
 0x228   : > { %v1052_v31 = vpop.f32.mrb[112].mxu0 }
 0x229   : > { %v1053_v32 = vadd.f32 %v4761_v63, %v1052_v31  ;;  %v1054_v33 = vpop.f32.mrb[113].mxu0  ;;  %4049 = vmatmul.mubr.bf16.gmra.mrb[52].mxu1 %v1174_v30 }
 0x22a   : > { %v1055_v34 = vpop.f32.mrb[114].mxu0 }
 0x22b   : > { %v1056_v36 = vadd.f32 %v4761_v63, %v1055_v34  ;;  %v1057_v37 = vpop.f32.mrb[115].mxu0  ;;  %v1139_v39 = vmax.f32 %v1053_v32, 0.0 }
 0x22c   : > { %v3998_v38 = vpop.f32.mrb[0].mxu1 }
 0x22d   : > { %v1140_v40 = vmax.f32 %v1056_v36, 0.0  ;;  %v1293_v41 = vadd.f32 %v3998_v38, %v4853_v35  ;;  %v1284_v42 = vpop.f32.mrb[1].mxu1 }
 0x22e   : > { %v1285_v43 = vadd.f32 %v4853_v35, %v1284_v42  ;;  %v3999_v44 = vpop.f32.mrb[2].mxu1 }
 0x22f   : > { %v1175_v45 = vpack.c.bf16 %v1140_v40, %v1139_v39  ;;  %v1296_v46 = vadd.f32 %v3999_v44, %v4853_v35  ;;  %v1287_v47 = vpop.f32.mrb[3].mxu1  ;;  %v1541_v50 = vmax.f32 %v1293_v41, 0.0 }
 0x230   : > { %v1288_v48 = vadd.f32 %v4853_v35, %v1287_v47  ;;  %v1060_v49 = vpop.f32.mrb[116].mxu0  ;;  %v1539_v54 = vmax.f32 %v1285_v43, 0.0 }
 0x231   : > { %v1542_v51 = vmax.f32 %v1296_v46, 0.0  ;;  %v1061_v52 = vadd.f32 %v4761_v63, %v1060_v49  ;;  %v1062_v53 = vpop.f32.mrb[117].mxu0  ;;  %4052 = vmatprep.mubr.bf16.mxu1 %v1175_v45 }
 0x232   : > { %v1540_v55 = vmax.f32 %v1288_v48, 0.0  ;;  %v1063_v56 = vpop.f32.mrb[118].mxu0 }
 0x233   : > { %v1604_v57 = vpack.c.bf16 %v1542_v51, %v1541_v50  ;;  %v1064_v58 = vadd.f32 %v4761_v63, %v1063_v56  ;;  %v1065_v59 = vpop.f32.mrb[119].mxu0  ;;  %v1141_v61 = vmax.f32 %v1061_v52, 0.0 }
 0x234   : > { %v1603_v60 = vpack.c.bf16 %v1540_v55, %v1539_v54 }
 0x235   : > { %v1142_v62 = vmax.f32 %v1064_v58, 0.0 }
 0x237   : > { %v1176_v0 = vpack.c.bf16 %v1142_v62, %v1141_v61 }
 0x238   : > { %v1068_v1 = vpop.f32.mrb[120].mxu0 }
 0x239   : > { %v1069_v2 = vadd.f32 %v4761_v63, %v1068_v1  ;;  %v1070_v3 = vpop.f32.mrb[121].mxu0  ;;  %4053 = vmatmul.mubr.bf16.gmra.mrb[56].mxu1 %v1176_v0 }
 0x23a   : > { %v1071_v4 = vpop.f32.mrb[122].mxu0 }
 0x23b   : > { %v1072_v5 = vadd.f32 %v4761_v63, %v1071_v4  ;;  %v1073_v6 = vpop.f32.mrb[123].mxu0  ;;  %v1143_v8 = vmax.f32 %v1069_v2, 0.0 }
 0x23c   : > { %v4002_v7 = vpop.f32.mrb[4].mxu1 }
 0x23d   : > { %v1144_v9 = vmax.f32 %v1072_v5, 0.0  ;;  %v1309_v10 = vadd.f32 %v4002_v7, %v4853_v35  ;;  %v1300_v11 = vpop.f32.mrb[5].mxu1 }
 0x23e   : > { %v1301_v12 = vadd.f32 %v4853_v35, %v1300_v11  ;;  %v4003_v13 = vpop.f32.mrb[6].mxu1 }
 0x23f   : > { %v1177_v14 = vpack.c.bf16 %v1144_v9, %v1143_v8  ;;  %v1312_v15 = vadd.f32 %v4003_v13, %v4853_v35  ;;  %v1303_v16 = vpop.f32.mrb[7].mxu1  ;;  %v1545_v19 = vmax.f32 %v1309_v10, 0.0 }
 0x240   : > { %v1304_v17 = vadd.f32 %v4853_v35, %v1303_v16  ;;  %v1076_v18 = vpop.f32.mrb[124].mxu0  ;;  %v1543_v23 = vmax.f32 %v1301_v12, 0.0 }
 0x241   : > { %v1546_v20 = vmax.f32 %v1312_v15, 0.0  ;;  %v1077_v21 = vadd.f32 %v4761_v63, %v1076_v18  ;;  %v1078_v22 = vpop.f32.mrb[125].mxu0  ;;  %4056 = vmatprep.mubr.bf16.mxu1 %v1177_v14 }
 0x242   : > { %v1544_v24 = vmax.f32 %v1304_v17, 0.0  ;;  %v1079_v25 = vpop.f32.mrb[126].mxu0 }
 0x243   : > { %v1606_v26 = vpack.c.bf16 %v1546_v20, %v1545_v19  ;;  %v1080_v27 = vadd.f32 %v4761_v63, %v1079_v25  ;;  %v1081_v28 = vpop.f32.mrb[127].mxu0  ;;  %v1145_v30 = vmax.f32 %v1077_v21, 0.0 }
 0x244   : > { %v1605_v29 = vpack.c.bf16 %v1544_v24, %v1543_v23 }
 0x245   : > { %v1146_v31 = vmax.f32 %v1080_v27, 0.0 }
 0x247   : > { %v1178_v32 = vpack.c.bf16 %v1146_v31, %v1145_v30 }
 0x249   : > { %4057 = vmatmul.mubr.bf16.gmra.mrb[60].mxu1 %v1178_v32 }
 0x24a   : > { %4068 = vmatprep.mubr.msk.bf16.mxu1 %vm1674_vm0, %v1603_v60 }
 0x24c   : > { %v4006_v33 = vpop.f32.mrb[8].mxu1 }
 0x24d   : > { %v1325_v34 = vadd.f32 %v4006_v33, %v4853_v35  ;;  %v1316_v36 = vpop.f32.mrb[9].mxu1  ;;  %v4338_v33 = vld [vmem:[%s5597_s7] sm:$0xff]  }
 0x24e   : > { %v1317_v37 = vadd.f32 %v4853_v35, %v1316_v36  ;;  %v4007_v38 = vpop.f32.mrb[10].mxu1  ;;  %4132 = vmatprep.subr.bf16.mxu1 %v4338_v33 }
 0x24f   : > { %v1328_v39 = vadd.f32 %v4007_v38, %v4853_v35  ;;  %v1319_v40 = vpop.f32.mrb[11].mxu1  ;;  %v1549_v41 = vmax.f32 %v1325_v34, 0.0 }
 0x250   : > { %v1320_v63 = vadd.f32 %v4853_v35, %v1319_v40  ;;  %v1547_v43 = vmax.f32 %v1317_v37, 0.0 }
 0x251   : > { %v1550_v42 = vmax.f32 %v1328_v39, 0.0  ;;  %4069 = vmatmul.mubr.msk.bf16.vlgmr.msra.gmra.mrb[64].mxu1 %vm1674_vm0, %v1604_v57 }
 0x252   : > { %v1548_v44 = vmax.f32 %v1320_v63, 0.0  ;;  %4072 = vmatprep.mubr.msk.bf16.mxu1 %vm1674_vm0, %v1605_v29  ;;  %4133 = vmatpush3.bf16.msra.mxu1 %v4338_v33 }
 0x253   : > { %v1608_v45 = vpack.c.bf16 %v1550_v42, %v1549_v41 }
 0x254   : > { %v1607_v46 = vpack.c.bf16 %v1548_v44, %v1547_v43 }
 0x259   : > { %4073 = vmatmul.mubr.msk.bf16.gmra.mrb[68].mxu1 %vm1674_vm0, %v1606_v26 }
 0x25a   : > { %4076 = vmatprep.mubr.msk.bf16.mxu1 %vm1674_vm0, %v1607_v46 }
 0x25c   : > { %v4010_v47 = vpop.f32.mrb[12].mxu1 }
 0x25d   : > { %v1341_v48 = vadd.f32 %v4010_v47, %v4853_v35  ;;  %v1332_v49 = vpop.f32.mrb[13].mxu1 }
 0x25e   : > { %v1333_v50 = vadd.f32 %v4853_v35, %v1332_v49  ;;  %v4011_v51 = vpop.f32.mrb[14].mxu1 }
 0x25f   : > { %v1344_v52 = vadd.f32 %v4011_v51, %v4853_v35  ;;  %v1335_v53 = vpop.f32.mrb[15].mxu1  ;;  %v1553_v55 = vmax.f32 %v1341_v48, 0.0 }
 0x260   : > { %v1336_v54 = vadd.f32 %v4853_v35, %v1335_v53  ;;  %v1551_v57 = vmax.f32 %v1333_v50, 0.0 }
 0x261   : > { %v1554_v56 = vmax.f32 %v1344_v52, 0.0  ;;  %4077 = vmatmul.mubr.msk.bf16.gmra.mrb[72].mxu1 %vm1674_vm0, %v1608_v45 }
 0x262   : > { %v1552_v58 = vmax.f32 %v1336_v54, 0.0 }
 0x263   : > { %v1610_v59 = vpack.c.bf16 %v1554_v56, %v1553_v55  ;;  %v4339_v55 = vld [vmem:[%s5597_s7 + $0x8] sm:$0xff]  }
 0x264   : > { %v1609_v60 = vpack.c.bf16 %v1552_v58, %v1551_v57  ;;  %4134 = vmatprep.subr.bf16.mxu1 %v4339_v55 }
 0x265   : > { %4135 = vmatpush3.bf16.msra.mxu1 %v4339_v55 }
 0x266   : > { %4080 = vmatprep.mubr.msk.bf16.mxu1 %vm1674_vm0, %v1609_v60 }
 0x269   : > { %4081 = vmatmul.mubr.msk.bf16.gmra.mrb[76].mxu1 %vm1674_vm0, %v1610_v59 }
 0x26c   : > { %v4014_v61 = vpop.f32.mrb[16].mxu1 }
 0x26d   : > { %v1357_v62 = vadd.f32 %v4014_v61, %v4853_v35  ;;  %v1348_v0 = vpop.f32.mrb[17].mxu1 }
 0x26e   : > { %v1349_v1 = vadd.f32 %v4853_v35, %v1348_v0  ;;  %v4015_v2 = vpop.f32.mrb[18].mxu1 }
 0x26f   : > { %v1360_v3 = vadd.f32 %v4015_v2, %v4853_v35  ;;  %v1351_v4 = vpop.f32.mrb[19].mxu1  ;;  %v1557_v6 = vmax.f32 %v1357_v62, 0.0 }
 0x270   : > { %v1352_v5 = vadd.f32 %v4853_v35, %v1351_v4  ;;  %v1555_v8 = vmax.f32 %v1349_v1, 0.0 }
 0x271   : > { %v1558_v7 = vmax.f32 %v1360_v3, 0.0 }
 0x272   : > { %v1556_v9 = vmax.f32 %v1352_v5, 0.0 }
 0x273   : > { %v1612_v10 = vpack.c.bf16 %v1558_v7, %v1557_v6 }
 0x274   : > { %v1611_v11 = vpack.c.bf16 %v1556_v9, %v1555_v8 }
 0x276   : > { %4084 = vmatprep.mubr.msk.bf16.mxu1 %vm1674_vm0, %v1611_v11 }
 0x277   : > { %4085 = vmatmul.mubr.msk.bf16.gmra.mrb[80].mxu1 %vm1674_vm0, %v1612_v10 }
 0x27c   : > { %v4018_v12 = vpop.f32.mrb[20].mxu1 }
 0x27d   : > { %v1373_v13 = vadd.f32 %v4018_v12, %v4853_v35  ;;  %v1364_v14 = vpop.f32.mrb[21].mxu1 }
 0x27e   : > { %v1365_v15 = vadd.f32 %v4853_v35, %v1364_v14  ;;  %v4019_v16 = vpop.f32.mrb[22].mxu1 }
 0x27f   : > { %v1376_v17 = vadd.f32 %v4019_v16, %v4853_v35  ;;  %v1367_v18 = vpop.f32.mrb[23].mxu1  ;;  %v1561_v20 = vmax.f32 %v1373_v13, 0.0 }
 0x280   : > { %v1368_v19 = vadd.f32 %v4853_v35, %v1367_v18  ;;  %v1559_v22 = vmax.f32 %v1365_v15, 0.0 }
 0x281   : > { %v1562_v21 = vmax.f32 %v1376_v17, 0.0 }
 0x282   : > { %v1560_v23 = vmax.f32 %v1368_v19, 0.0 }
 0x283   : > { %v1614_v24 = vpack.c.bf16 %v1562_v21, %v1561_v20 }
 0x284   : > { %v1613_v25 = vpack.c.bf16 %v1560_v23, %v1559_v22 }
 0x286   : > { %4088 = vmatprep.mubr.msk.bf16.mxu1 %vm1674_vm0, %v1613_v25 }
 0x287   : > { %4089 = vmatmul.mubr.msk.bf16.gmra.mrb[84].mxu1 %vm1674_vm0, %v1614_v24 }
 0x28c   : > { %v4022_v26 = vpop.f32.mrb[24].mxu1 }
 0x28d   : > { %v1389_v27 = vadd.f32 %v4022_v26, %v4853_v35  ;;  %v1380_v28 = vpop.f32.mrb[25].mxu1 }
 0x28e   : > { %v1381_v29 = vadd.f32 %v4853_v35, %v1380_v28  ;;  %v4023_v30 = vpop.f32.mrb[26].mxu1 }
 0x28f   : > { %v1392_v31 = vadd.f32 %v4023_v30, %v4853_v35  ;;  %v1383_v32 = vpop.f32.mrb[27].mxu1  ;;  %v1565_v36 = vmax.f32 %v1389_v27, 0.0 }
 0x290   : > { %v1384_v34 = vadd.f32 %v4853_v35, %v1383_v32  ;;  %v1563_v38 = vmax.f32 %v1381_v29, 0.0 }
 0x291   : > { %v1566_v37 = vmax.f32 %v1392_v31, 0.0 }
 0x292   : > { %v1564_v39 = vmax.f32 %v1384_v34, 0.0 }
 0x293   : > { %v1616_v40 = vpack.c.bf16 %v1566_v37, %v1565_v36 }
 0x294   : > { %v1615_v63 = vpack.c.bf16 %v1564_v39, %v1563_v38 }
 0x296   : > { %4092 = vmatprep.mubr.msk.bf16.mxu1 %vm1674_vm0, %v1615_v63 }
 0x297   : > { %4093 = vmatmul.mubr.msk.bf16.gmra.mrb[88].mxu1 %vm1674_vm0, %v1616_v40 }
 0x29c   : > { %v4026_v41 = vpop.f32.mrb[28].mxu1 }
 0x29d   : > { %v1405_v42 = vadd.f32 %v4026_v41, %v4853_v35  ;;  %v1396_v43 = vpop.f32.mrb[29].mxu1 }
 0x29e   : > { %v1397_v44 = vadd.f32 %v4853_v35, %v1396_v43  ;;  %v4027_v45 = vpop.f32.mrb[30].mxu1 }
 0x29f   : > { %v1408_v46 = vadd.f32 %v4027_v45, %v4853_v35  ;;  %v1399_v47 = vpop.f32.mrb[31].mxu1  ;;  %v1569_v49 = vmax.f32 %v1405_v42, 0.0 }
 0x2a0   : > { %v1400_v48 = vadd.f32 %v4853_v35, %v1399_v47  ;;  %v1567_v51 = vmax.f32 %v1397_v44, 0.0 }
 0x2a1   : > { %v1570_v50 = vmax.f32 %v1408_v46, 0.0 }
 0x2a2   : > { %v1568_v52 = vmax.f32 %v1400_v48, 0.0 }
 0x2a3   : > { %v1618_v53 = vpack.c.bf16 %v1570_v50, %v1569_v49 }
 0x2a4   : > { %v1617_v54 = vpack.c.bf16 %v1568_v52, %v1567_v51  ;;  %v4944_v52 = vld [vmem:[%s5599_s9] sm:$0xff]  }
 0x2a5   : > { %4200 = vmatprep.subr.bf16.mxu0 %v4944_v52  ;;  %4266 = vmatprep.subr.bf16.mxu1 %v4944_v52 }
 0x2a6   : > { %4096 = vmatprep.mubr.msk.bf16.mxu1 %vm1674_vm0, %v1617_v54  ;;  %4201 = vmatpush3.bf16.msra.mxu0 %v4944_v52 }
 0x2a7   : > { %4097 = vmatmul.mubr.msk.bf16.gmra.mrb[92].mxu1 %vm1674_vm0, %v1618_v53 }
 0x2ac   : > { %v4030_v56 = vpop.f32.mrb[32].mxu1 }
 0x2ad   : > { %v1421_v57 = vadd.f32 %v4030_v56, %v4853_v35  ;;  %v1412_v58 = vpop.f32.mrb[33].mxu1 }
 0x2ae   : > { %v1413_v59 = vadd.f32 %v4853_v35, %v1412_v58  ;;  %v4031_v60 = vpop.f32.mrb[34].mxu1 }
 0x2af   : > { %v1424_v61 = vadd.f32 %v4031_v60, %v4853_v35  ;;  %v1415_v62 = vpop.f32.mrb[35].mxu1  ;;  %v1573_v1 = vmax.f32 %v1421_v57, 0.0 }
 0x2b0   : > { %v1416_v0 = vadd.f32 %v4853_v35, %v1415_v62  ;;  %v1571_v3 = vmax.f32 %v1413_v59, 0.0 }
 0x2b1   : > { %v1574_v2 = vmax.f32 %v1424_v61, 0.0 }
 0x2b2   : > { %v1572_v4 = vmax.f32 %v1416_v0, 0.0 }
 0x2b3   : > { %v1620_v5 = vpack.c.bf16 %v1574_v2, %v1573_v1 }
 0x2b4   : > { %v1619_v6 = vpack.c.bf16 %v1572_v4, %v1571_v3 }
 0x2b6   : > { %4100 = vmatprep.mubr.msk.bf16.mxu1 %vm1674_vm0, %v1619_v6 }
 0x2b7   : > { %4101 = vmatmul.mubr.msk.bf16.gmra.mrb[96].mxu1 %vm1674_vm0, %v1620_v5 }
 0x2bc   : > { %v4034_v7 = vpop.f32.mrb[36].mxu1 }
 0x2bd   : > { %v1437_v8 = vadd.f32 %v4034_v7, %v4853_v35  ;;  %v1428_v9 = vpop.f32.mrb[37].mxu1 }
 0x2be   : > { %v1429_v10 = vadd.f32 %v4853_v35, %v1428_v9  ;;  %v4035_v11 = vpop.f32.mrb[38].mxu1 }
 0x2bf   : > { %v1440_v12 = vadd.f32 %v4035_v11, %v4853_v35  ;;  %v1431_v13 = vpop.f32.mrb[39].mxu1  ;;  %v1577_v15 = vmax.f32 %v1437_v8, 0.0 }
 0x2c0   : > { %v1432_v14 = vadd.f32 %v4853_v35, %v1431_v13  ;;  %v1575_v17 = vmax.f32 %v1429_v10, 0.0 }
 0x2c1   : > { %v1578_v16 = vmax.f32 %v1440_v12, 0.0 }
 0x2c2   : > { %v1576_v18 = vmax.f32 %v1432_v14, 0.0 }
 0x2c3   : > { %v1622_v19 = vpack.c.bf16 %v1578_v16, %v1577_v15 }
 0x2c4   : > { %v1621_v20 = vpack.c.bf16 %v1576_v18, %v1575_v17 }
 0x2c6   : > { %4104 = vmatprep.mubr.msk.bf16.mxu1 %vm1674_vm0, %v1621_v20 }
 0x2c7   : > { %4105 = vmatmul.mubr.msk.bf16.gmra.mrb[100].mxu1 %vm1674_vm0, %v1622_v19 }
 0x2cc   : > { %v4038_v21 = vpop.f32.mrb[40].mxu1 }
 0x2cd   : > { %v1453_v22 = vadd.f32 %v4038_v21, %v4853_v35  ;;  %v1444_v23 = vpop.f32.mrb[41].mxu1 }
 0x2ce   : > { %v1445_v24 = vadd.f32 %v4853_v35, %v1444_v23  ;;  %v4039_v25 = vpop.f32.mrb[42].mxu1 }
 0x2cf   : > { %v1456_v26 = vadd.f32 %v4039_v25, %v4853_v35  ;;  %v1447_v27 = vpop.f32.mrb[43].mxu1  ;;  %v1581_v29 = vmax.f32 %v1453_v22, 0.0 }
 0x2d0   : > { %v1448_v28 = vadd.f32 %v4853_v35, %v1447_v27  ;;  %v1579_v31 = vmax.f32 %v1445_v24, 0.0 }
 0x2d1   : > { %v1582_v30 = vmax.f32 %v1456_v26, 0.0 }
 0x2d2   : > { %v1580_v32 = vmax.f32 %v1448_v28, 0.0 }
 0x2d3   : > { %v1624_v33 = vpack.c.bf16 %v1582_v30, %v1581_v29 }
 0x2d4   : > { %v1623_v34 = vpack.c.bf16 %v1580_v32, %v1579_v31 }
 0x2d6   : > { %4108 = vmatprep.mubr.msk.bf16.mxu1 %vm1674_vm0, %v1623_v34 }
 0x2d7   : > { %4109 = vmatmul.mubr.msk.bf16.gmra.mrb[104].mxu1 %vm1674_vm0, %v1624_v33 }
 0x2dc   : > { %v4042_v36 = vpop.f32.mrb[44].mxu1 }
 0x2dd   : > { %v1469_v37 = vadd.f32 %v4042_v36, %v4853_v35  ;;  %v1460_v38 = vpop.f32.mrb[45].mxu1 }
 0x2de   : > { %v1461_v39 = vadd.f32 %v4853_v35, %v1460_v38  ;;  %v4043_v40 = vpop.f32.mrb[46].mxu1 }
 0x2df   : > { %v1472_v63 = vadd.f32 %v4043_v40, %v4853_v35  ;;  %v1463_v41 = vpop.f32.mrb[47].mxu1  ;;  %v1585_v43 = vmax.f32 %v1469_v37, 0.0 }
 0x2e0   : > { %v1464_v42 = vadd.f32 %v4853_v35, %v1463_v41  ;;  %v1583_v45 = vmax.f32 %v1461_v39, 0.0  ;;  %v4973_v41 = vld [vmem:[%s5596_s6] ss:$0 sm:$0xff] }
 0x2e1   : > { %v1586_v44 = vmax.f32 %v1472_v63, 0.0 }
 0x2e2   : > { %v1584_v46 = vmax.f32 %v1464_v42, 0.0 }
 0x2e3   : > { %v1626_v47 = vpack.c.bf16 %v1586_v44, %v1585_v43 }
 0x2e4   : > { %v1625_v48 = vpack.c.bf16 %v1584_v46, %v1583_v45 }
 0x2e6   : > { %4112 = vmatprep.mubr.msk.bf16.mxu1 %vm1674_vm0, %v1625_v48 }
 0x2e7   : > { %4113 = vmatmul.mubr.msk.bf16.gmra.mrb[108].mxu1 %vm1674_vm0, %v1626_v47 }
 0x2ec   : > { %v4046_v49 = vpop.f32.mrb[48].mxu1 }
 0x2ed   : > { %v1485_v50 = vadd.f32 %v4046_v49, %v4853_v35  ;;  %v1476_v51 = vpop.f32.mrb[49].mxu1 }
 0x2ee   : > { %v1477_v53 = vadd.f32 %v4853_v35, %v1476_v51  ;;  %v4047_v54 = vpop.f32.mrb[50].mxu1 }
 0x2ef   : > { %v1488_v55 = vadd.f32 %v4047_v54, %v4853_v35  ;;  %v1479_v56 = vpop.f32.mrb[51].mxu1  ;;  %v1589_v58 = vmax.f32 %v1485_v50, 0.0 }
 0x2f0   : > { %v1480_v57 = vadd.f32 %v4853_v35, %v1479_v56  ;;  %v1587_v60 = vmax.f32 %v1477_v53, 0.0 }
 0x2f1   : > { %v1590_v59 = vmax.f32 %v1488_v55, 0.0 }
 0x2f2   : > { %v1588_v61 = vmax.f32 %v1480_v57, 0.0 }
 0x2f3   : > { %v1628_v62 = vpack.c.bf16 %v1590_v59, %v1589_v58 }
 0x2f4   : > { %v1627_v0 = vpack.c.bf16 %v1588_v61, %v1587_v60 }
 0x2f6   : > { %4116 = vmatprep.mubr.msk.bf16.mxu1 %vm1674_vm0, %v1627_v0 }
 0x2f7   : > { %4117 = vmatmul.mubr.msk.bf16.gmra.mrb[112].mxu1 %vm1674_vm0, %v1628_v62 }
 0x2fc   : > { %v4050_v1 = vpop.f32.mrb[52].mxu1 }
 0x2fd   : > { %v1501_v2 = vadd.f32 %v4050_v1, %v4853_v35  ;;  %v1492_v3 = vpop.f32.mrb[53].mxu1 }
 0x2fe   : > { %v1493_v4 = vadd.f32 %v4853_v35, %v1492_v3  ;;  %v4051_v5 = vpop.f32.mrb[54].mxu1 }
 0x2ff   : > { %v1504_v6 = vadd.f32 %v4051_v5, %v4853_v35  ;;  %v1495_v7 = vpop.f32.mrb[55].mxu1  ;;  %v1593_v9 = vmax.f32 %v1501_v2, 0.0 }
 0x300   : > { %v1496_v8 = vadd.f32 %v4853_v35, %v1495_v7  ;;  %v1591_v11 = vmax.f32 %v1493_v4, 0.0 }
 0x301   : > { %v1594_v10 = vmax.f32 %v1504_v6, 0.0 }
 0x302   : > { %v1592_v12 = vmax.f32 %v1496_v8, 0.0 }
 0x303   : > { %v1630_v13 = vpack.c.bf16 %v1594_v10, %v1593_v9 }
 0x304   : > { %v1629_v14 = vpack.c.bf16 %v1592_v12, %v1591_v11 }
 0x306   : > { %4120 = vmatprep.mubr.msk.bf16.mxu1 %vm1674_vm0, %v1629_v14 }
 0x307   : > { %4121 = vmatmul.mubr.msk.bf16.gmra.mrb[116].mxu1 %vm1674_vm0, %v1630_v13 }
 0x30c   : > { %v4054_v15 = vpop.f32.mrb[56].mxu1 }
 0x30d   : > { %v1517_v16 = vadd.f32 %v4054_v15, %v4853_v35  ;;  %v1508_v17 = vpop.f32.mrb[57].mxu1 }
 0x30e   : > { %v1509_v18 = vadd.f32 %v4853_v35, %v1508_v17  ;;  %v4055_v19 = vpop.f32.mrb[58].mxu1 }
 0x30f   : > { %v1520_v20 = vadd.f32 %v4055_v19, %v4853_v35  ;;  %v1511_v21 = vpop.f32.mrb[59].mxu1  ;;  %v1597_v23 = vmax.f32 %v1517_v16, 0.0 }
 0x310   : > { %v1512_v22 = vadd.f32 %v4853_v35, %v1511_v21  ;;  %v1595_v25 = vmax.f32 %v1509_v18, 0.0 }
 0x311   : > { %v1598_v24 = vmax.f32 %v1520_v20, 0.0 }
 0x312   : > { %v1596_v26 = vmax.f32 %v1512_v22, 0.0 }
 0x313   : > { %v1632_v27 = vpack.c.bf16 %v1598_v24, %v1597_v23 }
 0x314   : > { %v1631_v28 = vpack.c.bf16 %v1596_v26, %v1595_v25 }
 0x316   : > { %4124 = vmatprep.mubr.msk.bf16.mxu1 %vm1674_vm0, %v1631_v28 }
 0x317   : > { %4125 = vmatmul.mubr.msk.bf16.gmra.mrb[120].mxu1 %vm1674_vm0, %v1632_v27 }
 0x31c   : > { %v4058_v29 = vpop.f32.mrb[60].mxu1 }
 0x31d   : > { %v1533_v30 = vadd.f32 %v4058_v29, %v4853_v35  ;;  %v1524_v31 = vpop.f32.mrb[61].mxu1 }
 0x31e   : > { %v1525_v32 = vadd.f32 %v4853_v35, %v1524_v31  ;;  %v4059_v33 = vpop.f32.mrb[62].mxu1 }
 0x31f   : > { %v1536_v34 = vadd.f32 %v4059_v33, %v4853_v35  ;;  %v1527_v36 = vpop.f32.mrb[63].mxu1  ;;  %v1601_v38 = vmax.f32 %v1533_v30, 0.0 }
 0x320   : > { %v1528_v37 = vadd.f32 %v4853_v35, %v1527_v36  ;;  %v1599_v40 = vmax.f32 %v1525_v32, 0.0 }
 0x321   : > { %v1602_v39 = vmax.f32 %v1536_v34, 0.0 }
 0x322   : > { %v1600_v63 = vmax.f32 %v1528_v37, 0.0 }
 0x323   : > { %v1634_v42 = vpack.c.bf16 %v1602_v39, %v1601_v38 }
 0x324   : > { %v1633_v43 = vpack.c.bf16 %v1600_v63, %v1599_v40  ;;  %v4070_v44 = vpop.f32.mrb[64].mxu1 }
 0x325   : > { %v1814_v45 = vadd.f32 %v4070_v44, %v4973_v41  ;;  %v1805_v46 = vpop.f32.mrb[65].mxu1 }
 0x326   : > { %v1806_v47 = vadd.f32 %v4973_v41, %v1805_v46  ;;  %v4071_v48 = vpop.f32.mrb[66].mxu1  ;;  %4128 = vmatprep.mubr.msk.bf16.mxu1 %vm1674_vm0, %v1633_v43 }
 0x327   : > { %v1817_v35 = vadd.f32 %v4071_v48, %v4973_v41  ;;  %v1808_v49 = vpop.f32.mrb[67].mxu1  ;;  %4129 = vmatmul.mubr.msk.bf16.gmra.mrb[124].mxu1 %vm1674_vm0, %v1634_v42  ;;  %v2062_v51 = vmax.f32 %v1814_v45, 0.0 }
 0x328   : > { %v1809_v50 = vadd.f32 %v4973_v41, %v1808_v49  ;;  %v2060_v54 = vmax.f32 %v1806_v47, 0.0 }
 0x329   : > { %v2063_v53 = vmax.f32 %v1817_v35, 0.0 }
 0x32a   : > { %v2061_v55 = vmax.f32 %v1809_v50, 0.0 }
 0x32b   : > { %v2125_v56 = vpack.c.bf16 %v2063_v53, %v2062_v51 }
 0x32c   : > { %v2124_v57 = vpack.c.bf16 %v2061_v55, %v2060_v54  ;;  %v4074_v58 = vpop.f32.mrb[68].mxu1 }
 0x32d   : > { %v1830_v59 = vadd.f32 %v4074_v58, %v4973_v41  ;;  %v1821_v60 = vpop.f32.mrb[69].mxu1 }
 0x32e   : > { %v1822_v61 = vadd.f32 %v4973_v41, %v1821_v60  ;;  %v4075_v62 = vpop.f32.mrb[70].mxu1  ;;  %4136 = vmatprep.mubr.msk.bf16.mxu1 %vm2179_vm1, %v2124_v57 }
 0x32f   : > { %v1833_v0 = vadd.f32 %v4075_v62, %v4973_v41  ;;  %v1824_v1 = vpop.f32.mrb[71].mxu1  ;;  %4137 = vmatmul.mubr.msk.bf16.vlgmr.msra.gmra.mrb[128].mxu1 %vm2179_vm1, %v2125_v56  ;;  %v2066_v3 = vmax.f32 %v1830_v59, 0.0 }
 0x330   : > { %v1825_v2 = vadd.f32 %v4973_v41, %v1824_v1  ;;  %4267 = vmatpush3.bf16.msra.mxu1 %v4944_v52  ;;  %v2064_v5 = vmax.f32 %v1822_v61, 0.0 }
 0x331   : > { %v2067_v4 = vmax.f32 %v1833_v0, 0.0 }
 0x332   : > { %v2065_v6 = vmax.f32 %v1825_v2, 0.0 }
 0x333   : > { %v2127_v7 = vpack.c.bf16 %v2067_v4, %v2066_v3 }
 0x334   : > { %v2126_v8 = vpack.c.bf16 %v2065_v6, %v2064_v5  ;;  %v4078_v9 = vpop.f32.mrb[72].mxu1 }
 0x335   : > { %v1846_v10 = vadd.f32 %v4078_v9, %v4973_v41  ;;  %v1837_v11 = vpop.f32.mrb[73].mxu1 }
 0x336   : > { %v1838_v12 = vadd.f32 %v4973_v41, %v1837_v11  ;;  %v4079_v13 = vpop.f32.mrb[74].mxu1  ;;  %4140 = vmatprep.mubr.msk.bf16.mxu1 %vm2179_vm1, %v2126_v8 }
 0x337   : > { %v1849_v14 = vadd.f32 %v4079_v13, %v4973_v41  ;;  %v1840_v15 = vpop.f32.mrb[75].mxu1  ;;  %4141 = vmatmul.mubr.msk.bf16.gmra.mrb[132].mxu1 %vm2179_vm1, %v2127_v7  ;;  %v2070_v16 = vmax.f32 %v1846_v10, 0.0 }
 0x338   : > { %v1841_v52 = vadd.f32 %v4973_v41, %v1840_v15  ;;  %v2068_v18 = vmax.f32 %v1838_v12, 0.0 }
 0x339   : > { %v2071_v17 = vmax.f32 %v1849_v14, 0.0 }
 0x33a   : > { %v2069_v19 = vmax.f32 %v1841_v52, 0.0 }
 0x33b   : > { %v2129_v20 = vpack.c.bf16 %v2071_v17, %v2070_v16 }
 0x33c   : > { %v2128_v21 = vpack.c.bf16 %v2069_v19, %v2068_v18  ;;  %v4082_v22 = vpop.f32.mrb[76].mxu1 }
 0x33d   : > { %v1862_v23 = vadd.f32 %v4082_v22, %v4973_v41  ;;  %v1853_v24 = vpop.f32.mrb[77].mxu1 }
 0x33e   : > { %v1854_v25 = vadd.f32 %v4973_v41, %v1853_v24  ;;  %v4083_v26 = vpop.f32.mrb[78].mxu1  ;;  %4144 = vmatprep.mubr.msk.bf16.mxu1 %vm2179_vm1, %v2128_v21 }
 0x33f   : > { %v1865_v27 = vadd.f32 %v4083_v26, %v4973_v41  ;;  %v1856_v28 = vpop.f32.mrb[79].mxu1  ;;  %4145 = vmatmul.mubr.msk.bf16.gmra.mrb[136].mxu1 %vm2179_vm1, %v2129_v20  ;;  %v2074_v30 = vmax.f32 %v1862_v23, 0.0 }
 0x340   : > { %v1857_v29 = vadd.f32 %v4973_v41, %v1856_v28  ;;  %v2072_v32 = vmax.f32 %v1854_v25, 0.0 }
 0x341   : > { %v2075_v31 = vmax.f32 %v1865_v27, 0.0 }
 0x342   : > { %v2073_v33 = vmax.f32 %v1857_v29, 0.0 }
 0x343   : > { %v2131_v34 = vpack.c.bf16 %v2075_v31, %v2074_v30 }
 0x344   : > { %v2130_v36 = vpack.c.bf16 %v2073_v33, %v2072_v32 }
 0x346   : > { %4148 = vmatprep.mubr.msk.bf16.mxu1 %vm2179_vm1, %v2130_v36 }
 0x347   : > { %4149 = vmatmul.mubr.msk.bf16.gmra.mrb[140].mxu1 %vm2179_vm1, %v2131_v34 }
 0x34a   : > { %v4086_v37 = vpop.f32.mrb[80].mxu1 }
 0x34b   : > { %v1878_v38 = vadd.f32 %v4086_v37, %v4973_v41  ;;  %v1869_v39 = vpop.f32.mrb[81].mxu1 }
 0x34c   : > { %v1870_v40 = vadd.f32 %v4973_v41, %v1869_v39  ;;  %v4087_v63 = vpop.f32.mrb[82].mxu1 }
 0x34d   : > { %v1881_v42 = vadd.f32 %v4087_v63, %v4973_v41  ;;  %v1872_v43 = vpop.f32.mrb[83].mxu1  ;;  %v2078_v45 = vmax.f32 %v1878_v38, 0.0 }
 0x34e   : > { %v1873_v44 = vadd.f32 %v4973_v41, %v1872_v43  ;;  %v2076_v47 = vmax.f32 %v1870_v40, 0.0 }
 0x34f   : > { %v2079_v46 = vmax.f32 %v1881_v42, 0.0 }
 0x350   : > { %v2077_v48 = vmax.f32 %v1873_v44, 0.0 }
 0x351   : > { %v2133_v35 = vpack.c.bf16 %v2079_v46, %v2078_v45 }
 0x352   : > { %v2132_v49 = vpack.c.bf16 %v2077_v48, %v2076_v47 }
 0x354   : > { %4152 = vmatprep.mubr.msk.bf16.mxu1 %vm2179_vm1, %v2132_v49 }
 0x355   : > { %4153 = vmatmul.mubr.msk.bf16.gmra.mrb[144].mxu1 %vm2179_vm1, %v2133_v35 }
 0x35a   : > { %v4090_v50 = vpop.f32.mrb[84].mxu1 }
 0x35b   : > { %v1894_v51 = vadd.f32 %v4090_v50, %v4973_v41  ;;  %v1885_v53 = vpop.f32.mrb[85].mxu1 }
 0x35c   : > { %v1886_v54 = vadd.f32 %v4973_v41, %v1885_v53  ;;  %v4091_v55 = vpop.f32.mrb[86].mxu1 }
 0x35d   : > { %v1897_v56 = vadd.f32 %v4091_v55, %v4973_v41  ;;  %v1888_v57 = vpop.f32.mrb[87].mxu1  ;;  %v2082_v59 = vmax.f32 %v1894_v51, 0.0 }
 0x35e   : > { %v1889_v58 = vadd.f32 %v4973_v41, %v1888_v57  ;;  %v2080_v61 = vmax.f32 %v1886_v54, 0.0 }
 0x35f   : > { %v2083_v60 = vmax.f32 %v1897_v56, 0.0 }
 0x360   : > { %v2081_v62 = vmax.f32 %v1889_v58, 0.0 }
 0x361   : > { %v2135_v0 = vpack.c.bf16 %v2083_v60, %v2082_v59 }
 0x362   : > { %v2134_v1 = vpack.c.bf16 %v2081_v62, %v2080_v61 }
 0x364   : > { %4156 = vmatprep.mubr.msk.bf16.mxu1 %vm2179_vm1, %v2134_v1 }
 0x365   : > { %4157 = vmatmul.mubr.msk.bf16.gmra.mrb[148].mxu1 %vm2179_vm1, %v2135_v0 }
 0x36a   : > { %v4094_v2 = vpop.f32.mrb[88].mxu1 }
 0x36b   : > { %v1910_v3 = vadd.f32 %v4094_v2, %v4973_v41  ;;  %v1901_v4 = vpop.f32.mrb[89].mxu1 }
 0x36c   : > { %v1902_v5 = vadd.f32 %v4973_v41, %v1901_v4  ;;  %v4095_v6 = vpop.f32.mrb[90].mxu1 }
 0x36d   : > { %v1913_v7 = vadd.f32 %v4095_v6, %v4973_v41  ;;  %v1904_v8 = vpop.f32.mrb[91].mxu1  ;;  %v2086_v10 = vmax.f32 %v1910_v3, 0.0 }
 0x36e   : > { %v1905_v9 = vadd.f32 %v4973_v41, %v1904_v8  ;;  %v2084_v12 = vmax.f32 %v1902_v5, 0.0 }
 0x36f   : > { %v2087_v11 = vmax.f32 %v1913_v7, 0.0 }
 0x370   : > { %v2085_v13 = vmax.f32 %v1905_v9, 0.0 }
 0x371   : > { %v2137_v14 = vpack.c.bf16 %v2087_v11, %v2086_v10 }
 0x372   : > { %v2136_v15 = vpack.c.bf16 %v2085_v13, %v2084_v12 }
 0x374   : > { %4160 = vmatprep.mubr.msk.bf16.mxu1 %vm2179_vm1, %v2136_v15 }
 0x375   : > { %4161 = vmatmul.mubr.msk.bf16.gmra.mrb[152].mxu1 %vm2179_vm1, %v2137_v14 }
 0x37a   : > { %v4098_v52 = vpop.f32.mrb[92].mxu1 }
 0x37b   : > { %v1926_v16 = vadd.f32 %v4098_v52, %v4973_v41  ;;  %v1917_v17 = vpop.f32.mrb[93].mxu1 }
 0x37c   : > { %v1918_v18 = vadd.f32 %v4973_v41, %v1917_v17  ;;  %v4099_v19 = vpop.f32.mrb[94].mxu1 }
 0x37d   : > { %v1929_v20 = vadd.f32 %v4099_v19, %v4973_v41  ;;  %v1920_v21 = vpop.f32.mrb[95].mxu1  ;;  %v2090_v23 = vmax.f32 %v1926_v16, 0.0 }
 0x37e   : > { %v1921_v22 = vadd.f32 %v4973_v41, %v1920_v21  ;;  %v2088_v25 = vmax.f32 %v1918_v18, 0.0 }
 0x37f   : > { %v2091_v24 = vmax.f32 %v1929_v20, 0.0 }
 0x380   : > { %v2089_v26 = vmax.f32 %v1921_v22, 0.0 }
 0x381   : > { %v2139_v27 = vpack.c.bf16 %v2091_v24, %v2090_v23 }
 0x382   : > { %v2138_v28 = vpack.c.bf16 %v2089_v26, %v2088_v25 }
 0x384   : > { %4164 = vmatprep.mubr.msk.bf16.mxu1 %vm2179_vm1, %v2138_v28 }
 0x385   : > { %4165 = vmatmul.mubr.msk.bf16.gmra.mrb[156].mxu1 %vm2179_vm1, %v2139_v27 }
 0x38a   : > { %v4102_v29 = vpop.f32.mrb[96].mxu1 }
 0x38b   : > { %v1942_v30 = vadd.f32 %v4102_v29, %v4973_v41  ;;  %v1933_v31 = vpop.f32.mrb[97].mxu1 }
 0x38c   : > { %v1934_v32 = vadd.f32 %v4973_v41, %v1933_v31  ;;  %v4103_v33 = vpop.f32.mrb[98].mxu1 }
 0x38d   : > { %v1945_v34 = vadd.f32 %v4103_v33, %v4973_v41  ;;  %v1936_v36 = vpop.f32.mrb[99].mxu1  ;;  %v2094_v38 = vmax.f32 %v1942_v30, 0.0 }
 0x38e   : > { %v1937_v37 = vadd.f32 %v4973_v41, %v1936_v36  ;;  %v2092_v40 = vmax.f32 %v1934_v32, 0.0 }
 0x38f   : > { %v2095_v39 = vmax.f32 %v1945_v34, 0.0 }
 0x390   : > { %v2093_v63 = vmax.f32 %v1937_v37, 0.0 }
 0x391   : > { %v2141_v42 = vpack.c.bf16 %v2095_v39, %v2094_v38 }
 0x392   : > { %v2140_v43 = vpack.c.bf16 %v2093_v63, %v2092_v40 }
 0x394   : > { %4168 = vmatprep.mubr.msk.bf16.mxu1 %vm2179_vm1, %v2140_v43 }
 0x395   : > { %4169 = vmatmul.mubr.msk.bf16.gmra.mrb[160].mxu1 %vm2179_vm1, %v2141_v42 }
 0x39a   : > { %v4106_v44 = vpop.f32.mrb[100].mxu1 }
 0x39b   : > { %v1958_v45 = vadd.f32 %v4106_v44, %v4973_v41  ;;  %v1949_v46 = vpop.f32.mrb[101].mxu1 }
 0x39c   : > { %v1950_v47 = vadd.f32 %v4973_v41, %v1949_v46  ;;  %v4107_v48 = vpop.f32.mrb[102].mxu1 }
 0x39d   : > { %v1961_v35 = vadd.f32 %v4107_v48, %v4973_v41  ;;  %v1952_v49 = vpop.f32.mrb[103].mxu1  ;;  %v2098_v51 = vmax.f32 %v1958_v45, 0.0 }
 0x39e   : > { %v1953_v50 = vadd.f32 %v4973_v41, %v1952_v49  ;;  %v2096_v54 = vmax.f32 %v1950_v47, 0.0 }
 0x39f   : > { %v2099_v53 = vmax.f32 %v1961_v35, 0.0 }
 0x3a0   : > { %v2097_v55 = vmax.f32 %v1953_v50, 0.0 }
 0x3a1   : > { %v2143_v56 = vpack.c.bf16 %v2099_v53, %v2098_v51 }
 0x3a2   : > { %v2142_v57 = vpack.c.bf16 %v2097_v55, %v2096_v54 }
 0x3a4   : > { %4172 = vmatprep.mubr.msk.bf16.mxu1 %vm2179_vm1, %v2142_v57 }
 0x3a5   : > { %4173 = vmatmul.mubr.msk.bf16.gmra.mrb[164].mxu1 %vm2179_vm1, %v2143_v56 }
 0x3aa   : > { %v4110_v58 = vpop.f32.mrb[104].mxu1 }
 0x3ab   : > { %v1974_v59 = vadd.f32 %v4110_v58, %v4973_v41  ;;  %v1965_v60 = vpop.f32.mrb[105].mxu1 }
 0x3ac   : > { %v1966_v61 = vadd.f32 %v4973_v41, %v1965_v60  ;;  %v4111_v62 = vpop.f32.mrb[106].mxu1 }
 0x3ad   : > { %v1977_v0 = vadd.f32 %v4111_v62, %v4973_v41  ;;  %v1968_v1 = vpop.f32.mrb[107].mxu1  ;;  %v2102_v3 = vmax.f32 %v1974_v59, 0.0 }
 0x3ae   : > { %v1969_v2 = vadd.f32 %v4973_v41, %v1968_v1  ;;  %v2100_v5 = vmax.f32 %v1966_v61, 0.0 }
 0x3af   : > { %v2103_v4 = vmax.f32 %v1977_v0, 0.0 }
 0x3b0   : > { %v2101_v6 = vmax.f32 %v1969_v2, 0.0 }
 0x3b1   : > { %v2145_v7 = vpack.c.bf16 %v2103_v4, %v2102_v3 }
 0x3b2   : > { %v2144_v8 = vpack.c.bf16 %v2101_v6, %v2100_v5 }
 0x3b4   : > { %4176 = vmatprep.mubr.msk.bf16.mxu1 %vm2179_vm1, %v2144_v8 }
 0x3b5   : > { %4177 = vmatmul.mubr.msk.bf16.gmra.mrb[168].mxu1 %vm2179_vm1, %v2145_v7 }
 0x3ba   : > { %v4114_v9 = vpop.f32.mrb[108].mxu1 }
 0x3bb   : > { %v1990_v10 = vadd.f32 %v4114_v9, %v4973_v41  ;;  %v1981_v11 = vpop.f32.mrb[109].mxu1 }
 0x3bc   : > { %v1982_v12 = vadd.f32 %v4973_v41, %v1981_v11  ;;  %v4115_v13 = vpop.f32.mrb[110].mxu1 }
 0x3bd   : > { %v1993_v14 = vadd.f32 %v4115_v13, %v4973_v41  ;;  %v1984_v15 = vpop.f32.mrb[111].mxu1  ;;  %v2106_v16 = vmax.f32 %v1990_v10, 0.0 }
 0x3be   : > { %v1985_v52 = vadd.f32 %v4973_v41, %v1984_v15  ;;  %v2104_v18 = vmax.f32 %v1982_v12, 0.0 }
 0x3bf   : > { %v2107_v17 = vmax.f32 %v1993_v14, 0.0  ;;  %v5075_v14 = vld [vmem:[%s5598_s8] ss:$0 sm:$0xff] }
 0x3c0   : > { %v2105_v19 = vmax.f32 %v1985_v52, 0.0 }
 0x3c1   : > { %v2147_v20 = vpack.c.bf16 %v2107_v17, %v2106_v16 }
 0x3c2   : > { %v2146_v21 = vpack.c.bf16 %v2105_v19, %v2104_v18 }
 0x3c4   : > { %4180 = vmatprep.mubr.msk.bf16.mxu1 %vm2179_vm1, %v2146_v21 }
 0x3c5   : > { %4181 = vmatmul.mubr.msk.bf16.gmra.mrb[172].mxu1 %vm2179_vm1, %v2147_v20 }
 0x3ca   : > { %v4118_v22 = vpop.f32.mrb[112].mxu1 }
 0x3cb   : > { %v2006_v23 = vadd.f32 %v4118_v22, %v4973_v41  ;;  %v1997_v24 = vpop.f32.mrb[113].mxu1 }
 0x3cc   : > { %v1998_v25 = vadd.f32 %v4973_v41, %v1997_v24  ;;  %v4119_v26 = vpop.f32.mrb[114].mxu1 }
 0x3cd   : > { %v2009_v27 = vadd.f32 %v4119_v26, %v4973_v41  ;;  %v2000_v28 = vpop.f32.mrb[115].mxu1  ;;  %v2110_v30 = vmax.f32 %v2006_v23, 0.0 }
 0x3ce   : > { %v2001_v29 = vadd.f32 %v4973_v41, %v2000_v28  ;;  %v2108_v32 = vmax.f32 %v1998_v25, 0.0 }
 0x3cf   : > { %v2111_v31 = vmax.f32 %v2009_v27, 0.0 }
 0x3d0   : > { %v2109_v33 = vmax.f32 %v2001_v29, 0.0 }
 0x3d1   : > { %v2149_v34 = vpack.c.bf16 %v2111_v31, %v2110_v30 }
 0x3d2   : > { %v2148_v36 = vpack.c.bf16 %v2109_v33, %v2108_v32 }
 0x3d4   : > { %4184 = vmatprep.mubr.msk.bf16.mxu1 %vm2179_vm1, %v2148_v36 }
 0x3d5   : > { %4185 = vmatmul.mubr.msk.bf16.gmra.mrb[176].mxu1 %vm2179_vm1, %v2149_v34 }
 0x3da   : > { %v4122_v37 = vpop.f32.mrb[116].mxu1 }
 0x3db   : > { %v2022_v38 = vadd.f32 %v4122_v37, %v4973_v41  ;;  %v2013_v39 = vpop.f32.mrb[117].mxu1 }
 0x3dc   : > { %v2014_v40 = vadd.f32 %v4973_v41, %v2013_v39  ;;  %v4123_v63 = vpop.f32.mrb[118].mxu1 }
 0x3dd   : > { %v2025_v42 = vadd.f32 %v4123_v63, %v4973_v41  ;;  %v2016_v43 = vpop.f32.mrb[119].mxu1  ;;  %v2114_v45 = vmax.f32 %v2022_v38, 0.0 }
 0x3de   : > { %v2017_v44 = vadd.f32 %v4973_v41, %v2016_v43  ;;  %v2112_v47 = vmax.f32 %v2014_v40, 0.0 }
 0x3df   : > { %v2115_v46 = vmax.f32 %v2025_v42, 0.0 }
 0x3e0   : > { %v2113_v48 = vmax.f32 %v2017_v44, 0.0 }
 0x3e1   : > { %v2151_v35 = vpack.c.bf16 %v2115_v46, %v2114_v45 }
 0x3e2   : > { %v2150_v49 = vpack.c.bf16 %v2113_v48, %v2112_v47 }
 0x3e4   : > { %4188 = vmatprep.mubr.msk.bf16.mxu1 %vm2179_vm1, %v2150_v49 }
 0x3e5   : > { %4189 = vmatmul.mubr.msk.bf16.gmra.mrb[180].mxu1 %vm2179_vm1, %v2151_v35 }
 0x3ea   : > { %v4126_v50 = vpop.f32.mrb[120].mxu1 }
 0x3eb   : > { %v2038_v51 = vadd.f32 %v4126_v50, %v4973_v41  ;;  %v2029_v53 = vpop.f32.mrb[121].mxu1 }
 0x3ec   : > { %v2030_v54 = vadd.f32 %v4973_v41, %v2029_v53  ;;  %v4127_v55 = vpop.f32.mrb[122].mxu1 }
 0x3ed   : > { %v2041_v56 = vadd.f32 %v4127_v55, %v4973_v41  ;;  %v2032_v57 = vpop.f32.mrb[123].mxu1  ;;  %v2118_v59 = vmax.f32 %v2038_v51, 0.0 }
 0x3ee   : > { %v2033_v58 = vadd.f32 %v4973_v41, %v2032_v57  ;;  %v2116_v61 = vmax.f32 %v2030_v54, 0.0 }
 0x3ef   : > { %v2119_v60 = vmax.f32 %v2041_v56, 0.0 }
 0x3f0   : > { %v2117_v62 = vmax.f32 %v2033_v58, 0.0 }
 0x3f1   : > { %v2153_v0 = vpack.c.bf16 %v2119_v60, %v2118_v59 }
 0x3f2   : > { %v2152_v1 = vpack.c.bf16 %v2117_v62, %v2116_v61 }
 0x3f4   : > { %4192 = vmatprep.mubr.msk.bf16.mxu1 %vm2179_vm1, %v2152_v1 }
 0x3f5   : > { %4193 = vmatmul.mubr.msk.bf16.gmra.mrb[184].mxu1 %vm2179_vm1, %v2153_v0 }
 0x3fa   : > { %v4130_v2 = vpop.f32.mrb[124].mxu1 }
 0x3fb   : > { %v2054_v3 = vadd.f32 %v4130_v2, %v4973_v41  ;;  %v2045_v4 = vpop.f32.mrb[125].mxu1 }
 0x3fc   : > { %v2046_v5 = vadd.f32 %v4973_v41, %v2045_v4  ;;  %v4131_v6 = vpop.f32.mrb[126].mxu1 }
 0x3fd   : > { %v2057_v7 = vadd.f32 %v4131_v6, %v4973_v41  ;;  %v2048_v8 = vpop.f32.mrb[127].mxu1  ;;  %v2122_v10 = vmax.f32 %v2054_v3, 0.0 }
 0x3fe   : > { %v2049_v9 = vadd.f32 %v4973_v41, %v2048_v8  ;;  %v2120_v12 = vmax.f32 %v2046_v5, 0.0 }
 0x3ff   : > { %v2123_v11 = vmax.f32 %v2057_v7, 0.0 }
 0x400   : > { %v2121_v13 = vmax.f32 %v2049_v9, 0.0 }
 0x401   : > { %v2155_v15 = vpack.c.bf16 %v2123_v11, %v2122_v10 }
 0x402   : > { %v2154_v52 = vpack.c.bf16 %v2121_v13, %v2120_v12  ;;  %v4138_v16 = vpop.f32.mrb[128].mxu1 }
 0x403   : > { %v2319_v17 = vadd.f32 %v4138_v16, %v5075_v14  ;;  %v2310_v18 = vpop.f32.mrb[129].mxu1 }
 0x404   : > { %v2311_v19 = vadd.f32 %v5075_v14, %v2310_v18  ;;  %v4139_v20 = vpop.f32.mrb[130].mxu1  ;;  %4196 = vmatprep.mubr.msk.bf16.mxu1 %vm2179_vm1, %v2154_v52 }
 0x405   : > { %v2322_v41 = vadd.f32 %v4139_v20, %v5075_v14  ;;  %v2313_v21 = vpop.f32.mrb[131].mxu1  ;;  %4197 = vmatmul.mubr.msk.bf16.gmra.mrb[188].mxu1 %vm2179_vm1, %v2155_v15  ;;  %v2567_v23 = vmax.f32 %v2319_v17, 0.0 }
 0x406   : > { %v2314_v22 = vadd.f32 %v5075_v14, %v2313_v21  ;;  %v2565_v25 = vmax.f32 %v2311_v19, 0.0 }
 0x407   : > { %v2568_v24 = vmax.f32 %v2322_v41, 0.0 }
 0x408   : > { %v2566_v26 = vmax.f32 %v2314_v22, 0.0 }
 0x409   : > { %v2630_v27 = vpack.c.bf16 %v2568_v24, %v2567_v23 }
 0x40a   : > { %v2629_v28 = vpack.c.bf16 %v2566_v26, %v2565_v25  ;;  %v4142_v29 = vpop.f32.mrb[132].mxu1 }
 0x40b   : > { %v2335_v30 = vadd.f32 %v4142_v29, %v5075_v14  ;;  %v2326_v31 = vpop.f32.mrb[133].mxu1 }
 0x40c   : > { %v2327_v32 = vadd.f32 %v5075_v14, %v2326_v31  ;;  %v4143_v33 = vpop.f32.mrb[134].mxu1  ;;  %4202 = vmatprep.mubr.msk.bf16.mxu0 %vm2676_vm2, %v2629_v28 }
 0x40d   : > { %v2338_v34 = vadd.f32 %v4143_v33, %v5075_v14  ;;  %v2329_v36 = vpop.f32.mrb[135].mxu1  ;;  %4203 = vmatmul.mubr.msk.bf16.vlgmr.msra.gmra.mrb[128].mxu0 %vm2676_vm2, %v2630_v27  ;;  %v2571_v38 = vmax.f32 %v2335_v30, 0.0 }
 0x40e   : > { %v2330_v37 = vadd.f32 %v5075_v14, %v2329_v36  ;;  %v2569_v40 = vmax.f32 %v2327_v32, 0.0 }
 0x40f   : > { %v2572_v39 = vmax.f32 %v2338_v34, 0.0 }
 0x410   : > { %v2570_v63 = vmax.f32 %v2330_v37, 0.0 }
 0x411   : > { %v2632_v42 = vpack.c.bf16 %v2572_v39, %v2571_v38 }
 0x412   : > { %v2631_v43 = vpack.c.bf16 %v2570_v63, %v2569_v40  ;;  %v4146_v44 = vpop.f32.mrb[136].mxu1 }
 0x413   : > { %v2351_v45 = vadd.f32 %v4146_v44, %v5075_v14  ;;  %v2342_v46 = vpop.f32.mrb[137].mxu1 }
 0x414   : > { %v2343_v47 = vadd.f32 %v5075_v14, %v2342_v46  ;;  %v4147_v48 = vpop.f32.mrb[138].mxu1  ;;  %4206 = vmatprep.mubr.msk.bf16.mxu0 %vm2676_vm2, %v2631_v43 }
 0x415   : > { %v2354_v35 = vadd.f32 %v4147_v48, %v5075_v14  ;;  %v2345_v49 = vpop.f32.mrb[139].mxu1  ;;  %4207 = vmatmul.mubr.msk.bf16.gmra.mrb[132].mxu0 %vm2676_vm2, %v2632_v42  ;;  %v2575_v51 = vmax.f32 %v2351_v45, 0.0 }
 0x416   : > { %v2346_v50 = vadd.f32 %v5075_v14, %v2345_v49  ;;  %v2573_v54 = vmax.f32 %v2343_v47, 0.0 }
 0x417   : > { %v2576_v53 = vmax.f32 %v2354_v35, 0.0 }
 0x418   : > { %v2574_v55 = vmax.f32 %v2346_v50, 0.0 }
 0x419   : > { %v2634_v56 = vpack.c.bf16 %v2576_v53, %v2575_v51 }
 0x41a   : > { %v2633_v57 = vpack.c.bf16 %v2574_v55, %v2573_v54  ;;  %v4150_v58 = vpop.f32.mrb[140].mxu1 }
 0x41b   : > { %v2367_v59 = vadd.f32 %v4150_v58, %v5075_v14  ;;  %v2358_v60 = vpop.f32.mrb[141].mxu1 }
 0x41c   : > { %v2359_v61 = vadd.f32 %v5075_v14, %v2358_v60  ;;  %v4151_v62 = vpop.f32.mrb[142].mxu1  ;;  %4210 = vmatprep.mubr.msk.bf16.mxu0 %vm2676_vm2, %v2633_v57 }
 0x41d   : > { %v2370_v0 = vadd.f32 %v4151_v62, %v5075_v14  ;;  %v2361_v1 = vpop.f32.mrb[143].mxu1  ;;  %4211 = vmatmul.mubr.msk.bf16.gmra.mrb[136].mxu0 %vm2676_vm2, %v2634_v56  ;;  %v2579_v3 = vmax.f32 %v2367_v59, 0.0 }
 0x41e   : > { %v2362_v2 = vadd.f32 %v5075_v14, %v2361_v1  ;;  %v2577_v5 = vmax.f32 %v2359_v61, 0.0 }
 0x41f   : > { %v2580_v4 = vmax.f32 %v2370_v0, 0.0 }
 0x420   : > { %v2578_v6 = vmax.f32 %v2362_v2, 0.0 }
 0x421   : > { %v2636_v7 = vpack.c.bf16 %v2580_v4, %v2579_v3 }
 0x422   : > { %v2635_v8 = vpack.c.bf16 %v2578_v6, %v2577_v5 }
 0x424   : > { %4214 = vmatprep.mubr.msk.bf16.mxu0 %vm2676_vm2, %v2635_v8 }
 0x425   : > { %4215 = vmatmul.mubr.msk.bf16.gmra.mrb[140].mxu0 %vm2676_vm2, %v2636_v7 }
 0x428   : > { %v4154_v9 = vpop.f32.mrb[144].mxu1 }
 0x429   : > { %v2383_v10 = vadd.f32 %v4154_v9, %v5075_v14  ;;  %v2374_v11 = vpop.f32.mrb[145].mxu1 }
 0x42a   : > { %v2375_v12 = vadd.f32 %v5075_v14, %v2374_v11  ;;  %v4155_v13 = vpop.f32.mrb[146].mxu1 }
 0x42b   : > { %v2386_v15 = vadd.f32 %v4155_v13, %v5075_v14  ;;  %v2377_v52 = vpop.f32.mrb[147].mxu1  ;;  %v2583_v17 = vmax.f32 %v2383_v10, 0.0 }
 0x42c   : > { %v2378_v16 = vadd.f32 %v5075_v14, %v2377_v52  ;;  %v2581_v19 = vmax.f32 %v2375_v12, 0.0 }
 0x42d   : > { %v2584_v18 = vmax.f32 %v2386_v15, 0.0 }
 0x42e   : > { %v2582_v20 = vmax.f32 %v2378_v16, 0.0 }
 0x42f   : > { %v2638_v41 = vpack.c.bf16 %v2584_v18, %v2583_v17 }
 0x430   : > { %v2637_v21 = vpack.c.bf16 %v2582_v20, %v2581_v19 }
 0x432   : > { %4218 = vmatprep.mubr.msk.bf16.mxu0 %vm2676_vm2, %v2637_v21 }
 0x433   : > { %4219 = vmatmul.mubr.msk.bf16.gmra.mrb[144].mxu0 %vm2676_vm2, %v2638_v41 }
 0x438   : > { %v4158_v22 = vpop.f32.mrb[148].mxu1 }
 0x439   : > { %v2399_v23 = vadd.f32 %v4158_v22, %v5075_v14  ;;  %v2390_v24 = vpop.f32.mrb[149].mxu1 }
 0x43a   : > { %v2391_v25 = vadd.f32 %v5075_v14, %v2390_v24  ;;  %v4159_v26 = vpop.f32.mrb[150].mxu1 }
 0x43b   : > { %v2402_v27 = vadd.f32 %v4159_v26, %v5075_v14  ;;  %v2393_v28 = vpop.f32.mrb[151].mxu1  ;;  %v2587_v30 = vmax.f32 %v2399_v23, 0.0 }
 0x43c   : > { %v2394_v29 = vadd.f32 %v5075_v14, %v2393_v28  ;;  %v2585_v32 = vmax.f32 %v2391_v25, 0.0 }
 0x43d   : > { %v2588_v31 = vmax.f32 %v2402_v27, 0.0 }
 0x43e   : > { %v2586_v33 = vmax.f32 %v2394_v29, 0.0 }
 0x43f   : > { %v2640_v34 = vpack.c.bf16 %v2588_v31, %v2587_v30 }
 0x440   : > { %v2639_v36 = vpack.c.bf16 %v2586_v33, %v2585_v32 }
 0x442   : > { %4222 = vmatprep.mubr.msk.bf16.mxu0 %vm2676_vm2, %v2639_v36 }
 0x443   : > { %4223 = vmatmul.mubr.msk.bf16.gmra.mrb[148].mxu0 %vm2676_vm2, %v2640_v34 }
 0x448   : > { %v4162_v37 = vpop.f32.mrb[152].mxu1 }
 0x449   : > { %v2415_v38 = vadd.f32 %v4162_v37, %v5075_v14  ;;  %v2406_v39 = vpop.f32.mrb[153].mxu1 }
 0x44a   : > { %v2407_v40 = vadd.f32 %v5075_v14, %v2406_v39  ;;  %v4163_v63 = vpop.f32.mrb[154].mxu1 }
 0x44b   : > { %v2418_v42 = vadd.f32 %v4163_v63, %v5075_v14  ;;  %v2409_v43 = vpop.f32.mrb[155].mxu1  ;;  %v2591_v45 = vmax.f32 %v2415_v38, 0.0 }
 0x44c   : > { %v2410_v44 = vadd.f32 %v5075_v14, %v2409_v43  ;;  %v2589_v47 = vmax.f32 %v2407_v40, 0.0 }
 0x44d   : > { %v2592_v46 = vmax.f32 %v2418_v42, 0.0 }
 0x44e   : > { %v2590_v48 = vmax.f32 %v2410_v44, 0.0 }
 0x44f   : > { %v2642_v35 = vpack.c.bf16 %v2592_v46, %v2591_v45 }
 0x450   : > { %v2641_v49 = vpack.c.bf16 %v2590_v48, %v2589_v47 }
 0x452   : > { %4226 = vmatprep.mubr.msk.bf16.mxu0 %vm2676_vm2, %v2641_v49 }
 0x453   : > { %4227 = vmatmul.mubr.msk.bf16.gmra.mrb[152].mxu0 %vm2676_vm2, %v2642_v35 }
 0x458   : > { %v4166_v50 = vpop.f32.mrb[156].mxu1 }
 0x459   : > { %v2431_v51 = vadd.f32 %v4166_v50, %v5075_v14  ;;  %v2422_v53 = vpop.f32.mrb[157].mxu1 }
 0x45a   : > { %v2423_v54 = vadd.f32 %v5075_v14, %v2422_v53  ;;  %v4167_v55 = vpop.f32.mrb[158].mxu1 }
 0x45b   : > { %v2434_v56 = vadd.f32 %v4167_v55, %v5075_v14  ;;  %v2425_v57 = vpop.f32.mrb[159].mxu1  ;;  %v2595_v59 = vmax.f32 %v2431_v51, 0.0 }
 0x45c   : > { %v2426_v58 = vadd.f32 %v5075_v14, %v2425_v57  ;;  %v2593_v61 = vmax.f32 %v2423_v54, 0.0 }
 0x45d   : > { %v2596_v60 = vmax.f32 %v2434_v56, 0.0 }
 0x45e   : > { %v2594_v62 = vmax.f32 %v2426_v58, 0.0 }
 0x45f   : > { %v2644_v0 = vpack.c.bf16 %v2596_v60, %v2595_v59 }
 0x460   : > { %v2643_v1 = vpack.c.bf16 %v2594_v62, %v2593_v61 }
 0x462   : > { %4230 = vmatprep.mubr.msk.bf16.mxu0 %vm2676_vm2, %v2643_v1 }
 0x463   : > { %4231 = vmatmul.mubr.msk.bf16.gmra.mrb[156].mxu0 %vm2676_vm2, %v2644_v0 }
 0x468   : > { %v4170_v2 = vpop.f32.mrb[160].mxu1 }
 0x469   : > { %v2447_v3 = vadd.f32 %v4170_v2, %v5075_v14  ;;  %v2438_v4 = vpop.f32.mrb[161].mxu1 }
 0x46a   : > { %v2439_v5 = vadd.f32 %v5075_v14, %v2438_v4  ;;  %v4171_v6 = vpop.f32.mrb[162].mxu1 }
 0x46b   : > { %v2450_v7 = vadd.f32 %v4171_v6, %v5075_v14  ;;  %v2441_v8 = vpop.f32.mrb[163].mxu1  ;;  %v2599_v10 = vmax.f32 %v2447_v3, 0.0 }
 0x46c   : > { %v2442_v9 = vadd.f32 %v5075_v14, %v2441_v8  ;;  %v2597_v12 = vmax.f32 %v2439_v5, 0.0 }
 0x46d   : > { %v2600_v11 = vmax.f32 %v2450_v7, 0.0 }
 0x46e   : > { %v2598_v13 = vmax.f32 %v2442_v9, 0.0 }
 0x46f   : > { %v2646_v15 = vpack.c.bf16 %v2600_v11, %v2599_v10 }
 0x470   : > { %v2645_v52 = vpack.c.bf16 %v2598_v13, %v2597_v12 }
 0x472   : > { %4234 = vmatprep.mubr.msk.bf16.mxu0 %vm2676_vm2, %v2645_v52 }
 0x473   : > { %4235 = vmatmul.mubr.msk.bf16.gmra.mrb[160].mxu0 %vm2676_vm2, %v2646_v15 }
 0x478   : > { %v4174_v16 = vpop.f32.mrb[164].mxu1 }
 0x479   : > { %v2463_v17 = vadd.f32 %v4174_v16, %v5075_v14  ;;  %v2454_v18 = vpop.f32.mrb[165].mxu1 }
 0x47a   : > { %v2455_v19 = vadd.f32 %v5075_v14, %v2454_v18  ;;  %v4175_v20 = vpop.f32.mrb[166].mxu1 }
 0x47b   : > { %v2466_v41 = vadd.f32 %v4175_v20, %v5075_v14  ;;  %v2457_v21 = vpop.f32.mrb[167].mxu1  ;;  %v2603_v23 = vmax.f32 %v2463_v17, 0.0 }
 0x47c   : > { %v2458_v22 = vadd.f32 %v5075_v14, %v2457_v21  ;;  %v2601_v25 = vmax.f32 %v2455_v19, 0.0 }
 0x47d   : > { %v2604_v24 = vmax.f32 %v2466_v41, 0.0 }
 0x47e   : > { %v2602_v26 = vmax.f32 %v2458_v22, 0.0 }
 0x47f   : > { %v2648_v27 = vpack.c.bf16 %v2604_v24, %v2603_v23 }
 0x480   : > { %v2647_v28 = vpack.c.bf16 %v2602_v26, %v2601_v25 }
 0x482   : > { %4238 = vmatprep.mubr.msk.bf16.mxu0 %vm2676_vm2, %v2647_v28 }
 0x483   : > { %4239 = vmatmul.mubr.msk.bf16.gmra.mrb[164].mxu0 %vm2676_vm2, %v2648_v27 }
 0x488   : > { %v4178_v29 = vpop.f32.mrb[168].mxu1 }
 0x489   : > { %v2479_v30 = vadd.f32 %v4178_v29, %v5075_v14  ;;  %v2470_v31 = vpop.f32.mrb[169].mxu1 }
 0x48a   : > { %v2471_v32 = vadd.f32 %v5075_v14, %v2470_v31  ;;  %v4179_v33 = vpop.f32.mrb[170].mxu1 }
 0x48b   : > { %v2482_v34 = vadd.f32 %v4179_v33, %v5075_v14  ;;  %v2473_v36 = vpop.f32.mrb[171].mxu1  ;;  %v2607_v38 = vmax.f32 %v2479_v30, 0.0 }
 0x48c   : > { %v2474_v37 = vadd.f32 %v5075_v14, %v2473_v36  ;;  %v2605_v40 = vmax.f32 %v2471_v32, 0.0 }
 0x48d   : > { %v2608_v39 = vmax.f32 %v2482_v34, 0.0 }
 0x48e   : > { %v2606_v63 = vmax.f32 %v2474_v37, 0.0 }
 0x48f   : > { %v2650_v42 = vpack.c.bf16 %v2608_v39, %v2607_v38 }
 0x490   : > { %v2649_v43 = vpack.c.bf16 %v2606_v63, %v2605_v40 }
 0x492   : > { %4242 = vmatprep.mubr.msk.bf16.mxu0 %vm2676_vm2, %v2649_v43 }
 0x493   : > { %4243 = vmatmul.mubr.msk.bf16.gmra.mrb[168].mxu0 %vm2676_vm2, %v2650_v42 }
 0x498   : > { %v4182_v44 = vpop.f32.mrb[172].mxu1 }
 0x499   : > { %v2495_v45 = vadd.f32 %v4182_v44, %v5075_v14  ;;  %v2486_v46 = vpop.f32.mrb[173].mxu1  ;;  %v3224_v44 = vlaneseq }
 0x49a   : > { %v2487_v47 = vadd.f32 %v5075_v14, %v2486_v46  ;;  %v4183_v48 = vpop.f32.mrb[174].mxu1 }
 0x49b   : > { %v2498_v35 = vadd.f32 %v4183_v48, %v5075_v14  ;;  %v2489_v49 = vpop.f32.mrb[175].mxu1  ;;  %v2611_v51 = vmax.f32 %v2495_v45, 0.0 }
 0x49c   : > { %v2490_v50 = vadd.f32 %v5075_v14, %v2489_v49  ;;  %v2609_v54 = vmax.f32 %v2487_v47, 0.0  ;;  %v5176_v49 = vld [vmem:[%s5600_s10] ss:$0 sm:$0xff] }
 0x49d   : > { %v2612_v53 = vmax.f32 %v2498_v35, 0.0 }
 0x49e   : > { %v2610_v55 = vmax.f32 %v2490_v50, 0.0 }
 0x49f   : > { %v2652_v56 = vpack.c.bf16 %v2612_v53, %v2611_v51  ;;  %v3225_v51 = vshrl.u32 %v3224_v44, 7 }
 0x4a0   : > { %v2651_v57 = vpack.c.bf16 %v2610_v55, %v2609_v54  ;;  %v3158_v55 = vld [vmem:[%s5601_s11] sm:$0x1] }
 0x4a2   : > { %4246 = vmatprep.mubr.msk.bf16.mxu0 %vm2676_vm2, %v2651_v57 }
 0x4a3   : > { %4247 = vmatmul.mubr.msk.bf16.gmra.mrb[172].mxu0 %vm2676_vm2, %v2652_v56 }
 0x4a8   : > { %v4186_v58 = vpop.f32.mrb[176].mxu1 }
 0x4a9   : > { %v2511_v59 = vadd.f32 %v4186_v58, %v5075_v14  ;;  %v2502_v60 = vpop.f32.mrb[177].mxu1 }
 0x4aa   : > { %v2503_v61 = vadd.f32 %v5075_v14, %v2502_v60  ;;  %v4187_v62 = vpop.f32.mrb[178].mxu1 }
 0x4ab   : > { %v2514_v0 = vadd.f32 %v4187_v62, %v5075_v14  ;;  %v2505_v1 = vpop.f32.mrb[179].mxu1  ;;  %v2615_v3 = vmax.f32 %v2511_v59, 0.0  ;;  %v3226_v62 = vsub.s32 0, %v3225_v51 }
 0x4ac   : > { %v2506_v2 = vadd.f32 %v5075_v14, %v2505_v1  ;;  %v2613_v5 = vmax.f32 %v2503_v61, 0.0  ;;  %v3159_v61 = vunpack.c.l.bf16 %v3158_v55 }
 0x4ad   : > { %v2616_v4 = vmax.f32 %v2514_v0, 0.0 }
 0x4ae   : > { %v2614_v6 = vmax.f32 %v2506_v2, 0.0 }
 0x4af   : > { %v2654_v7 = vpack.c.bf16 %v2616_v4, %v2615_v3 }
 0x4b0   : > { %v2653_v8 = vpack.c.bf16 %v2614_v6, %v2613_v5  ;;  %v5187_v6 = vrot.slane %v3159_v61, %v3226_v62 }
 0x4b2   : > { %4250 = vmatprep.mubr.msk.bf16.mxu0 %vm2676_vm2, %v2653_v8 }
 0x4b3   : > { %4251 = vmatmul.mubr.msk.bf16.gmra.mrb[176].mxu0 %vm2676_vm2, %v2654_v7 }
 0x4b8   : > { %v4190_v9 = vpop.f32.mrb[180].mxu1 }
 0x4b9   : > { %v2527_v10 = vadd.f32 %v4190_v9, %v5075_v14  ;;  %v2518_v11 = vpop.f32.mrb[181].mxu1 }
 0x4ba   : > { %v2519_v12 = vadd.f32 %v5075_v14, %v2518_v11  ;;  %v4191_v13 = vpop.f32.mrb[182].mxu1 }
 0x4bb   : > { %v2530_v15 = vadd.f32 %v4191_v13, %v5075_v14  ;;  %v2521_v52 = vpop.f32.mrb[183].mxu1  ;;  %v2619_v17 = vmax.f32 %v2527_v10, 0.0 }
 0x4bc   : > { %v2522_v16 = vadd.f32 %v5075_v14, %v2521_v52  ;;  %v2617_v19 = vmax.f32 %v2519_v12, 0.0 }
 0x4bd   : > { %v2620_v18 = vmax.f32 %v2530_v15, 0.0 }
 0x4be   : > { %v2618_v20 = vmax.f32 %v2522_v16, 0.0 }
 0x4bf   : > { %v2656_v41 = vpack.c.bf16 %v2620_v18, %v2619_v17 }
 0x4c0   : > { %v2655_v21 = vpack.c.bf16 %v2618_v20, %v2617_v19 }
 0x4c2   : > { %4254 = vmatprep.mubr.msk.bf16.mxu0 %vm2676_vm2, %v2655_v21 }
 0x4c3   : > { %4255 = vmatmul.mubr.msk.bf16.gmra.mrb[180].mxu0 %vm2676_vm2, %v2656_v41 }
 0x4c8   : > { %v4194_v22 = vpop.f32.mrb[184].mxu1 }
 0x4c9   : > { %v2543_v23 = vadd.f32 %v4194_v22, %v5075_v14  ;;  %v2534_v24 = vpop.f32.mrb[185].mxu1 }
 0x4ca   : > { %v2535_v25 = vadd.f32 %v5075_v14, %v2534_v24  ;;  %v4195_v26 = vpop.f32.mrb[186].mxu1 }
 0x4cb   : > { %v2546_v27 = vadd.f32 %v4195_v26, %v5075_v14  ;;  %v2537_v28 = vpop.f32.mrb[187].mxu1  ;;  %v2623_v30 = vmax.f32 %v2543_v23, 0.0 }
 0x4cc   : > { %v2538_v29 = vadd.f32 %v5075_v14, %v2537_v28  ;;  %v2621_v32 = vmax.f32 %v2535_v25, 0.0 }
 0x4cd   : > { %v2624_v31 = vmax.f32 %v2546_v27, 0.0 }
 0x4ce   : > { %v2622_v33 = vmax.f32 %v2538_v29, 0.0 }
 0x4cf   : > { %v2658_v34 = vpack.c.bf16 %v2624_v31, %v2623_v30 }
 0x4d0   : > { %v2657_v36 = vpack.c.bf16 %v2622_v33, %v2621_v32 }
 0x4d2   : > { %4258 = vmatprep.mubr.msk.bf16.mxu1 %vm2676_vm2, %v2657_v36 }
 0x4d3   : > { %4259 = vmatmul.mubr.msk.bf16.vlgmr.msra.gmra.mrb[192].mxu1 %vm2676_vm2, %v2658_v34 }
 0x4d8   : > { %v4198_v37 = vpop.f32.mrb[188].mxu1 }
 0x4d9   : > { %v2559_v38 = vadd.f32 %v4198_v37, %v5075_v14  ;;  %v2550_v39 = vpop.f32.mrb[189].mxu1 }
 0x4da   : > { %v2551_v40 = vadd.f32 %v5075_v14, %v2550_v39  ;;  %v4199_v63 = vpop.f32.mrb[190].mxu1 }
 0x4db   : > { %v2562_v42 = vadd.f32 %v4199_v63, %v5075_v14  ;;  %v2553_v43 = vpop.f32.mrb[191].mxu1  ;;  %v2627_v46 = vmax.f32 %v2559_v38, 0.0 }
 0x4dc   : > { %v2554_v45 = vadd.f32 %v5075_v14, %v2553_v43  ;;  %v2625_v48 = vmax.f32 %v2551_v40, 0.0 }
 0x4dd   : > { %v2628_v47 = vmax.f32 %v2562_v42, 0.0 }
 0x4de   : > { %v2626_v35 = vmax.f32 %v2554_v45, 0.0 }
 0x4df   : > { %v2660_v50 = vpack.c.bf16 %v2628_v47, %v2627_v46 }
 0x4e0   : > { %v2659_v53 = vpack.c.bf16 %v2626_v35, %v2625_v48  ;;  %v4204_v54 = vpop.f32.mrb[128].mxu0 }
 0x4e1   : > { %v2816_v56 = vadd.f32 %v4204_v54, %v5176_v49  ;;  %v2807_v14 = vpop.f32.mrb[129].mxu0 }
 0x4e2   : > { %v2808_v57 = vadd.f32 %v5176_v49, %v2807_v14  ;;  %v4205_v58 = vpop.f32.mrb[130].mxu0  ;;  %4262 = vmatprep.mubr.msk.bf16.mxu1 %vm2676_vm2, %v2659_v53 }
 0x4e3   : > { %v2819_v59 = vadd.f32 %v4205_v58, %v5176_v49  ;;  %v2810_v60 = vpop.f32.mrb[131].mxu0  ;;  %4263 = vmatmul.mubr.msk.bf16.gmra.mrb[196].mxu1 %vm2676_vm2, %v2660_v50  ;;  %v3064_v1 = vmax.f32 %v2816_v56, 0.0 }
 0x4e4   : > { %v2811_v0 = vadd.f32 %v5176_v49, %v2810_v60  ;;  %v3062_v3 = vmax.f32 %v2808_v57, 0.0 }
 0x4e5   : > { %v3065_v2 = vmax.f32 %v2819_v59, 0.0 }
 0x4e6   : > { %v3063_v4 = vmax.f32 %v2811_v0, 0.0 }
 0x4e7   : > { %v3127_v5 = vpack.c.bf16 %v3065_v2, %v3064_v1 }
 0x4e8   : > { %v3126_v7 = vpack.c.bf16 %v3063_v4, %v3062_v3  ;;  %v4208_v8 = vpop.f32.mrb[132].mxu0 }
 0x4e9   : > { %v2832_v9 = vadd.f32 %v4208_v8, %v5176_v49  ;;  %v2823_v10 = vpop.f32.mrb[133].mxu0  ;;  %v3162_v11 = vunpack.c.l.bf16 %v3127_v5  ;;  %v3163_v12 = vunpack.c.h.bf16 %v3127_v5 }
 0x4ea   : > { %v2824_v13 = vadd.f32 %v5176_v49, %v2823_v10  ;;  %v4209_v15 = vpop.f32.mrb[134].mxu0  ;;  %v3160_v52 = vunpack.c.l.bf16 %v3126_v7  ;;  %v3161_v16 = vunpack.c.h.bf16 %v3126_v7 }
 0x4eb   : > { %v2835_v17 = vadd.f32 %v4209_v15, %v5176_v49  ;;  %v2826_v18 = vpop.f32.mrb[135].mxu0  ;;  %v3230_v19 = vmul.f32 %v5187_v6, %v3162_v11  ;;  %v3068_v21 = vmax.f32 %v2832_v9, 0.0  ;;  %v3231_v24 = vmul.f32 %v5187_v6, %v3163_v12 }
 0x4ec   : > { %v2827_v20 = vadd.f32 %v5176_v49, %v2826_v18  ;;  %v3228_v41 = vmul.f32 %v5187_v6, %v3160_v52  ;;  %v3066_v25 = vmax.f32 %v2824_v13, 0.0  ;;  %v3229_v28 = vmul.f32 %v5187_v6, %v3161_v16 }
 0x4ed   : > { %v3069_v22 = vmax.f32 %v2835_v17, 0.0  ;;  %v3299_v23 = vsel %vm3292_vm3, %v3230_v19, 0.0  ;;  %v3302_v34 = vsel %vm3292_vm3, %v3231_v24, 0.0 }
 0x4ee   : > { %v3067_v26 = vmax.f32 %v2827_v20, 0.0  ;;  %3300 = vadd.xlane.f32.xlu1 %v3299_v23  ;;  %v3293_v27 = vsel %vm3292_vm3, %v3228_v41, 0.0  ;;  %v3296_v40 = vsel %vm3292_vm3, %v3229_v28, 0.0 }
 0x4ef   : > { %v3129_v29 = vpack.c.bf16 %v3069_v22, %v3068_v21  ;;  %3294 = vadd.xlane.f32.xlu0 %v3293_v27 }
 0x4f0   : > { %v3128_v30 = vpack.c.bf16 %v3067_v26, %v3066_v25  ;;  %v4212_v31 = vpop.f32.mrb[136].mxu0 }
 0x4f1   : > { %v2848_v32 = vadd.f32 %v4212_v31, %v5176_v49  ;;  %v2839_v33 = vpop.f32.mrb[137].mxu0  ;;  %v3167_v36 = vunpack.c.h.bf16 %v3129_v29  ;;  %v3166_v37 = vunpack.c.l.bf16 %v3129_v29 }
 0x4f2   : > { %v2840_v38 = vadd.f32 %v5176_v49, %v2839_v33  ;;  %3303 = vadd.xlane.f32.xlu1 %v3302_v34  ;;  %v4213_v39 = vpop.f32.mrb[138].mxu0  ;;  %v3165_v63 = vunpack.c.h.bf16 %v3128_v30  ;;  %v3164_v42 = vunpack.c.l.bf16 %v3128_v30 }
 0x4f3   : > { %v2851_v43 = vadd.f32 %v4213_v39, %v5176_v49  ;;  %v2842_v44 = vpop.f32.mrb[139].mxu0  ;;  %3297 = vadd.xlane.f32.xlu0 %v3296_v40  ;;  %v3235_v45 = vmul.f32 %v5187_v6, %v3167_v36  ;;  %v3234_v46 = vmul.f32 %v5187_v6, %v3166_v37  ;;  %v3072_v47 = vmax.f32 %v2848_v32, 0.0 }
 0x4f4   : > { %v2843_v48 = vadd.f32 %v5176_v49, %v2842_v44  ;;  %v3233_v53 = vmul.f32 %v5187_v6, %v3165_v63  ;;  %v3070_v54 = vmax.f32 %v2840_v38, 0.0  ;;  %v3232_v56 = vmul.f32 %v5187_v6, %v3164_v42 }
 0x4f5   : > { %v3073_v35 = vmax.f32 %v2851_v43, 0.0  ;;  %v3314_v50 = vsel %vm3292_vm3, %v3235_v45, 0.0  ;;  %v3311_v51 = vsel %vm3292_vm3, %v3234_v46, 0.0 }
 0x4f6   : > { %v3071_v55 = vmax.f32 %v2843_v48, 0.0  ;;  %3315 = vadd.xlane.f32.xlu1 %v3314_v50  ;;  %v3308_v61 = vsel %vm3292_vm3, %v3233_v53, 0.0  ;;  %v3305_v3 = vsel %vm3292_vm3, %v3232_v56, 0.0 }
 0x4f7   : > { %v3131_v14 = vpack.c.bf16 %v3073_v35, %v3072_v47  ;;  %3312 = vadd.xlane.f32.xlu0 %v3311_v51 }
 0x4f8   : > { %v3130_v57 = vpack.c.bf16 %v3071_v55, %v3070_v54  ;;  %v4216_v58 = vpop.f32.mrb[140].mxu0 }
 0x4f9   : > { %v2864_v59 = vadd.f32 %v4216_v58, %v5176_v49  ;;  %v2855_v60 = vpop.f32.mrb[141].mxu0  ;;  %v3171_v62 = vunpack.c.h.bf16 %v3131_v14  ;;  %v3170_v0 = vunpack.c.l.bf16 %v3131_v14 }
 0x4fa   : > { %v2856_v1 = vadd.f32 %v5176_v49, %v2855_v60  ;;  %v4217_v2 = vpop.f32.mrb[142].mxu0  ;;  %3309 = vadd.xlane.f32.xlu1 %v3308_v61  ;;  %v3169_v4 = vunpack.c.h.bf16 %v3130_v57  ;;  %v3168_v5 = vunpack.c.l.bf16 %v3130_v57 }
 0x4fb   : > { %v2867_v7 = vadd.f32 %v4217_v2, %v5176_v49  ;;  %v2858_v8 = vpop.f32.mrb[143].mxu0  ;;  %3306 = vadd.xlane.f32.xlu0 %v3305_v3  ;;  %v3239_v9 = vmul.f32 %v5187_v6, %v3171_v62  ;;  %v3238_v10 = vmul.f32 %v5187_v6, %v3170_v0  ;;  %v3076_v11 = vmax.f32 %v2864_v59, 0.0 }
 0x4fc   : > { %v2859_v12 = vadd.f32 %v5176_v49, %v2858_v8  ;;  %v3237_v16 = vmul.f32 %v5187_v6, %v3169_v4  ;;  %v3074_v17 = vmax.f32 %v2856_v1, 0.0  ;;  %v3236_v19 = vmul.f32 %v5187_v6, %v3168_v5 }
 0x4fd   : > { %v3077_v13 = vmax.f32 %v2867_v7, 0.0  ;;  %v3326_v15 = vsel %vm3292_vm3, %v3239_v9, 0.0  ;;  %v3323_v52 = vsel %vm3292_vm3, %v3238_v10, 0.0 }
 0x4fe   : > { %v3075_v18 = vmax.f32 %v2859_v12, 0.0  ;;  %3327 = vadd.xlane.f32.xlu1 %v3326_v15  ;;  %v3320_v21 = vsel %vm3292_vm3, %v3237_v16, 0.0  ;;  %v3317_v24 = vsel %vm3292_vm3, %v3236_v19, 0.0 }
 0x4ff   : > { %v3133_v20 = vpack.c.bf16 %v3077_v13, %v3076_v11  ;;  %3324 = vadd.xlane.f32.xlu0 %v3323_v52 }
 0x500   : > { %v3132_v41 = vpack.c.bf16 %v3075_v18, %v3074_v17 }
 0x501   : > { %v3175_v22 = vunpack.c.h.bf16 %v3133_v20  ;;  %v3174_v23 = vunpack.c.l.bf16 %v3133_v20 }
 0x502   : > { %3321 = vadd.xlane.f32.xlu1 %v3320_v21  ;;  %v3173_v25 = vunpack.c.h.bf16 %v3132_v41  ;;  %v3172_v26 = vunpack.c.l.bf16 %v3132_v41 }
 0x503   : > { %3318 = vadd.xlane.f32.xlu0 %v3317_v24  ;;  %v3243_v27 = vmul.f32 %v5187_v6, %v3175_v22  ;;  %v3242_v28 = vmul.f32 %v5187_v6, %v3174_v23 }
 0x504   : > { %v3241_v31 = vmul.f32 %v5187_v6, %v3173_v25  ;;  %v3240_v33 = vmul.f32 %v5187_v6, %v3172_v26 }
 0x505   : > { %v3338_v29 = vsel %vm3292_vm3, %v3243_v27, 0.0  ;;  %v3335_v30 = vsel %vm3292_vm3, %v3242_v28, 0.0 }
 0x506   : > { %v4220_v32 = vpop.f32.mrb[144].mxu0  ;;  %3339 = vadd.xlane.f32.xlu1 %v3338_v29  ;;  %v3332_v63 = vsel %vm3292_vm3, %v3241_v31, 0.0  ;;  %v3329_v43 = vsel %vm3292_vm3, %v3240_v33, 0.0 }
 0x507   : > { %v2880_v34 = vadd.f32 %v4220_v32, %v5176_v49  ;;  %v2871_v36 = vpop.f32.mrb[145].mxu0  ;;  %3336 = vadd.xlane.f32.xlu0 %v3335_v30 }
 0x508   : > { %v2872_v37 = vadd.f32 %v5176_v49, %v2871_v36  ;;  %v4221_v38 = vpop.f32.mrb[146].mxu0 }
 0x509   : > { %v2883_v39 = vadd.f32 %v4221_v38, %v5176_v49  ;;  %v2874_v40 = vpop.f32.mrb[147].mxu0  ;;  %v3080_v44 = vmax.f32 %v2880_v34, 0.0 }
 0x50a   : > { %v2875_v42 = vadd.f32 %v5176_v49, %v2874_v40  ;;  %3333 = vadd.xlane.f32.xlu1 %v3332_v63  ;;  %v3078_v46 = vmax.f32 %v2872_v37, 0.0 }
 0x50b   : > { %v3081_v45 = vmax.f32 %v2883_v39, 0.0  ;;  %3330 = vadd.xlane.f32.xlu0 %v3329_v43 }
 0x50c   : > { %v3079_v47 = vmax.f32 %v2875_v42, 0.0 }
 0x50d   : > { %v3135_v48 = vpack.c.bf16 %v3081_v45, %v3080_v44 }
 0x50e   : > { %v3134_v35 = vpack.c.bf16 %v3079_v47, %v3078_v46 }
 0x50f   : > { %v3179_v50 = vunpack.c.h.bf16 %v3135_v48  ;;  %v3178_v51 = vunpack.c.l.bf16 %v3135_v48 }
 0x510   : > { %v3177_v53 = vunpack.c.h.bf16 %v3134_v35  ;;  %v3176_v54 = vunpack.c.l.bf16 %v3134_v35 }
 0x511   : > { %v3247_v55 = vmul.f32 %v5187_v6, %v3179_v50  ;;  %v3246_v56 = vmul.f32 %v5187_v6, %v3178_v51 }
 0x512   : > { %v3245_v58 = vmul.f32 %v5187_v6, %v3177_v53  ;;  %v3244_v59 = vmul.f32 %v5187_v6, %v3176_v54 }
 0x513   : > { %v3350_v14 = vsel %vm3292_vm3, %v3247_v55, 0.0  ;;  %v3347_v57 = vsel %vm3292_vm3, %v3246_v56, 0.0 }
 0x514   : > { %3351 = vadd.xlane.f32.xlu1 %v3350_v14  ;;  %3348 = vadd.xlane.f32.xlu0 %v3347_v57  ;;  %v3344_v0 = vsel %vm3292_vm3, %v3245_v58, 0.0  ;;  %v3341_v1 = vsel %vm3292_vm3, %v3244_v59, 0.0 }
 0x516   : > { %v4224_v60 = vpop.f32.mrb[148].mxu0 }
 0x517   : > { %v2896_v61 = vadd.f32 %v4224_v60, %v5176_v49  ;;  %v2887_v62 = vpop.f32.mrb[149].mxu0 }
 0x518   : > { %v2888_v2 = vadd.f32 %v5176_v49, %v2887_v62  ;;  %v4225_v3 = vpop.f32.mrb[150].mxu0  ;;  %3345 = vadd.xlane.f32.xlu1 %v3344_v0  ;;  %3342 = vadd.xlane.f32.xlu0 %v3341_v1 }
 0x519   : > { %v2899_v4 = vadd.f32 %v4225_v3, %v5176_v49  ;;  %v2890_v5 = vpop.f32.mrb[151].mxu0  ;;  %v3084_v8 = vmax.f32 %v2896_v61, 0.0 }
 0x51a   : > { %v2891_v7 = vadd.f32 %v5176_v49, %v2890_v5  ;;  %v3082_v10 = vmax.f32 %v2888_v2, 0.0 }
 0x51b   : > { %v3085_v9 = vmax.f32 %v2899_v4, 0.0 }
 0x51c   : > { %v3083_v11 = vmax.f32 %v2891_v7, 0.0 }
 0x51d   : > { %v3137_v12 = vpack.c.bf16 %v3085_v9, %v3084_v8 }
 0x51e   : > { %v3136_v13 = vpack.c.bf16 %v3083_v11, %v3082_v10 }
 0x51f   : > { %v3183_v15 = vunpack.c.h.bf16 %v3137_v12  ;;  %v3182_v52 = vunpack.c.l.bf16 %v3137_v12 }
 0x520   : > { %v3181_v16 = vunpack.c.h.bf16 %v3136_v13  ;;  %v3180_v17 = vunpack.c.l.bf16 %v3136_v13 }
 0x521   : > { %v3251_v18 = vmul.f32 %v5187_v6, %v3183_v15  ;;  %v3250_v19 = vmul.f32 %v5187_v6, %v3182_v52 }
 0x522   : > { %v3249_v21 = vmul.f32 %v5187_v6, %v3181_v16  ;;  %v3248_v22 = vmul.f32 %v5187_v6, %v3180_v17 }
 0x523   : > { %v3362_v20 = vsel %vm3292_vm3, %v3251_v18, 0.0  ;;  %v3359_v41 = vsel %vm3292_vm3, %v3250_v19, 0.0 }
 0x524   : > { %3363 = vadd.xlane.f32.xlu1 %v3362_v20  ;;  %3360 = vadd.xlane.f32.xlu0 %v3359_v41  ;;  %v3356_v26 = vsel %vm3292_vm3, %v3249_v21, 0.0  ;;  %v3353_v27 = vsel %vm3292_vm3, %v3248_v22, 0.0 }
 0x526   : > { %v4228_v23 = vpop.f32.mrb[152].mxu0 }
 0x527   : > { %v2912_v24 = vadd.f32 %v4228_v23, %v5176_v49  ;;  %v2903_v25 = vpop.f32.mrb[153].mxu0 }
 0x528   : > { %v2904_v28 = vadd.f32 %v5176_v49, %v2903_v25  ;;  %v4229_v29 = vpop.f32.mrb[154].mxu0  ;;  %3357 = vadd.xlane.f32.xlu1 %v3356_v26  ;;  %3354 = vadd.xlane.f32.xlu0 %v3353_v27 }
 0x529   : > { %v2915_v30 = vadd.f32 %v4229_v29, %v5176_v49  ;;  %v2906_v31 = vpop.f32.mrb[155].mxu0  ;;  %v3088_v33 = vmax.f32 %v2912_v24, 0.0 }
 0x52a   : > { %v2907_v32 = vadd.f32 %v5176_v49, %v2906_v31  ;;  %v3086_v36 = vmax.f32 %v2904_v28, 0.0 }
 0x52b   : > { %v3089_v34 = vmax.f32 %v2915_v30, 0.0 }
 0x52c   : > { %v3087_v37 = vmax.f32 %v2907_v32, 0.0 }
 0x52d   : > { %v3139_v38 = vpack.c.bf16 %v3089_v34, %v3088_v33 }
 0x52e   : > { %v3138_v39 = vpack.c.bf16 %v3087_v37, %v3086_v36 }
 0x52f   : > { %v3187_v40 = vunpack.c.h.bf16 %v3139_v38  ;;  %v3186_v63 = vunpack.c.l.bf16 %v3139_v38 }
 0x530   : > { %v3185_v42 = vunpack.c.h.bf16 %v3138_v39  ;;  %v3184_v43 = vunpack.c.l.bf16 %v3138_v39 }
 0x531   : > { %v3255_v44 = vmul.f32 %v5187_v6, %v3187_v40  ;;  %v3254_v45 = vmul.f32 %v5187_v6, %v3186_v63 }
 0x532   : > { %v3253_v48 = vmul.f32 %v5187_v6, %v3185_v42  ;;  %v3252_v35 = vmul.f32 %v5187_v6, %v3184_v43 }
 0x533   : > { %v3374_v46 = vsel %vm3292_vm3, %v3255_v44, 0.0  ;;  %v3371_v47 = vsel %vm3292_vm3, %v3254_v45, 0.0 }
 0x534   : > { %3375 = vadd.xlane.f32.xlu1 %v3374_v46  ;;  %3372 = vadd.xlane.f32.xlu0 %v3371_v47  ;;  %v3368_v54 = vsel %vm3292_vm3, %v3253_v48, 0.0  ;;  %v3365_v55 = vsel %vm3292_vm3, %v3252_v35, 0.0 }
 0x536   : > { %v4232_v50 = vpop.f32.mrb[156].mxu0 }
 0x537   : > { %v2928_v51 = vadd.f32 %v4232_v50, %v5176_v49  ;;  %v2919_v53 = vpop.f32.mrb[157].mxu0 }
 0x538   : > { %v2920_v56 = vadd.f32 %v5176_v49, %v2919_v53  ;;  %v4233_v14 = vpop.f32.mrb[158].mxu0  ;;  %3369 = vadd.xlane.f32.xlu1 %v3368_v54  ;;  %3366 = vadd.xlane.f32.xlu0 %v3365_v55 }
 0x539   : > { %v2931_v57 = vadd.f32 %v4233_v14, %v5176_v49  ;;  %v2922_v58 = vpop.f32.mrb[159].mxu0  ;;  %v3092_v60 = vmax.f32 %v2928_v51, 0.0 }
 0x53a   : > { %v2923_v59 = vadd.f32 %v5176_v49, %v2922_v58  ;;  %v3090_v62 = vmax.f32 %v2920_v56, 0.0 }
 0x53b   : > { %v3093_v61 = vmax.f32 %v2931_v57, 0.0 }
 0x53c   : > { %v3091_v0 = vmax.f32 %v2923_v59, 0.0 }
 0x53d   : > { %v3141_v1 = vpack.c.bf16 %v3093_v61, %v3092_v60 }
 0x53e   : > { %v3140_v2 = vpack.c.bf16 %v3091_v0, %v3090_v62 }
 0x53f   : > { %v3191_v3 = vunpack.c.h.bf16 %v3141_v1  ;;  %v3190_v4 = vunpack.c.l.bf16 %v3141_v1 }
 0x540   : > { %v3189_v5 = vunpack.c.h.bf16 %v3140_v2  ;;  %v3188_v7 = vunpack.c.l.bf16 %v3140_v2 }
 0x541   : > { %v3259_v8 = vmul.f32 %v5187_v6, %v3191_v3  ;;  %v3258_v9 = vmul.f32 %v5187_v6, %v3190_v4 }
 0x542   : > { %v3257_v12 = vmul.f32 %v5187_v6, %v3189_v5  ;;  %v3256_v13 = vmul.f32 %v5187_v6, %v3188_v7 }
 0x543   : > { %v3386_v10 = vsel %vm3292_vm3, %v3259_v8, 0.0  ;;  %v3383_v11 = vsel %vm3292_vm3, %v3258_v9, 0.0 }
 0x544   : > { %3387 = vadd.xlane.f32.xlu1 %v3386_v10  ;;  %3384 = vadd.xlane.f32.xlu0 %v3383_v11  ;;  %v3380_v17 = vsel %vm3292_vm3, %v3257_v12, 0.0  ;;  %v3377_v18 = vsel %vm3292_vm3, %v3256_v13, 0.0 }
 0x546   : > { %v4236_v15 = vpop.f32.mrb[160].mxu0 }
 0x547   : > { %v2944_v52 = vadd.f32 %v4236_v15, %v5176_v49  ;;  %v2935_v16 = vpop.f32.mrb[161].mxu0 }
 0x548   : > { %v2936_v19 = vadd.f32 %v5176_v49, %v2935_v16  ;;  %v4237_v20 = vpop.f32.mrb[162].mxu0  ;;  %3381 = vadd.xlane.f32.xlu1 %v3380_v17  ;;  %3378 = vadd.xlane.f32.xlu0 %v3377_v18 }
 0x549   : > { %v2947_v41 = vadd.f32 %v4237_v20, %v5176_v49  ;;  %v2938_v21 = vpop.f32.mrb[163].mxu0  ;;  %v3096_v23 = vmax.f32 %v2944_v52, 0.0 }
 0x54a   : > { %v2939_v22 = vadd.f32 %v5176_v49, %v2938_v21  ;;  %v3094_v25 = vmax.f32 %v2936_v19, 0.0 }
 0x54b   : > { %v3097_v24 = vmax.f32 %v2947_v41, 0.0 }
 0x54c   : > { %v3095_v26 = vmax.f32 %v2939_v22, 0.0 }
 0x54d   : > { %v3143_v27 = vpack.c.bf16 %v3097_v24, %v3096_v23 }
 0x54e   : > { %v3142_v28 = vpack.c.bf16 %v3095_v26, %v3094_v25 }
 0x54f   : > { %v3195_v29 = vunpack.c.h.bf16 %v3143_v27  ;;  %v3194_v30 = vunpack.c.l.bf16 %v3143_v27 }
 0x550   : > { %v3193_v31 = vunpack.c.h.bf16 %v3142_v28  ;;  %v3192_v32 = vunpack.c.l.bf16 %v3142_v28 }
 0x551   : > { %v3263_v33 = vmul.f32 %v5187_v6, %v3195_v29  ;;  %v3262_v34 = vmul.f32 %v5187_v6, %v3194_v30 }
 0x552   : > { %v3261_v38 = vmul.f32 %v5187_v6, %v3193_v31  ;;  %v3260_v39 = vmul.f32 %v5187_v6, %v3192_v32 }
 0x553   : > { %v3398_v36 = vsel %vm3292_vm3, %v3263_v33, 0.0  ;;  %v3395_v37 = vsel %vm3292_vm3, %v3262_v34, 0.0 }
 0x554   : > { %3399 = vadd.xlane.f32.xlu1 %v3398_v36  ;;  %3396 = vadd.xlane.f32.xlu0 %v3395_v37  ;;  %v3392_v43 = vsel %vm3292_vm3, %v3261_v38, 0.0  ;;  %v3389_v44 = vsel %vm3292_vm3, %v3260_v39, 0.0  ;;  %v5322_v39 = vld [vmem:[#allocation2] ss:$0 sm:$0xff] }
 0x556   : > { %v4240_v40 = vpop.f32.mrb[164].mxu0 }
 0x557   : > { %v2960_v63 = vadd.f32 %v4240_v40, %v5176_v49  ;;  %v2951_v42 = vpop.f32.mrb[165].mxu0 }
 0x558   : > { %v2952_v45 = vadd.f32 %v5176_v49, %v2951_v42  ;;  %v4241_v46 = vpop.f32.mrb[166].mxu0  ;;  %3393 = vadd.xlane.f32.xlu1 %v3392_v43  ;;  %3390 = vadd.xlane.f32.xlu0 %v3389_v44 }
 0x559   : > { %v2963_v47 = vadd.f32 %v4241_v46, %v5176_v49  ;;  %v2954_v48 = vpop.f32.mrb[167].mxu0  ;;  %v3100_v50 = vmax.f32 %v2960_v63, 0.0 }
 0x55a   : > { %v2955_v35 = vadd.f32 %v5176_v49, %v2954_v48  ;;  %v3098_v53 = vmax.f32 %v2952_v45, 0.0 }
 0x55b   : > { %v3101_v51 = vmax.f32 %v2963_v47, 0.0 }
 0x55c   : > { %v3099_v54 = vmax.f32 %v2955_v35, 0.0 }
 0x55d   : > { %v3145_v55 = vpack.c.bf16 %v3101_v51, %v3100_v50 }
 0x55e   : > { %v3144_v56 = vpack.c.bf16 %v3099_v54, %v3098_v53 }
 0x55f   : > { %v3199_v14 = vunpack.c.h.bf16 %v3145_v55  ;;  %v3198_v57 = vunpack.c.l.bf16 %v3145_v55 }
 0x560   : > { %v3197_v58 = vunpack.c.h.bf16 %v3144_v56  ;;  %v3196_v59 = vunpack.c.l.bf16 %v3144_v56 }
 0x561   : > { %v3267_v60 = vmul.f32 %v5187_v6, %v3199_v14  ;;  %v3266_v61 = vmul.f32 %v5187_v6, %v3198_v57 }
 0x562   : > { %v3265_v1 = vmul.f32 %v5187_v6, %v3197_v58  ;;  %v3264_v2 = vmul.f32 %v5187_v6, %v3196_v59 }
 0x563   : > { %v3410_v62 = vsel %vm3292_vm3, %v3267_v60, 0.0  ;;  %v3407_v0 = vsel %vm3292_vm3, %v3266_v61, 0.0 }
 0x564   : > { %3411 = vadd.xlane.f32.xlu1 %v3410_v62  ;;  %3408 = vadd.xlane.f32.xlu0 %v3407_v0  ;;  %v3404_v7 = vsel %vm3292_vm3, %v3265_v1, 0.0  ;;  %v3401_v8 = vsel %vm3292_vm3, %v3264_v2, 0.0 }
 0x566   : > { %v4244_v3 = vpop.f32.mrb[168].mxu0 }
 0x567   : > { %v2976_v4 = vadd.f32 %v4244_v3, %v5176_v49  ;;  %v2967_v5 = vpop.f32.mrb[169].mxu0 }
 0x568   : > { %v2968_v9 = vadd.f32 %v5176_v49, %v2967_v5  ;;  %v4245_v10 = vpop.f32.mrb[170].mxu0  ;;  %3405 = vadd.xlane.f32.xlu1 %v3404_v7  ;;  %3402 = vadd.xlane.f32.xlu0 %v3401_v8 }
 0x569   : > { %v2979_v11 = vadd.f32 %v4245_v10, %v5176_v49  ;;  %v2970_v12 = vpop.f32.mrb[171].mxu0  ;;  %v3104_v15 = vmax.f32 %v2976_v4, 0.0 }
 0x56a   : > { %v2971_v13 = vadd.f32 %v5176_v49, %v2970_v12  ;;  %v3102_v16 = vmax.f32 %v2968_v9, 0.0 }
 0x56b   : > { %v3105_v52 = vmax.f32 %v2979_v11, 0.0 }
 0x56c   : > { %v3103_v17 = vmax.f32 %v2971_v13, 0.0 }
 0x56d   : > { %v3147_v18 = vpack.c.bf16 %v3105_v52, %v3104_v15 }
 0x56e   : > { %v3146_v19 = vpack.c.bf16 %v3103_v17, %v3102_v16 }
 0x56f   : > { %v3203_v20 = vunpack.c.h.bf16 %v3147_v18  ;;  %v3202_v41 = vunpack.c.l.bf16 %v3147_v18 }
 0x570   : > { %v3201_v21 = vunpack.c.h.bf16 %v3146_v19  ;;  %v3200_v22 = vunpack.c.l.bf16 %v3146_v19 }
 0x571   : > { %v3271_v23 = vmul.f32 %v5187_v6, %v3203_v20  ;;  %v3270_v24 = vmul.f32 %v5187_v6, %v3202_v41 }
 0x572   : > { %v3269_v27 = vmul.f32 %v5187_v6, %v3201_v21  ;;  %v3268_v28 = vmul.f32 %v5187_v6, %v3200_v22 }
 0x573   : > { %v3422_v25 = vsel %vm3292_vm3, %v3271_v23, 0.0  ;;  %v3419_v26 = vsel %vm3292_vm3, %v3270_v24, 0.0 }
 0x574   : > { %3423 = vadd.xlane.f32.xlu1 %v3422_v25  ;;  %3420 = vadd.xlane.f32.xlu0 %v3419_v26  ;;  %v3416_v32 = vsel %vm3292_vm3, %v3269_v27, 0.0  ;;  %v3413_v33 = vsel %vm3292_vm3, %v3268_v28, 0.0 }
 0x576   : > { %v4248_v29 = vpop.f32.mrb[172].mxu0 }
 0x577   : > { %v2992_v30 = vadd.f32 %v4248_v29, %v5176_v49  ;;  %v2983_v31 = vpop.f32.mrb[173].mxu0 }
 0x578   : > { %v2984_v34 = vadd.f32 %v5176_v49, %v2983_v31  ;;  %v4249_v36 = vpop.f32.mrb[174].mxu0  ;;  %3417 = vadd.xlane.f32.xlu1 %v3416_v32  ;;  %3414 = vadd.xlane.f32.xlu0 %v3413_v33 }
 0x579   : > { %v2995_v37 = vadd.f32 %v4249_v36, %v5176_v49  ;;  %v2986_v38 = vpop.f32.mrb[175].mxu0  ;;  %v3108_v63 = vmax.f32 %v2992_v30, 0.0 }
 0x57a   : > { %v2987_v40 = vadd.f32 %v5176_v49, %v2986_v38  ;;  %v3106_v44 = vmax.f32 %v2984_v34, 0.0 }
 0x57b   : > { %v3109_v42 = vmax.f32 %v2995_v37, 0.0  ;;  %v3301_v43 = vpop.xlane.xlu1 %3300 }
 0x57c   : > { %v3107_v45 = vmax.f32 %v2987_v40, 0.0  ;;  %v3494_v46 = vadd.f32 %v5322_v39, %v3301_v43  ;;  %v3295_v47 = vpop.xlane.xlu0 %3294 }
 0x57d   : > { %v3149_v48 = vpack.c.bf16 %v3109_v42, %v3108_v63  ;;  %v3492_v35 = vadd.f32 %v5322_v39, %v3295_v47 }
 0x57e   : > { %v3148_v50 = vpack.c.bf16 %v3107_v45, %v3106_v44  ;;  %3559 = vst.msk [vmem:[%s5328_s22 + $0x10] sm:$0xff] %vm3556_vm4, %v3494_v46 }
 0x57f   : > { %3557 = vst.msk [vmem:[%s5328_s22] sm:$0xff] %vm3556_vm4, %v3492_v35  ;;  %v3304_v51 = vpop.xlane.xlu1 %3303  ;;  %v3207_v53 = vunpack.c.h.bf16 %v3149_v48  ;;  %v3206_v54 = vunpack.c.l.bf16 %v3149_v48 }
 0x580   : > { %v3495_v55 = vadd.f32 %v5322_v39, %v3304_v51  ;;  %v3298_v56 = vpop.xlane.xlu0 %3297  ;;  %v3205_v14 = vunpack.c.h.bf16 %v3148_v50  ;;  %v3204_v57 = vunpack.c.l.bf16 %v3148_v50 }
 0x581   : > { %v3493_v58 = vadd.f32 %v5322_v39, %v3298_v56  ;;  %v3275_v59 = vmul.f32 %v5187_v6, %v3207_v53  ;;  %v3274_v60 = vmul.f32 %v5187_v6, %v3206_v54 }
 0x582   : > { %3560 = vst.msk [vmem:[%s5328_s22 + $0x18] sm:$0xff] %vm3556_vm4, %v3495_v55  ;;  %v3273_v1 = vmul.f32 %v5187_v6, %v3205_v14  ;;  %v3272_v2 = vmul.f32 %v5187_v6, %v3204_v57 }
 0x583   : > { %3558 = vst.msk [vmem:[%s5328_s22 + $0x8] sm:$0xff] %vm3556_vm4, %v3493_v58  ;;  %v3316_v61 = vpop.xlane.xlu1 %3315  ;;  %v3434_v62 = vsel %vm3292_vm3, %v3275_v59, 0.0  ;;  %v3431_v0 = vsel %vm3292_vm3, %v3274_v60, 0.0 }
 0x584   : > { %v3499_v3 = vadd.f32 %v5322_v39, %v3316_v61  ;;  %3435 = vadd.xlane.f32.xlu1 %v3434_v62  ;;  %3432 = vadd.xlane.f32.xlu0 %v3431_v0  ;;  %v3313_v4 = vpop.xlane.xlu0 %3312  ;;  %v3428_v11 = vsel %vm3292_vm3, %v3273_v1, 0.0  ;;  %v3425_v12 = vsel %vm3292_vm3, %v3272_v2, 0.0 }
 0x585   : > { %v3498_v5 = vadd.f32 %v5322_v39, %v3313_v4 }
 0x586   : > { %3564 = vst.msk [vmem:[%s5328_s22 + $0x38] sm:$0xff] %vm3556_vm4, %v3499_v3  ;;  %v4252_v7 = vpop.f32.mrb[176].mxu0 }
 0x587   : > { %3563 = vst.msk [vmem:[%s5328_s22 + $0x30] sm:$0xff] %vm3556_vm4, %v3498_v5  ;;  %v3008_v8 = vadd.f32 %v4252_v7, %v5176_v49  ;;  %v2999_v9 = vpop.f32.mrb[177].mxu0  ;;  %v3310_v10 = vpop.xlane.xlu1 %3309 }
 0x588   : > { %v3000_v13 = vadd.f32 %v5176_v49, %v2999_v9  ;;  %v3497_v15 = vadd.f32 %v5322_v39, %v3310_v10  ;;  %v4253_v52 = vpop.f32.mrb[178].mxu0  ;;  %3429 = vadd.xlane.f32.xlu1 %v3428_v11  ;;  %3426 = vadd.xlane.f32.xlu0 %v3425_v12  ;;  %v3307_v16 = vpop.xlane.xlu0 %3306 }
 0x589   : > { %v3011_v17 = vadd.f32 %v4253_v52, %v5176_v49  ;;  %v3496_v18 = vadd.f32 %v5322_v39, %v3307_v16  ;;  %v3002_v19 = vpop.f32.mrb[179].mxu0  ;;  %v3112_v41 = vmax.f32 %v3008_v8, 0.0 }
 0x58a   : > { %3562 = vst.msk [vmem:[%s5328_s22 + $0x28] sm:$0xff] %vm3556_vm4, %v3497_v15  ;;  %v3003_v20 = vadd.f32 %v5176_v49, %v3002_v19  ;;  %v3110_v23 = vmax.f32 %v3000_v13, 0.0 }
 0x58b   : > { %v3113_v21 = vmax.f32 %v3011_v17, 0.0  ;;  %3561 = vst.msk [vmem:[%s5328_s22 + $0x20] sm:$0xff] %vm3556_vm4, %v3496_v18  ;;  %v3328_v22 = vpop.xlane.xlu1 %3327 }
 0x58c   : > { %v3111_v24 = vmax.f32 %v3003_v20, 0.0  ;;  %v3503_v25 = vadd.f32 %v5322_v39, %v3328_v22  ;;  %v3325_v26 = vpop.xlane.xlu0 %3324 }
 0x58d   : > { %v3151_v27 = vpack.c.bf16 %v3113_v21, %v3112_v41  ;;  %v3502_v28 = vadd.f32 %v5322_v39, %v3325_v26 }
 0x58e   : > { %v3150_v29 = vpack.c.bf16 %v3111_v24, %v3110_v23  ;;  %3568 = vst.msk [vmem:[%s5328_s22 + $0x58] sm:$0xff] %vm3556_vm4, %v3503_v25 }
 0x58f   : > { %3567 = vst.msk [vmem:[%s5328_s22 + $0x50] sm:$0xff] %vm3556_vm4, %v3502_v28  ;;  %v3322_v30 = vpop.xlane.xlu1 %3321  ;;  %v3211_v31 = vunpack.c.h.bf16 %v3151_v27  ;;  %v3210_v32 = vunpack.c.l.bf16 %v3151_v27 }
 0x590   : > { %v3501_v33 = vadd.f32 %v5322_v39, %v3322_v30  ;;  %v3319_v34 = vpop.xlane.xlu0 %3318  ;;  %v3209_v36 = vunpack.c.h.bf16 %v3150_v29  ;;  %v3208_v37 = vunpack.c.l.bf16 %v3150_v29 }
 0x591   : > { %v3500_v38 = vadd.f32 %v5322_v39, %v3319_v34  ;;  %v3279_v40 = vmul.f32 %v5187_v6, %v3211_v31  ;;  %v3278_v63 = vmul.f32 %v5187_v6, %v3210_v32 }
 0x592   : > { %3566 = vst.msk [vmem:[%s5328_s22 + $0x48] sm:$0xff] %vm3556_vm4, %v3501_v33  ;;  %v3277_v45 = vmul.f32 %v5187_v6, %v3209_v36  ;;  %v3276_v46 = vmul.f32 %v5187_v6, %v3208_v37 }
 0x593   : > { %3565 = vst.msk [vmem:[%s5328_s22 + $0x40] sm:$0xff] %vm3556_vm4, %v3500_v38  ;;  %v3340_v42 = vpop.xlane.xlu1 %3339  ;;  %v3446_v43 = vsel %vm3292_vm3, %v3279_v40, 0.0  ;;  %v3443_v44 = vsel %vm3292_vm3, %v3278_v63, 0.0 }
 0x594   : > { %v3507_v47 = vadd.f32 %v5322_v39, %v3340_v42  ;;  %3447 = vadd.xlane.f32.xlu1 %v3446_v43  ;;  %3444 = vadd.xlane.f32.xlu0 %v3443_v44  ;;  %v3337_v48 = vpop.xlane.xlu0 %3336  ;;  %v3440_v55 = vsel %vm3292_vm3, %v3277_v45, 0.0  ;;  %v3437_v56 = vsel %vm3292_vm3, %v3276_v46, 0.0 }
 0x595   : > { %v3506_v35 = vadd.f32 %v5322_v39, %v3337_v48 }
 0x596   : > { %3572 = vst.msk [vmem:[%s5328_s22 + $0x78] sm:$0xff] %vm3556_vm4, %v3507_v47  ;;  %v4256_v50 = vpop.f32.mrb[180].mxu0 }
 0x597   : > { %3571 = vst.msk [vmem:[%s5328_s22 + $0x70] sm:$0xff] %vm3556_vm4, %v3506_v35  ;;  %v3024_v51 = vadd.f32 %v4256_v50, %v5176_v49  ;;  %v3015_v53 = vpop.f32.mrb[181].mxu0  ;;  %v3334_v54 = vpop.xlane.xlu1 %3333 }
 0x598   : > { %v3016_v14 = vadd.f32 %v5176_v49, %v3015_v53  ;;  %v3505_v57 = vadd.f32 %v5322_v39, %v3334_v54  ;;  %v4257_v58 = vpop.f32.mrb[182].mxu0  ;;  %3441 = vadd.xlane.f32.xlu1 %v3440_v55  ;;  %3438 = vadd.xlane.f32.xlu0 %v3437_v56  ;;  %v3331_v59 = vpop.xlane.xlu0 %3330 }
 0x599   : > { %v3027_v60 = vadd.f32 %v4257_v58, %v5176_v49  ;;  %v3504_v61 = vadd.f32 %v5322_v39, %v3331_v59  ;;  %v3018_v62 = vpop.f32.mrb[183].mxu0  ;;  %v3116_v1 = vmax.f32 %v3024_v51, 0.0 }
 0x59a   : > { %3570 = vst.msk [vmem:[%s5328_s22 + $0x68] sm:$0xff] %vm3556_vm4, %v3505_v57  ;;  %v3019_v0 = vadd.f32 %v5176_v49, %v3018_v62  ;;  %v3114_v3 = vmax.f32 %v3016_v14, 0.0 }
 0x59b   : > { %v3117_v2 = vmax.f32 %v3027_v60, 0.0  ;;  %3569 = vst.msk [vmem:[%s5328_s22 + $0x60] sm:$0xff] %vm3556_vm4, %v3504_v61  ;;  %v4341_v61 = vld [vmem:[%s5600_s10] ss:$0 sm:$0xff] }
 0x59c   : > { %v3115_v4 = vmax.f32 %v3019_v0, 0.0 }
 0x59d   : > { %v3153_v5 = vpack.c.bf16 %v3117_v2, %v3116_v1 }
 0x59e   : > { %v3152_v7 = vpack.c.bf16 %v3115_v4, %v3114_v3 }
 0x59f   : > { %v3215_v8 = vunpack.c.h.bf16 %v3153_v5  ;;  %v3214_v9 = vunpack.c.l.bf16 %v3153_v5 }
 0x5a0   : > { %v3213_v10 = vunpack.c.h.bf16 %v3152_v7  ;;  %v3212_v11 = vunpack.c.l.bf16 %v3152_v7 }
 0x5a1   : > { %v3352_v12 = vpop.xlane.xlu1 %3351  ;;  %v3349_v13 = vpop.xlane.xlu0 %3348  ;;  %v3283_v15 = vmul.f32 %v5187_v6, %v3215_v8  ;;  %v3282_v52 = vmul.f32 %v5187_v6, %v3214_v9 }
 0x5a2   : > { %v3511_v16 = vadd.f32 %v5322_v39, %v3352_v12  ;;  %v3510_v17 = vadd.f32 %v5322_v39, %v3349_v13  ;;  %v3281_v20 = vmul.f32 %v5187_v6, %v3213_v10  ;;  %v3280_v41 = vmul.f32 %v5187_v6, %v3212_v11 }
 0x5a3   : > { %v3458_v18 = vsel %vm3292_vm3, %v3283_v15, 0.0  ;;  %v3455_v19 = vsel %vm3292_vm3, %v3282_v52, 0.0 }
 0x5a4   : > { %3576 = vst.msk [vmem:[%s5328_s22 + $0x98] sm:$0xff] %vm3556_vm4, %v3511_v16  ;;  %3575 = vst.msk [vmem:[%s5328_s22 + $0x90] sm:$0xff] %vm3556_vm4, %v3510_v17  ;;  %3459 = vadd.xlane.f32.xlu1 %v3458_v18  ;;  %3456 = vadd.xlane.f32.xlu0 %v3455_v19  ;;  %v3452_v28 = vsel %vm3292_vm3, %v3281_v20, 0.0  ;;  %v3449_v29 = vsel %vm3292_vm3, %v3280_v41, 0.0 }
 0x5a5   : > { %v3346_v21 = vpop.xlane.xlu1 %3345  ;;  %v3343_v22 = vpop.xlane.xlu0 %3342 }
 0x5a6   : > { %v3509_v23 = vadd.f32 %v5322_v39, %v3346_v21  ;;  %v3508_v24 = vadd.f32 %v5322_v39, %v3343_v22  ;;  %v4260_v25 = vpop.f32.mrb[192].mxu1 }
 0x5a7   : > { %v3040_v26 = vadd.f32 %v4260_v25, %v5176_v49  ;;  %v3031_v27 = vpop.f32.mrb[193].mxu1 }
 0x5a8   : > { %3574 = vst.msk [vmem:[%s5328_s22 + $0x88] sm:$0xff] %vm3556_vm4, %v3509_v23  ;;  %3573 = vst.msk [vmem:[%s5328_s22 + $0x80] sm:$0xff] %vm3556_vm4, %v3508_v24  ;;  %v3032_v30 = vadd.f32 %v5176_v49, %v3031_v27  ;;  %v4261_v31 = vpop.f32.mrb[194].mxu1  ;;  %3453 = vadd.xlane.f32.xlu1 %v3452_v28  ;;  %3450 = vadd.xlane.f32.xlu0 %v3449_v29 }
 0x5a9   : > { %v3043_v32 = vadd.f32 %v4261_v31, %v5176_v49  ;;  %v3034_v33 = vpop.f32.mrb[195].mxu1  ;;  %v3120_v36 = vmax.f32 %v3040_v26, 0.0 }
 0x5aa   : > { %v3035_v34 = vadd.f32 %v5176_v49, %v3034_v33  ;;  %v3118_v38 = vmax.f32 %v3032_v30, 0.0 }
 0x5ab   : > { %v3121_v37 = vmax.f32 %v3043_v32, 0.0 }
 0x5ac   : > { %v3119_v40 = vmax.f32 %v3035_v34, 0.0 }
 0x5ad   : > { %v3155_v63 = vpack.c.bf16 %v3121_v37, %v3120_v36 }
 0x5ae   : > { %v3154_v42 = vpack.c.bf16 %v3119_v40, %v3118_v38 }
 0x5af   : > { %v3219_v43 = vunpack.c.h.bf16 %v3155_v63  ;;  %v3218_v44 = vunpack.c.l.bf16 %v3155_v63 }
 0x5b0   : > { %v3217_v45 = vunpack.c.h.bf16 %v3154_v42  ;;  %v3216_v46 = vunpack.c.l.bf16 %v3154_v42 }
 0x5b1   : > { %v3364_v47 = vpop.xlane.xlu1 %3363  ;;  %v3361_v48 = vpop.xlane.xlu0 %3360  ;;  %v3287_v35 = vmul.f32 %v5187_v6, %v3219_v43  ;;  %v3286_v50 = vmul.f32 %v5187_v6, %v3218_v44 }
 0x5b2   : > { %v3515_v49 = vadd.f32 %v5322_v39, %v3364_v47  ;;  %v3514_v51 = vadd.f32 %v5322_v39, %v3361_v48  ;;  %v3285_v55 = vmul.f32 %v5187_v6, %v3217_v45  ;;  %v3284_v56 = vmul.f32 %v5187_v6, %v3216_v46 }
 0x5b3   : > { %v3470_v53 = vsel %vm3292_vm3, %v3287_v35, 0.0  ;;  %v3467_v54 = vsel %vm3292_vm3, %v3286_v50, 0.0 }
 0x5b4   : > { %3580 = vst.msk [vmem:[%s5328_s22 + $0xb8] sm:$0xff] %vm3556_vm4, %v3515_v49  ;;  %3579 = vst.msk [vmem:[%s5328_s22 + $0xb0] sm:$0xff] %vm3556_vm4, %v3514_v51  ;;  %3471 = vadd.xlane.f32.xlu1 %v3470_v53  ;;  %3468 = vadd.xlane.f32.xlu0 %v3467_v54  ;;  %v3464_v1 = vsel %vm3292_vm3, %v3285_v55, 0.0  ;;  %v3461_v2 = vsel %vm3292_vm3, %v3284_v56, 0.0 }
 0x5b5   : > { %v3358_v14 = vpop.xlane.xlu1 %3357  ;;  %v3355_v57 = vpop.xlane.xlu0 %3354 }
 0x5b6   : > { %v3513_v58 = vadd.f32 %v5322_v39, %v3358_v14  ;;  %v3512_v59 = vadd.f32 %v5322_v39, %v3355_v57  ;;  %v4264_v60 = vpop.f32.mrb[196].mxu1 }
 0x5b7   : > { %v3056_v62 = vadd.f32 %v4341_v61, %v4264_v60  ;;  %v3047_v0 = vpop.f32.mrb[197].mxu1 }
 0x5b8   : > { %3578 = vst.msk [vmem:[%s5328_s22 + $0xa8] sm:$0xff] %vm3556_vm4, %v3513_v58  ;;  %3577 = vst.msk [vmem:[%s5328_s22 + $0xa0] sm:$0xff] %vm3556_vm4, %v3512_v59  ;;  %v3048_v3 = vadd.f32 %v4341_v61, %v3047_v0  ;;  %v4265_v4 = vpop.f32.mrb[198].mxu1  ;;  %3465 = vadd.xlane.f32.xlu1 %v3464_v1  ;;  %3462 = vadd.xlane.f32.xlu0 %v3461_v2 }
 0x5b9   : > { %v3059_v5 = vadd.f32 %v4341_v61, %v4265_v4  ;;  %v3050_v7 = vpop.f32.mrb[199].mxu1  ;;  %v3124_v9 = vmax.f32 %v3056_v62, 0.0 }
 0x5ba   : > { %v3051_v8 = vadd.f32 %v4341_v61, %v3050_v7  ;;  %v3122_v11 = vmax.f32 %v3048_v3, 0.0 }
 0x5bb   : > { %v3125_v10 = vmax.f32 %v3059_v5, 0.0 }
 0x5bc   : > { %v3123_v12 = vmax.f32 %v3051_v8, 0.0 }
 0x5bd   : > { %v3157_v13 = vpack.c.bf16 %v3125_v10, %v3124_v9 }
 0x5be   : > { %v3156_v15 = vpack.c.bf16 %v3123_v12, %v3122_v11 }
 0x5bf   : > { %v3223_v17 = vunpack.c.h.bf16 %v3157_v13  ;;  %v3222_v18 = vunpack.c.l.bf16 %v3157_v13 }
 0x5c0   : > { %v3221_v52 = vunpack.c.h.bf16 %v3156_v15  ;;  %v3220_v16 = vunpack.c.l.bf16 %v3156_v15 }
 0x5c1   : > { %v3376_v19 = vpop.xlane.xlu1 %3375  ;;  %v3373_v20 = vpop.xlane.xlu0 %3372  ;;  %v3291_v26 = vmul.f32 %v5187_v6, %v3223_v17  ;;  %v3290_v27 = vmul.f32 %v5187_v6, %v3222_v18 }
 0x5c2   : > { %v3519_v41 = vadd.f32 %v5322_v39, %v3376_v19  ;;  %v3518_v21 = vadd.f32 %v5322_v39, %v3373_v20  ;;  %v3289_v22 = vmul.f32 %v5187_v6, %v3221_v52  ;;  %v3288_v23 = vmul.f32 %v5187_v6, %v3220_v16 }
 0x5c3   : > { %v3482_v32 = vsel %vm3292_vm3, %v3291_v26, 0.0  ;;  %v3479_v6 = vsel %vm3292_vm3, %v3290_v27, 0.0 }
 0x5c4   : > { %3584 = vst.msk [vmem:[%s5328_s22 + $0xd8] sm:$0xff] %vm3556_vm4, %v3519_v41  ;;  %3583 = vst.msk [vmem:[%s5328_s22 + $0xd0] sm:$0xff] %vm3556_vm4, %v3518_v21  ;;  %v3476_v24 = vsel %vm3292_vm3, %v3289_v22, 0.0  ;;  %v3473_v25 = vsel %vm3292_vm3, %v3288_v23, 0.0 }
 0x5c5   : > { %3477 = vadd.xlane.f32.xlu1 %v3476_v24  ;;  %v3370_v28 = vpop.xlane.xlu1 %3369  ;;  %3474 = vadd.xlane.f32.xlu0 %v3473_v25  ;;  %v3367_v29 = vpop.xlane.xlu0 %3366 }
 0x5c6   : > { %v3517_v30 = vadd.f32 %v5322_v39, %v3370_v28  ;;  %v3516_v31 = vadd.f32 %v5322_v39, %v3367_v29 }
 0x5c8   : > { %3582 = vst.msk [vmem:[%s5328_s22 + $0xc8] sm:$0xff] %vm3556_vm4, %v3517_v30  ;;  %3581 = vst.msk [vmem:[%s5328_s22 + $0xc0] sm:$0xff] %vm3556_vm4, %v3516_v31 }
 0x5c9   : > { %3483 = vadd.xlane.f32.xlu1 %v3482_v32  ;;  %3480 = vadd.xlane.f32.xlu0 %v3479_v6 }
 0x5d1   : > { %v3388_v33 = vpop.xlane.xlu1 %3387  ;;  %v3385_v34 = vpop.xlane.xlu0 %3384 }
 0x5d2   : > { %v3523_v36 = vadd.f32 %v5322_v39, %v3388_v33  ;;  %v3522_v37 = vadd.f32 %v5322_v39, %v3385_v34 }
 0x5d4   : > { %3588 = vst.msk [vmem:[%s5328_s22 + $0xf8] sm:$0xff] %vm3556_vm4, %v3523_v36  ;;  %3587 = vst.msk [vmem:[%s5328_s22 + $0xf0] sm:$0xff] %vm3556_vm4, %v3522_v37 }
 0x5d5   : > { %v3382_v38 = vpop.xlane.xlu1 %3381  ;;  %v3379_v40 = vpop.xlane.xlu0 %3378 }
 0x5d6   : > { %v3521_v63 = vadd.f32 %v5322_v39, %v3382_v38  ;;  %v3520_v42 = vadd.f32 %v5322_v39, %v3379_v40 }
 0x5d8   : > { %3586 = vst.msk [vmem:[%s5328_s22 + $0xe8] sm:$0xff] %vm3556_vm4, %v3521_v63  ;;  %3585 = vst.msk [vmem:[%s5328_s22 + $0xe0] sm:$0xff] %vm3556_vm4, %v3520_v42 }
 0x5e1   : > { %v3400_v43 = vpop.xlane.xlu1 %3399  ;;  %v3397_v44 = vpop.xlane.xlu0 %3396 }
 0x5e2   : > { %v3527_v45 = vadd.f32 %v5322_v39, %v3400_v43  ;;  %v3526_v46 = vadd.f32 %v5322_v39, %v3397_v44 }
 0x5e4   : > { %3592 = vst.msk [vmem:[%s5328_s22 + $0x118] sm:$0xff] %vm3556_vm4, %v3527_v45  ;;  %3591 = vst.msk [vmem:[%s5328_s22 + $0x110] sm:$0xff] %vm3556_vm4, %v3526_v46 }
 0x5e5   : > { %v3394_v47 = vpop.xlane.xlu1 %3393  ;;  %v3391_v48 = vpop.xlane.xlu0 %3390 }
 0x5e6   : > { %v3525_v35 = vadd.f32 %v5322_v39, %v3394_v47  ;;  %v3524_v50 = vadd.f32 %v5322_v39, %v3391_v48 }
 0x5e8   : > { %3590 = vst.msk [vmem:[%s5328_s22 + $0x108] sm:$0xff] %vm3556_vm4, %v3525_v35  ;;  %3589 = vst.msk [vmem:[%s5328_s22 + $0x100] sm:$0xff] %vm3556_vm4, %v3524_v50 }
 0x5f1   : > { %v3412_v49 = vpop.xlane.xlu1 %3411  ;;  %v3409_v51 = vpop.xlane.xlu0 %3408 }
 0x5f2   : > { %v3531_v53 = vadd.f32 %v5322_v39, %v3412_v49  ;;  %v3530_v54 = vadd.f32 %v5322_v39, %v3409_v51 }
 0x5f4   : > { %3596 = vst.msk [vmem:[%s5328_s22 + $0x138] sm:$0xff] %vm3556_vm4, %v3531_v53  ;;  %3595 = vst.msk [vmem:[%s5328_s22 + $0x130] sm:$0xff] %vm3556_vm4, %v3530_v54 }
 0x5f5   : > { %v3406_v55 = vpop.xlane.xlu1 %3405  ;;  %v3403_v56 = vpop.xlane.xlu0 %3402 }
 0x5f6   : > { %v3529_v14 = vadd.f32 %v5322_v39, %v3406_v55  ;;  %v3528_v57 = vadd.f32 %v5322_v39, %v3403_v56 }
 0x5f8   : > { %3594 = vst.msk [vmem:[%s5328_s22 + $0x128] sm:$0xff] %vm3556_vm4, %v3529_v14  ;;  %3593 = vst.msk [vmem:[%s5328_s22 + $0x120] sm:$0xff] %vm3556_vm4, %v3528_v57 }
 0x601   : > { %v3424_v58 = vpop.xlane.xlu1 %3423  ;;  %v3421_v59 = vpop.xlane.xlu0 %3420 }
 0x602   : > { %v3535_v60 = vadd.f32 %v5322_v39, %v3424_v58  ;;  %v3534_v61 = vadd.f32 %v5322_v39, %v3421_v59 }
 0x604   : > { %3600 = vst.msk [vmem:[%s5328_s22 + $0x158] sm:$0xff] %vm3556_vm4, %v3535_v60  ;;  %3599 = vst.msk [vmem:[%s5328_s22 + $0x150] sm:$0xff] %vm3556_vm4, %v3534_v61 }
 0x605   : > { %v3418_v62 = vpop.xlane.xlu1 %3417  ;;  %v3415_v0 = vpop.xlane.xlu0 %3414 }
 0x606   : > { %v3533_v1 = vadd.f32 %v5322_v39, %v3418_v62  ;;  %v3532_v2 = vadd.f32 %v5322_v39, %v3415_v0 }
 0x608   : > { %3598 = vst.msk [vmem:[%s5328_s22 + $0x148] sm:$0xff] %vm3556_vm4, %v3533_v1  ;;  %3597 = vst.msk [vmem:[%s5328_s22 + $0x140] sm:$0xff] %vm3556_vm4, %v3532_v2 }
 0x611   : > { %v3436_v3 = vpop.xlane.xlu1 %3435  ;;  %v3433_v4 = vpop.xlane.xlu0 %3432 }
 0x612   : > { %v3539_v5 = vadd.f32 %v5322_v39, %v3436_v3  ;;  %v3538_v7 = vadd.f32 %v5322_v39, %v3433_v4 }
 0x614   : > { %3604 = vst.msk [vmem:[%s5328_s22 + $0x178] sm:$0xff] %vm3556_vm4, %v3539_v5  ;;  %3603 = vst.msk [vmem:[%s5328_s22 + $0x170] sm:$0xff] %vm3556_vm4, %v3538_v7 }
 0x615   : > { %v3430_v8 = vpop.xlane.xlu1 %3429  ;;  %v3427_v9 = vpop.xlane.xlu0 %3426 }
 0x616   : > { %v3537_v10 = vadd.f32 %v5322_v39, %v3430_v8  ;;  %v3536_v11 = vadd.f32 %v5322_v39, %v3427_v9 }
 0x618   : > { %3602 = vst.msk [vmem:[%s5328_s22 + $0x168] sm:$0xff] %vm3556_vm4, %v3537_v10  ;;  %3601 = vst.msk [vmem:[%s5328_s22 + $0x160] sm:$0xff] %vm3556_vm4, %v3536_v11 }
 0x621   : > { %v3448_v12 = vpop.xlane.xlu1 %3447  ;;  %v3445_v13 = vpop.xlane.xlu0 %3444 }
 0x622   : > { %v3543_v15 = vadd.f32 %v5322_v39, %v3448_v12  ;;  %v3542_v52 = vadd.f32 %v5322_v39, %v3445_v13 }
 0x624   : > { %3608 = vst.msk [vmem:[%s5328_s22 + $0x198] sm:$0xff] %vm3556_vm4, %v3543_v15  ;;  %3607 = vst.msk [vmem:[%s5328_s22 + $0x190] sm:$0xff] %vm3556_vm4, %v3542_v52 }
 0x625   : > { %v3442_v16 = vpop.xlane.xlu1 %3441  ;;  %v3439_v17 = vpop.xlane.xlu0 %3438 }
 0x626   : > { %v3541_v18 = vadd.f32 %v5322_v39, %v3442_v16  ;;  %v3540_v19 = vadd.f32 %v5322_v39, %v3439_v17 }
 0x628   : > { %3606 = vst.msk [vmem:[%s5328_s22 + $0x188] sm:$0xff] %vm3556_vm4, %v3541_v18  ;;  %3605 = vst.msk [vmem:[%s5328_s22 + $0x180] sm:$0xff] %vm3556_vm4, %v3540_v19 }
 0x631   : > { %v3460_v20 = vpop.xlane.xlu1 %3459  ;;  %v3457_v41 = vpop.xlane.xlu0 %3456 }
 0x632   : > { %v3547_v21 = vadd.f32 %v5322_v39, %v3460_v20  ;;  %v3546_v22 = vadd.f32 %v5322_v39, %v3457_v41 }
 0x634   : > { %3612 = vst.msk [vmem:[%s5328_s22 + $0x1b8] sm:$0xff] %vm3556_vm4, %v3547_v21  ;;  %3611 = vst.msk [vmem:[%s5328_s22 + $0x1b0] sm:$0xff] %vm3556_vm4, %v3546_v22 }
 0x635   : > { %v3454_v23 = vpop.xlane.xlu1 %3453  ;;  %v3451_v24 = vpop.xlane.xlu0 %3450 }
 0x636   : > { %v3545_v25 = vadd.f32 %v5322_v39, %v3454_v23  ;;  %v3544_v26 = vadd.f32 %v5322_v39, %v3451_v24 }
 0x638   : > { %3610 = vst.msk [vmem:[%s5328_s22 + $0x1a8] sm:$0xff] %vm3556_vm4, %v3545_v25  ;;  %3609 = vst.msk [vmem:[%s5328_s22 + $0x1a0] sm:$0xff] %vm3556_vm4, %v3544_v26 }
 0x641   : > { %v3472_v27 = vpop.xlane.xlu1 %3471  ;;  %v3469_v28 = vpop.xlane.xlu0 %3468 }
 0x642   : > { %v3551_v29 = vadd.f32 %v5322_v39, %v3472_v27  ;;  %v3550_v30 = vadd.f32 %v5322_v39, %v3469_v28 }
 0x644   : > { %3616 = vst.msk [vmem:[%s5328_s22 + $0x1d8] sm:$0xff] %vm3556_vm4, %v3551_v29  ;;  %3615 = vst.msk [vmem:[%s5328_s22 + $0x1d0] sm:$0xff] %vm3556_vm4, %v3550_v30 }
 0x645   : > { %v3466_v31 = vpop.xlane.xlu1 %3465  ;;  %v3463_v32 = vpop.xlane.xlu0 %3462 }
 0x646   : > { %v3549_v6 = vadd.f32 %v5322_v39, %v3466_v31  ;;  %v3548_v33 = vadd.f32 %v5322_v39, %v3463_v32 }
 0x648   : > { %3614 = vst.msk [vmem:[%s5328_s22 + $0x1c8] sm:$0xff] %vm3556_vm4, %v3549_v6  ;;  %3613 = vst.msk [vmem:[%s5328_s22 + $0x1c0] sm:$0xff] %vm3556_vm4, %v3548_v33 }
 0x652   : > { %v3478_v34 = vpop.xlane.xlu1 %3477  ;;  %v3475_v36 = vpop.xlane.xlu0 %3474 }
 0x653   : > { %v3553_v37 = vadd.f32 %v5322_v39, %v3478_v34  ;;  %v3552_v38 = vadd.f32 %v5322_v39, %v3475_v36 }
 0x655   : > { %3618 = vst.msk [vmem:[%s5328_s22 + $0x1e8] sm:$0xff] %vm3556_vm4, %v3553_v37  ;;  %3617 = vst.msk [vmem:[%s5328_s22 + $0x1e0] sm:$0xff] %vm3556_vm4, %v3552_v38 }
 0x656   : > { %v3484_v40 = vpop.xlane.xlu1 %3483  ;;  %v3481_v63 = vpop.xlane.xlu0 %3480 }
 0x657   : > { %v3555_v42 = vadd.f32 %v5322_v39, %v3484_v40  ;;  %v3554_v43 = vadd.f32 %v5322_v39, %v3481_v63 }
 0x659   : > { %3620 = vst.msk [vmem:[%s5328_s22 + $0x1f8] sm:$0xff] %vm3556_vm4, %v3555_v42  ;;  %3619 = vst.msk [vmem:[%s5328_s22 + $0x1f0] sm:$0xff] %vm3556_vm4, %v3554_v43 }
 0x65a PF: > { %p25_p8 = scmp.ge.s32.totalorder %s4505_s14, 4   ;;  %s5607_s27 = smov %s4398_s28 }
 0x65b   : > { %s5608_s28 = smov %s4402_s29  ;;  %s5609_s29 = smov %s4515_s17 }
 0x65c   : > { %s5610_s30 = smov %s4505_s14  ;;  %27 = sbr.rel (!%p25_p8) target bundleno = 6 (0x6), region = 112 }
 0x663   :  { %3643 = vsyncpa [#allocation4], 1 }
 0x664   :  { %3645 = vsyncpa [#allocation4 + $0x1], 1 }

</bundles_post_ra>
